<compile_context>
chip_gen: v7x
topology: tpu7x:2x2x1
jax: 0.10.0
libtpu: 0.0.40
codegen_flags: <defaults>
</compile_context>

<pallas_src>
import functools

import jax
import jax.numpy as jnp
from jax.experimental import pallas as pl
from jax.experimental.pallas import tpu as pltpu


# --------------------------------------------------------------------------- #
# Helpers
# --------------------------------------------------------------------------- #
def _edge_row_mask(m_rows, h, offset):
    """Bool (m_rows, 1) mask marking flat rows i with i % h == offset.

    h / offset / m_rows are trace-time Python ints, so this is a short chain of
    VPU compares + ors (no integer division on the vector unit).
    """
    row = jax.lax.broadcasted_iota(jnp.int32, (m_rows, 1), 0)
    mask = row == offset
    r = h + offset
    while r < m_rows:
        mask = jnp.logical_or(mask, row == r)
        r += h
    return mask


# --------------------------------------------------------------------------- #
# Fused DPCNN kernel (`bt` batch elements folded into each grid step)
# --------------------------------------------------------------------------- #
def _dpcnn_kernel(emb_ref, wr_ref, br_ref, wc_ref, bc_ref, wo_ref, bo_ref,
                  out_ref, pad_ref, col_ref, pool_ref, pout_ref, *, bt, seq):
    # emb_ref : (bt*W, E) f32   embedded tokens, bt examples back-to-back
    # wr_ref  : (3E, C)  bf16   region-conv weight, im2col layout
    # wc_ref  : (3C, C)  bf16   conv3 weight, im2col layout
    # br/bc   : (1, C)   f32    biases
    # wo_ref  : (C, n)   f32,  bo_ref: (1, n) f32
    # out_ref : (bt, n)  f32
    # pad_ref : (bt*H0+2, C) f32 VMEM   zero-halo flat activation (conv shifts)
    # col_ref : (bt*H0, 3E)  f32 VMEM   region-conv im2col staging
    # pool_ref: (bt*H0+2, C) f32 VMEM   maxpool input staging
    # pout_ref: (bt*H0, C)   f32 VMEM   maxpool output staging
    E = emb_ref.shape[1]
    C = wc_ref.shape[1]
    H0 = seq - 2
    M0 = bt * H0
    cdt = wc_ref.dtype                         # MXU compute dtype (bf16)
    zrow = jnp.zeros((1, C), jnp.float32)

    # Top zero halo: written once per invocation; conv3 never touches row 0.
    pad_ref[0:1, :] = zrow

    # ---- region embedding conv ---------------------------------------------
    # Per-example im2col (3 shifted copies, runs ONCE per grid step), then one
    # (bt*H0, 3E) @ (3E, C) matmul.
    for b in range(bt):
        s = b * seq
        d = b * H0
        col_ref[d:d + H0, 0:E] = emb_ref[s:s + H0, :]
        col_ref[d:d + H0, E:2 * E] = emb_ref[s + 1:s + H0 + 1, :]
        col_ref[d:d + H0, 2 * E:3 * E] = emb_ref[s + 2:s + H0 + 2, :]
    x = jnp.dot(col_ref[...].astype(cdt), wr_ref[...],
                preferred_element_type=jnp.float32) + br_ref[...]

    # ---- conv3: ZeroPad2d((0,0,1,1)) -> ReLU -> Conv2d(C,C,(3,1)) ----------
    def conv3(x, h):
        m = bt * h
        xa = jnp.maximum(x, 0.0)                       # ReLU, f32 (VPU)
        pad_ref[1:m + 1, :] = xa                       # dense body store
        pad_ref[m + 1:m + 2, :] = zrow                 # re-zero bottom halo (h shrinks)
        up = pad_ref[0:m, :]                           # flat row i-1
        down = pad_ref[2:m + 2, :]                     # flat row i+1
        if bt > 1:                                     # per-example zero halos at fold
            up = jnp.where(_edge_row_mask(m, h, 0), 0.0, up)       # boundaries
            down = jnp.where(_edge_row_mask(m, h, h - 1), 0.0, down)
        # value-level im2col: lane concat of 128-aligned pieces stays in vregs
        col = jnp.concatenate([up, xa, down], axis=1)  # (m, 3C) f32
        return jnp.dot(col.astype(cdt), wc_ref[...],
                       preferred_element_type=jnp.float32) + bc_ref[...]

    # ---- maxpool: ZeroPad2d((0,0,0,1)) -> MaxPool2d((3,1), stride=2) -------
    def maxpool(x, h):
        m = bt * h
        hout = (h - 2) // 2 + 1
        pool_ref[0:m, :] = x
        for b in range(bt):
            base = b * h
            r0 = pool_ref[pl.ds(base + 0, hout, stride=2), :]
            r1 = pool_ref[pl.ds(base + 1, hout, stride=2), :]
            r2 = pool_ref[pl.ds(base + 2, hout, stride=2), :]
            if h % 2 == 0:
                # For even h the last window's 3rd row is the per-example zero
                # pad, not whatever sits at flat row base + h.
                t = jax.lax.broadcasted_iota(jnp.int32, (hout, 1), 0)
                r2 = jnp.where(t == hout - 1, 0.0, r2)
            pout_ref[b * hout:(b + 1) * hout, :] = jnp.maximum(
                jnp.maximum(r0, r1), r2)
        return pout_ref[0:bt * hout, :], hout

    # ---- two pre-block conv units, then the pyramid (trace-time unrolled) ---
    x = conv3(x, H0)
    x = conv3(x, H0)
    h = H0
    while h > 2:
        px, h = maxpool(x, h)
        y = conv3(px, h)
        y = conv3(y, h)
        x = y + px                                     # residual, f32
    assert h == 1, "sequence length must reduce to a single position"

    # ---- head: Linear(C, n) + exact, numerically stable sigmoid -------------
    logits = jnp.dot(x, wo_ref[...],
                     preferred_element_type=jnp.float32) + bo_ref[...]
    ez = jnp.exp(-jnp.abs(logits))                     # EUP
    num = jnp.where(logits >= 0, 1.0, ez)
    out_ref[...] = num / (1.0 + ez)                    # exact divide (review)


# --------------------------------------------------------------------------- #
# Wrapper
# --------------------------------------------------------------------------- #
def _pick_block_batch(batch, h0):
    """Fold enough examples per grid step that conv matmul M ~ 128-256 rows,
    while keeping >= 2 parallel grid steps so both v7x TensorCores get work."""
    target_rows = 256
    bt = max(1, min(batch, target_rows // max(h0, 1)))
    while batch % bt:
        bt -= 1
    if batch // bt < 2 and batch >= 2:
        bt = max(1, bt // 2)
        while batch % bt:
            bt -= 1
    return bt


def dpcnn_forward(tokens, params, *, block_batch=None):
    """Embedding gather in plain JAX; everything else in ONE pallas_call with
    `block_batch` examples folded into each matmul's M axis."""
    emb = jnp.take(params["emb"], tokens, axis=0)          # (B, W, E) f32
    B, W, E = emb.shape
    C = params["w_conv3"].shape[1]
    n_out = params["w_out"].shape[1]
    H0 = W - 2

    bt = _pick_block_batch(B, H0) if block_batch is None else block_batch
    assert B % bt == 0, (B, bt)
    nsteps = B // bt
    M0 = bt * H0

    # group `bt` consecutive examples per grid step; kernel works on 2-D slabs.
    emb = emb.reshape(nsteps, bt * W, E)

    out = pl.pallas_call(
        functools.partial(_dpcnn_kernel, bt=bt, seq=W),
        out_shape=jax.ShapeDtypeStruct((nsteps, bt, n_out), jnp.float32),
        grid=(nsteps,),
        in_specs=[
            pl.BlockSpec((None, bt * W, E), lambda i: (i, 0, 0)),  # folded emb
            pl.BlockSpec((3 * E, C), lambda i: (0, 0)),            # weights are
            pl.BlockSpec((1, C), lambda i: (0, 0)),                #   DMA'd once
            pl.BlockSpec((3 * C, C), lambda i: (0, 0)),            #   (constant
            pl.BlockSpec((1, C), lambda i: (0, 0)),                #    index map)
            pl.BlockSpec((C, n_out), lambda i: (0, 0)),
            pl.BlockSpec((1, n_out), lambda i: (0, 0)),
        ],
        out_specs=pl.BlockSpec((None, bt, n_out), lambda i: (i, 0, 0)),
        scratch_shapes=[
            pltpu.VMEM((M0 + 2, C), jnp.float32),    # pad_ref : zero-halo activation
            pltpu.VMEM((M0, 3 * E), jnp.float32),    # col_ref : region-conv im2col
            pltpu.VMEM((M0 + 2, C), jnp.float32),    # pool_ref: maxpool input staging
            pltpu.VMEM((M0, C), jnp.float32),        # pout_ref: maxpool output staging
        ],
        compiler_params=pltpu.CompilerParams(
            dimension_semantics=("parallel",)),      # folded batch across TCs (v7x)
    )(emb, params["w_region"], params["b_region"],
      params["w_conv3"], params["b_conv3"],
      params["w_out"], params["b_out"])
    return out.reshape(B, n_out)


# --------------------------------------------------------------------------- #
# Parameters (im2col layout, bf16 matmul weights) + pure-JAX reference
# --------------------------------------------------------------------------- #
def init_params(key, vocab, emb_dim, channels, n_classes=2,
                compute_dtype=jnp.bfloat16):
    ks = jax.random.split(key, 7)

    def rnd(k, shape, scale=0.1):
        return (scale * jax.random.normal(k, shape)).astype(jnp.float32)

    return dict(
        emb=rnd(ks[0], (vocab, emb_dim), 1.0),                        # Embedding
        # conv weights pre-reshaped to im2col layout (row = k*D + d_in) and
        # pre-cast to the MXU compute dtype once, at init.
        w_region=rnd(ks[1], (3, emb_dim, channels))
            .reshape(3 * emb_dim, channels).astype(compute_dtype),    # Conv2d(1,C,(3,E))
        b_region=rnd(ks[2], (1, channels)),
        w_conv3=rnd(ks[3], (3, channels, channels))
            .reshape(3 * channels, channels).astype(compute_dtype),   # Conv2d(C,C,(3,1))
        b_conv3=rnd(ks[4], (1, channels)),
        w_out=rnd(ks[5], (channels, n_classes)),                      # Linear(C,2)
        b_out=rnd(ks[6], (1, n_classes)),
    )


def dpcnn_reference(tokens, params):
    """Plain-JAX reference mirroring the PyTorch module (same dtype policy)."""
    emb = jnp.take(params["emb"], tokens, axis=0)                     # (B, W, E)
    B, W, E = emb.shape
    C = params["w_conv3"].shape[1]
    cdt = params["w_conv3"].dtype
    wr = params["w_region"].reshape(3, E, C)
    wc = params["w_conv3"].reshape(3, C, C)

    def tap_conv(xpad, w3, b):
        H = xpad.shape[1] - 2
        acc = jnp.zeros((B, H, w3.shape[-1]), jnp.float32)
        for k in range(3):
            acc = acc + jnp.einsum("bhd,dc->bhc",
                                   xpad[:, k:k + H, :].astype(cdt), w3[k],
                                   preferred_element_type=jnp.float32)
        return acc + b

    def conv3(x):
        xp = jnp.pad(jnp.maximum(x, 0.0), ((0, 0), (1, 1), (0, 0)))
        return tap_conv(xp, wc, params["b_conv3"])

    def maxpool(x):
        H = x.shape[1]
        Hout = (H - 2) // 2 + 1
        xp = jnp.pad(x, ((0, 0), (0, 2), (0, 0)))
        r0 = xp[:, 0:2 * Hout:2, :]
        r1 = xp[:, 1:2 * Hout + 1:2, :]
        r2 = xp[:, 2:2 * Hout + 2:2, :]
        return jnp.maximum(jnp.maximum(r0, r1), r2)

    x = tap_conv(emb, wr, params["b_region"])     # region conv (no padding)
    x = conv3(x)
    x = conv3(x)
    while x.shape[1] > 2:
        px = maxpool(x)
        x = conv3(conv3(px)) + px
    logits = x.reshape(B, C) @ params["w_out"] + params["b_out"]
    return jax.nn.sigmoid(logits)


if __name__ == "__main__":
    key = jax.random.PRNGKey(0)
    k_tok, k_par = jax.random.split(key)

    # Small but lane-dense stand-ins for the real model (channel_size=250,
    # emb_dim=300): C = E = 128 keeps every vreg / MXU tile fully occupied.
    # B=16 with seq_len=16 folds to bt=8 per grid step (conv matmul M=112)
    # across grid=(2,) parallel steps.
    B, seq_len = 16, 16                      # H: 14 -> 7 -> 3 -> 1
    vocab, emb_dim, channels = 50, 128, 128

    tokens = jax.random.randint(k_tok, (B, seq_len), 0, vocab, dtype=jnp.int32)
    params = init_params(k_par, vocab, emb_dim, channels)

    out = jax.block_until_ready(jax.jit(dpcnn_forward)(tokens, params))
    ref = dpcnn_reference(tokens, params)

    assert out.shape == (B, 2)
    assert bool(jnp.all(jnp.isfinite(out)))
    assert bool(jnp.allclose(out, ref, atol=1e-1, rtol=1e-1)), (out, ref)
    print("KERNEL_OK")
</pallas_src>

<mosaic_0001>
module attributes {stable_mosaic.version = 11 : i64} {
  func.func @_dpcnn_kernel(%arg0: i32, %arg1: memref<1x128x128xf32, #tpu.memory_space<vmem>>, %arg2: memref<384x128xbf16, #tpu.memory_space<vmem>>, %arg3: memref<1x128xf32, #tpu.memory_space<vmem>>, %arg4: memref<384x128xbf16, #tpu.memory_space<vmem>>, %arg5: memref<1x128xf32, #tpu.memory_space<vmem>>, %arg6: memref<128x2xf32, #tpu.memory_space<vmem>>, %arg7: memref<1x2xf32, #tpu.memory_space<vmem>>, %arg8: memref<1x8x2xf32, #tpu.memory_space<vmem>>, %arg9: memref<114x128xf32, #tpu.memory_space<vmem>>, %arg10: memref<112x384xf32, #tpu.memory_space<vmem>>, %arg11: memref<114x128xf32, #tpu.memory_space<vmem>>, %arg12: memref<112x128xf32, #tpu.memory_space<vmem>>) attributes {dimension_semantics = [#tpu.dimension_semantics<parallel>], iteration_bounds = array<i64: 2>, scalar_prefetch = 0 : i64, scratch_operands = 4 : i64, tpu.core_type = #tpu.core_type<tc>, window_params = [{transform_indices = @transform_0, window_bounds = array<i64: 1, 128, 128>}, {pipeline_mode = #tpu.pipeline_mode<synchronous>, transform_indices = @transform_1, window_bounds = array<i64: 384, 128>}, {pipeline_mode = #tpu.pipeline_mode<synchronous>, transform_indices = @transform_2, window_bounds = array<i64: 1, 128>}, {pipeline_mode = #tpu.pipeline_mode<synchronous>, transform_indices = @transform_3, window_bounds = array<i64: 384, 128>}, {pipeline_mode = #tpu.pipeline_mode<synchronous>, transform_indices = @transform_4, window_bounds = array<i64: 1, 128>}, {pipeline_mode = #tpu.pipeline_mode<synchronous>, transform_indices = @transform_5, window_bounds = array<i64: 128, 2>}, {pipeline_mode = #tpu.pipeline_mode<synchronous>, transform_indices = @transform_6, window_bounds = array<i64: 1, 2>}, {transform_indices = @transform_7, window_bounds = array<i64: 1, 8, 2>}]} {
    %cst = arith.constant 0.000000e+00 : f32
    %0 = vector.broadcast %cst : f32 to vector<1x128xf32>
    %c0 = arith.constant 0 : index
    %c0_0 = arith.constant 0 : index
    %1 = vector.load %arg9[%c0, %c0_0] : memref<114x128xf32, #tpu.memory_space<vmem>>, vector<1x128xf32>
    tpu.vector_store %arg9[%c0, %c0_0], %0 {strides = array<i32>} : memref<114x128xf32, #tpu.memory_space<vmem>>, vector<1x128xf32>,
    %c0_1 = arith.constant 0 : index
    %c0_2 = arith.constant 0 : index
    %c0_3 = arith.constant 0 : index
    %2 = vector.load %arg1[%c0_1, %c0_2, %c0_3] : memref<1x128x128xf32, #tpu.memory_space<vmem>>, vector<1x14x128xf32>
    %3 = vector.shape_cast %2 : vector<1x14x128xf32> to vector<14x128xf32>
    %c0_4 = arith.constant 0 : index
    %c0_5 = arith.constant 0 : index
    %4 = vector.load %arg10[%c0_4, %c0_5] : memref<112x384xf32, #tpu.memory_space<vmem>>, vector<14x128xf32>
    tpu.vector_store %arg10[%c0_4, %c0_5], %3 {strides = array<i32>} : memref<112x384xf32, #tpu.memory_space<vmem>>, vector<14x128xf32>,
    %c0_6 = arith.constant 0 : index
    %c1 = arith.constant 1 : index
    %c0_7 = arith.constant 0 : index
    %5 = vector.load %arg1[%c0_6, %c1, %c0_7] : memref<1x128x128xf32, #tpu.memory_space<vmem>>, vector<1x14x128xf32>
    %6 = vector.shape_cast %5 : vector<1x14x128xf32> to vector<14x128xf32>
    %c0_8 = arith.constant 0 : index
    %c128 = arith.constant 128 : index
    %7 = vector.load %arg10[%c0_8, %c128] : memref<112x384xf32, #tpu.memory_space<vmem>>, vector<14x128xf32>
    tpu.vector_store %arg10[%c0_8, %c128], %6 {strides = array<i32>} : memref<112x384xf32, #tpu.memory_space<vmem>>, vector<14x128xf32>,
    %c0_9 = arith.constant 0 : index
    %c2 = arith.constant 2 : index
    %c0_10 = arith.constant 0 : index
    %8 = vector.load %arg1[%c0_9, %c2, %c0_10] : memref<1x128x128xf32, #tpu.memory_space<vmem>>, vector<1x14x128xf32>
    %9 = vector.shape_cast %8 : vector<1x14x128xf32> to vector<14x128xf32>
    %c0_11 = arith.constant 0 : index
    %c256 = arith.constant 256 : index
    %10 = vector.load %arg10[%c0_11, %c256] : memref<112x384xf32, #tpu.memory_space<vmem>>, vector<14x128xf32>
    tpu.vector_store %arg10[%c0_11, %c256], %9 {strides = array<i32>} : memref<112x384xf32, #tpu.memory_space<vmem>>, vector<14x128xf32>,
    %c0_12 = arith.constant 0 : index
    %c16 = arith.constant 16 : index
    %c0_13 = arith.constant 0 : index
    %11 = vector.load %arg1[%c0_12, %c16, %c0_13] : memref<1x128x128xf32, #tpu.memory_space<vmem>>, vector<1x14x128xf32>
    %12 = vector.shape_cast %11 : vector<1x14x128xf32> to vector<14x128xf32>
    %c14 = arith.constant 14 : index
    %c0_14 = arith.constant 0 : index
    %13 = vector.load %arg10[%c14, %c0_14] : memref<112x384xf32, #tpu.memory_space<vmem>>, vector<14x128xf32>
    tpu.vector_store %arg10[%c14, %c0_14], %12 {strides = array<i32>} : memref<112x384xf32, #tpu.memory_space<vmem>>, vector<14x128xf32>,
    %c0_15 = arith.constant 0 : index
    %c17 = arith.constant 17 : index
    %c0_16 = arith.constant 0 : index
    %14 = vector.load %arg1[%c0_15, %c17, %c0_16] : memref<1x128x128xf32, #tpu.memory_space<vmem>>, vector<1x14x128xf32>
    %15 = vector.shape_cast %14 : vector<1x14x128xf32> to vector<14x128xf32>
    %c14_17 = arith.constant 14 : index
    %c128_18 = arith.constant 128 : index
    %16 = vector.load %arg10[%c14_17, %c128_18] : memref<112x384xf32, #tpu.memory_space<vmem>>, vector<14x128xf32>
    tpu.vector_store %arg10[%c14_17, %c128_18], %15 {strides = array<i32>} : memref<112x384xf32, #tpu.memory_space<vmem>>, vector<14x128xf32>,
    %c0_19 = arith.constant 0 : index
    %c18 = arith.constant 18 : index
    %c0_20 = arith.constant 0 : index
    %17 = vector.load %arg1[%c0_19, %c18, %c0_20] : memref<1x128x128xf32, #tpu.memory_space<vmem>>, vector<1x14x128xf32>
    %18 = vector.shape_cast %17 : vector<1x14x128xf32> to vector<14x128xf32>
    %c14_21 = arith.constant 14 : index
    %c256_22 = arith.constant 256 : index
    %19 = vector.load %arg10[%c14_21, %c256_22] : memref<112x384xf32, #tpu.memory_space<vmem>>, vector<14x128xf32>
    tpu.vector_store %arg10[%c14_21, %c256_22], %18 {strides = array<i32>} : memref<112x384xf32, #tpu.memory_space<vmem>>, vector<14x128xf32>,
    %c0_23 = arith.constant 0 : index
    %c32 = arith.constant 32 : index
    %c0_24 = arith.constant 0 : index
    %20 = vector.load %arg1[%c0_23, %c32, %c0_24] : memref<1x128x128xf32, #tpu.memory_space<vmem>>, vector<1x14x128xf32>
    %21 = vector.shape_cast %20 : vector<1x14x128xf32> to vector<14x128xf32>
    %c28 = arith.constant 28 : index
    %c0_25 = arith.constant 0 : index
    %22 = vector.load %arg10[%c28, %c0_25] : memref<112x384xf32, #tpu.memory_space<vmem>>, vector<14x128xf32>
    tpu.vector_store %arg10[%c28, %c0_25], %21 {strides = array<i32>} : memref<112x384xf32, #tpu.memory_space<vmem>>, vector<14x128xf32>,
    %c0_26 = arith.constant 0 : index
    %c33 = arith.constant 33 : index
    %c0_27 = arith.constant 0 : index
    %23 = vector.load %arg1[%c0_26, %c33, %c0_27] : memref<1x128x128xf32, #tpu.memory_space<vmem>>, vector<1x14x128xf32>
    %24 = vector.shape_cast %23 : vector<1x14x128xf32> to vector<14x128xf32>
    %c28_28 = arith.constant 28 : index
    %c128_29 = arith.constant 128 : index
    %25 = vector.load %arg10[%c28_28, %c128_29] : memref<112x384xf32, #tpu.memory_space<vmem>>, vector<14x128xf32>
    tpu.vector_store %arg10[%c28_28, %c128_29], %24 {strides = array<i32>} : memref<112x384xf32, #tpu.memory_space<vmem>>, vector<14x128xf32>,
    %c0_30 = arith.constant 0 : index
    %c34 = arith.constant 34 : index
    %c0_31 = arith.constant 0 : index
    %26 = vector.load %arg1[%c0_30, %c34, %c0_31] : memref<1x128x128xf32, #tpu.memory_space<vmem>>, vector<1x14x128xf32>
    %27 = vector.shape_cast %26 : vector<1x14x128xf32> to vector<14x128xf32>
    %c28_32 = arith.constant 28 : index
    %c256_33 = arith.constant 256 : index
    %28 = vector.load %arg10[%c28_32, %c256_33] : memref<112x384xf32, #tpu.memory_space<vmem>>, vector<14x128xf32>
    tpu.vector_store %arg10[%c28_32, %c256_33], %27 {strides = array<i32>} : memref<112x384xf32, #tpu.memory_space<vmem>>, vector<14x128xf32>,
    %c0_34 = arith.constant 0 : index
    %c48 = arith.constant 48 : index
    %c0_35 = arith.constant 0 : index
    %29 = vector.load %arg1[%c0_34, %c48, %c0_35] : memref<1x128x128xf32, #tpu.memory_space<vmem>>, vector<1x14x128xf32>
    %30 = vector.shape_cast %29 : vector<1x14x128xf32> to vector<14x128xf32>
    %c42 = arith.constant 42 : index
    %c0_36 = arith.constant 0 : index
    %31 = vector.load %arg10[%c42, %c0_36] : memref<112x384xf32, #tpu.memory_space<vmem>>, vector<14x128xf32>
    tpu.vector_store %arg10[%c42, %c0_36], %30 {strides = array<i32>} : memref<112x384xf32, #tpu.memory_space<vmem>>, vector<14x128xf32>,
    %c0_37 = arith.constant 0 : index
    %c49 = arith.constant 49 : index
    %c0_38 = arith.constant 0 : index
    %32 = vector.load %arg1[%c0_37, %c49, %c0_38] : memref<1x128x128xf32, #tpu.memory_space<vmem>>, vector<1x14x128xf32>
    %33 = vector.shape_cast %32 : vector<1x14x128xf32> to vector<14x128xf32>
    %c42_39 = arith.constant 42 : index
    %c128_40 = arith.constant 128 : index
    %34 = vector.load %arg10[%c42_39, %c128_40] : memref<112x384xf32, #tpu.memory_space<vmem>>, vector<14x128xf32>
    tpu.vector_store %arg10[%c42_39, %c128_40], %33 {strides = array<i32>} : memref<112x384xf32, #tpu.memory_space<vmem>>, vector<14x128xf32>,
    %c0_41 = arith.constant 0 : index
    %c50 = arith.constant 50 : index
    %c0_42 = arith.constant 0 : index
    %35 = vector.load %arg1[%c0_41, %c50, %c0_42] : memref<1x128x128xf32, #tpu.memory_space<vmem>>, vector<1x14x128xf32>
    %36 = vector.shape_cast %35 : vector<1x14x128xf32> to vector<14x128xf32>
    %c42_43 = arith.constant 42 : index
    %c256_44 = arith.constant 256 : index
    %37 = vector.load %arg10[%c42_43, %c256_44] : memref<112x384xf32, #tpu.memory_space<vmem>>, vector<14x128xf32>
    tpu.vector_store %arg10[%c42_43, %c256_44], %36 {strides = array<i32>} : memref<112x384xf32, #tpu.memory_space<vmem>>, vector<14x128xf32>,
    %c0_45 = arith.constant 0 : index
    %c64 = arith.constant 64 : index
    %c0_46 = arith.constant 0 : index
    %38 = vector.load %arg1[%c0_45, %c64, %c0_46] : memref<1x128x128xf32, #tpu.memory_space<vmem>>, vector<1x14x128xf32>
    %39 = vector.shape_cast %38 : vector<1x14x128xf32> to vector<14x128xf32>
    %c56 = arith.constant 56 : index
    %c0_47 = arith.constant 0 : index
    %40 = vector.load %arg10[%c56, %c0_47] : memref<112x384xf32, #tpu.memory_space<vmem>>, vector<14x128xf32>
    tpu.vector_store %arg10[%c56, %c0_47], %39 {strides = array<i32>} : memref<112x384xf32, #tpu.memory_space<vmem>>, vector<14x128xf32>,
    %c0_48 = arith.constant 0 : index
    %c65 = arith.constant 65 : index
    %c0_49 = arith.constant 0 : index
    %41 = vector.load %arg1[%c0_48, %c65, %c0_49] : memref<1x128x128xf32, #tpu.memory_space<vmem>>, vector<1x14x128xf32>
    %42 = vector.shape_cast %41 : vector<1x14x128xf32> to vector<14x128xf32>
    %c56_50 = arith.constant 56 : index
    %c128_51 = arith.constant 128 : index
    %43 = vector.load %arg10[%c56_50, %c128_51] : memref<112x384xf32, #tpu.memory_space<vmem>>, vector<14x128xf32>
    tpu.vector_store %arg10[%c56_50, %c128_51], %42 {strides = array<i32>} : memref<112x384xf32, #tpu.memory_space<vmem>>, vector<14x128xf32>,
    %c0_52 = arith.constant 0 : index
    %c66 = arith.constant 66 : index
    %c0_53 = arith.constant 0 : index
    %44 = vector.load %arg1[%c0_52, %c66, %c0_53] : memref<1x128x128xf32, #tpu.memory_space<vmem>>, vector<1x14x128xf32>
    %45 = vector.shape_cast %44 : vector<1x14x128xf32> to vector<14x128xf32>
    %c56_54 = arith.constant 56 : index
    %c256_55 = arith.constant 256 : index
    %46 = vector.load %arg10[%c56_54, %c256_55] : memref<112x384xf32, #tpu.memory_space<vmem>>, vector<14x128xf32>
    tpu.vector_store %arg10[%c56_54, %c256_55], %45 {strides = array<i32>} : memref<112x384xf32, #tpu.memory_space<vmem>>, vector<14x128xf32>,
    %c0_56 = arith.constant 0 : index
    %c80 = arith.constant 80 : index
    %c0_57 = arith.constant 0 : index
    %47 = vector.load %arg1[%c0_56, %c80, %c0_57] : memref<1x128x128xf32, #tpu.memory_space<vmem>>, vector<1x14x128xf32>
    %48 = vector.shape_cast %47 : vector<1x14x128xf32> to vector<14x128xf32>
    %c70 = arith.constant 70 : index
    %c0_58 = arith.constant 0 : index
    %49 = vector.load %arg10[%c70, %c0_58] : memref<112x384xf32, #tpu.memory_space<vmem>>, vector<14x128xf32>
    tpu.vector_store %arg10[%c70, %c0_58], %48 {strides = array<i32>} : memref<112x384xf32, #tpu.memory_space<vmem>>, vector<14x128xf32>,
    %c0_59 = arith.constant 0 : index
    %c81 = arith.constant 81 : index
    %c0_60 = arith.constant 0 : index
    %50 = vector.load %arg1[%c0_59, %c81, %c0_60] : memref<1x128x128xf32, #tpu.memory_space<vmem>>, vector<1x14x128xf32>
    %51 = vector.shape_cast %50 : vector<1x14x128xf32> to vector<14x128xf32>
    %c70_61 = arith.constant 70 : index
    %c128_62 = arith.constant 128 : index
    %52 = vector.load %arg10[%c70_61, %c128_62] : memref<112x384xf32, #tpu.memory_space<vmem>>, vector<14x128xf32>
    tpu.vector_store %arg10[%c70_61, %c128_62], %51 {strides = array<i32>} : memref<112x384xf32, #tpu.memory_space<vmem>>, vector<14x128xf32>,
    %c0_63 = arith.constant 0 : index
    %c82 = arith.constant 82 : index
    %c0_64 = arith.constant 0 : index
    %53 = vector.load %arg1[%c0_63, %c82, %c0_64] : memref<1x128x128xf32, #tpu.memory_space<vmem>>, vector<1x14x128xf32>
    %54 = vector.shape_cast %53 : vector<1x14x128xf32> to vector<14x128xf32>
    %c70_65 = arith.constant 70 : index
    %c256_66 = arith.constant 256 : index
    %55 = vector.load %arg10[%c70_65, %c256_66] : memref<112x384xf32, #tpu.memory_space<vmem>>, vector<14x128xf32>
    tpu.vector_store %arg10[%c70_65, %c256_66], %54 {strides = array<i32>} : memref<112x384xf32, #tpu.memory_space<vmem>>, vector<14x128xf32>,
    %c0_67 = arith.constant 0 : index
    %c96 = arith.constant 96 : index
    %c0_68 = arith.constant 0 : index
    %56 = vector.load %arg1[%c0_67, %c96, %c0_68] : memref<1x128x128xf32, #tpu.memory_space<vmem>>, vector<1x14x128xf32>
    %57 = vector.shape_cast %56 : vector<1x14x128xf32> to vector<14x128xf32>
    %c84 = arith.constant 84 : index
    %c0_69 = arith.constant 0 : index
    %58 = vector.load %arg10[%c84, %c0_69] : memref<112x384xf32, #tpu.memory_space<vmem>>, vector<14x128xf32>
    tpu.vector_store %arg10[%c84, %c0_69], %57 {strides = array<i32>} : memref<112x384xf32, #tpu.memory_space<vmem>>, vector<14x128xf32>,
    %c0_70 = arith.constant 0 : index
    %c97 = arith.constant 97 : index
    %c0_71 = arith.constant 0 : index
    %59 = vector.load %arg1[%c0_70, %c97, %c0_71] : memref<1x128x128xf32, #tpu.memory_space<vmem>>, vector<1x14x128xf32>
    %60 = vector.shape_cast %59 : vector<1x14x128xf32> to vector<14x128xf32>
    %c84_72 = arith.constant 84 : index
    %c128_73 = arith.constant 128 : index
    %61 = vector.load %arg10[%c84_72, %c128_73] : memref<112x384xf32, #tpu.memory_space<vmem>>, vector<14x128xf32>
    tpu.vector_store %arg10[%c84_72, %c128_73], %60 {strides = array<i32>} : memref<112x384xf32, #tpu.memory_space<vmem>>, vector<14x128xf32>,
    %c0_74 = arith.constant 0 : index
    %c98 = arith.constant 98 : index
    %c0_75 = arith.constant 0 : index
    %62 = vector.load %arg1[%c0_74, %c98, %c0_75] : memref<1x128x128xf32, #tpu.memory_space<vmem>>, vector<1x14x128xf32>
    %63 = vector.shape_cast %62 : vector<1x14x128xf32> to vector<14x128xf32>
    %c84_76 = arith.constant 84 : index
    %c256_77 = arith.constant 256 : index
    %64 = vector.load %arg10[%c84_76, %c256_77] : memref<112x384xf32, #tpu.memory_space<vmem>>, vector<14x128xf32>
    tpu.vector_store %arg10[%c84_76, %c256_77], %63 {strides = array<i32>} : memref<112x384xf32, #tpu.memory_space<vmem>>, vector<14x128xf32>,
    %c0_78 = arith.constant 0 : index
    %c112 = arith.constant 112 : index
    %c0_79 = arith.constant 0 : index
    %65 = vector.load %arg1[%c0_78, %c112, %c0_79] : memref<1x128x128xf32, #tpu.memory_space<vmem>>, vector<1x14x128xf32>
    %66 = vector.shape_cast %65 : vector<1x14x128xf32> to vector<14x128xf32>
    %c98_80 = arith.constant 98 : index
    %c0_81 = arith.constant 0 : index
    %67 = vector.load %arg10[%c98_80, %c0_81] : memref<112x384xf32, #tpu.memory_space<vmem>>, vector<14x128xf32>
    tpu.vector_store %arg10[%c98_80, %c0_81], %66 {strides = array<i32>} : memref<112x384xf32, #tpu.memory_space<vmem>>, vector<14x128xf32>,
    %c0_82 = arith.constant 0 : index
    %c113 = arith.constant 113 : index
    %c0_83 = arith.constant 0 : index
    %68 = vector.load %arg1[%c0_82, %c113, %c0_83] : memref<1x128x128xf32, #tpu.memory_space<vmem>>, vector<1x14x128xf32>
    %69 = vector.shape_cast %68 : vector<1x14x128xf32> to vector<14x128xf32>
    %c98_84 = arith.constant 98 : index
    %c128_85 = arith.constant 128 : index
    %70 = vector.load %arg10[%c98_84, %c128_85] : memref<112x384xf32, #tpu.memory_space<vmem>>, vector<14x128xf32>
    tpu.vector_store %arg10[%c98_84, %c128_85], %69 {strides = array<i32>} : memref<112x384xf32, #tpu.memory_space<vmem>>, vector<14x128xf32>,
    %c0_86 = arith.constant 0 : index
    %c114 = arith.constant 114 : index
    %c0_87 = arith.constant 0 : index
    %71 = vector.load %arg1[%c0_86, %c114, %c0_87] : memref<1x128x128xf32, #tpu.memory_space<vmem>>, vector<1x14x128xf32>
    %72 = vector.shape_cast %71 : vector<1x14x128xf32> to vector<14x128xf32>
    %c98_88 = arith.constant 98 : index
    %c256_89 = arith.constant 256 : index
    %73 = vector.load %arg10[%c98_88, %c256_89] : memref<112x384xf32, #tpu.memory_space<vmem>>, vector<14x128xf32>
    tpu.vector_store %arg10[%c98_88, %c256_89], %72 {strides = array<i32>} : memref<112x384xf32, #tpu.memory_space<vmem>>, vector<14x128xf32>,
    %c0_90 = arith.constant 0 : index
    %c0_91 = arith.constant 0 : index
    %74 = vector.load %arg10[%c0_90, %c0_91] : memref<112x384xf32, #tpu.memory_space<vmem>>, vector<112x384xf32>
    %75 = arith.truncf %74 : vector<112x384xf32> to vector<112x384xbf16>
    %c0_92 = arith.constant 0 : index
    %c0_93 = arith.constant 0 : index
    %76 = vector.load %arg2[%c0_92, %c0_93] : memref<384x128xbf16, #tpu.memory_space<vmem>>, vector<384x128xbf16>
    %cst_94 = arith.constant dense<0.000000e+00> : vector<112x128xf32>
    %77 = tpu.matmul %75, %76, %cst_94 {dimension_numbers = #tpu.dot_dimension_numbers<[1], [0], [0], [1], [0, 0, 1, 1], [], []>} : vector<112x384xbf16>, vector<384x128xbf16>, vector<112x128xf32> -> vector<112x128xf32>
    %c0_95 = arith.constant 0 : index
    %c0_96 = arith.constant 0 : index
    %78 = vector.load %arg3[%c0_95, %c0_96] : memref<1x128xf32, #tpu.memory_space<vmem>>, vector<1x128xf32>
    %79 = vector.broadcast %78 : vector<1x128xf32> to vector<112x128xf32>
    %80 = arith.addf %77, %79 : vector<112x128xf32>
    %cst_97 = arith.constant 0.000000e+00 : f32
    %81 = vector.broadcast %cst_97 : f32 to vector<112x128xf32>
    %82 = arith.maximumf %80, %81 : vector<112x128xf32>
    %c1_98 = arith.constant 1 : index
    %c0_99 = arith.constant 0 : index
    %83 = vector.load %arg9[%c1_98, %c0_99] : memref<114x128xf32, #tpu.memory_space<vmem>>, vector<112x128xf32>
    tpu.vector_store %arg9[%c1_98, %c0_99], %82 {strides = array<i32>} : memref<114x128xf32, #tpu.memory_space<vmem>>, vector<112x128xf32>,
    %c113_100 = arith.constant 113 : index
    %c0_101 = arith.constant 0 : index
    %84 = vector.load %arg9[%c113_100, %c0_101] : memref<114x128xf32, #tpu.memory_space<vmem>>, vector<1x128xf32>
    tpu.vector_store %arg9[%c113_100, %c0_101], %0 {strides = array<i32>} : memref<114x128xf32, #tpu.memory_space<vmem>>, vector<1x128xf32>,
    %c0_102 = arith.constant 0 : index
    %c0_103 = arith.constant 0 : index
    %85 = vector.load %arg9[%c0_102, %c0_103] : memref<114x128xf32, #tpu.memory_space<vmem>>, vector<112x128xf32>
    %c2_104 = arith.constant 2 : index
    %c0_105 = arith.constant 0 : index
    %86 = vector.load %arg9[%c2_104, %c0_105] : memref<114x128xf32, #tpu.memory_space<vmem>>, vector<112x128xf32>
    %87 = tpu.iota {dimensions = array<i32: 0>} : vector<112x1xi32>
    %c0_i32 = arith.constant 0 : i32
    %88 = vector.broadcast %c0_i32 : i32 to vector<112x1xi32>
    %89 = arith.cmpi eq, %87, %88 : vector<112x1xi32>
    %c14_i32 = arith.constant 14 : i32
    %90 = vector.broadcast %c14_i32 : i32 to vector<112x1xi32>
    %91 = arith.cmpi eq, %87, %90 : vector<112x1xi32>
    %92 = arith.ori %89, %91 : vector<112x1xi1>
    %c28_i32 = arith.constant 28 : i32
    %93 = vector.broadcast %c28_i32 : i32 to vector<112x1xi32>
    %94 = arith.cmpi eq, %87, %93 : vector<112x1xi32>
    %95 = arith.ori %92, %94 : vector<112x1xi1>
    %c42_i32 = arith.constant 42 : i32
    %96 = vector.broadcast %c42_i32 : i32 to vector<112x1xi32>
    %97 = arith.cmpi eq, %87, %96 : vector<112x1xi32>
    %98 = arith.ori %95, %97 : vector<112x1xi1>
    %c56_i32 = arith.constant 56 : i32
    %99 = vector.broadcast %c56_i32 : i32 to vector<112x1xi32>
    %100 = arith.cmpi eq, %87, %99 : vector<112x1xi32>
    %101 = arith.ori %98, %100 : vector<112x1xi1>
    %c70_i32 = arith.constant 70 : i32
    %102 = vector.broadcast %c70_i32 : i32 to vector<112x1xi32>
    %103 = arith.cmpi eq, %87, %102 : vector<112x1xi32>
    %104 = arith.ori %101, %103 : vector<112x1xi1>
    %c84_i32 = arith.constant 84 : i32
    %105 = vector.broadcast %c84_i32 : i32 to vector<112x1xi32>
    %106 = arith.cmpi eq, %87, %105 : vector<112x1xi32>
    %107 = arith.ori %104, %106 : vector<112x1xi1>
    %c98_i32 = arith.constant 98 : i32
    %108 = vector.broadcast %c98_i32 : i32 to vector<112x1xi32>
    %109 = arith.cmpi eq, %87, %108 : vector<112x1xi32>
    %110 = arith.ori %107, %109 : vector<112x1xi1>
    %cst_106 = arith.constant 0.000000e+00 : f32
    %111 = vector.shape_cast %110 : vector<112x1xi1> to vector<112x1xi1>
    %112 = vector.broadcast %111 : vector<112x1xi1> to vector<112x128xi1>
    %113 = vector.broadcast %cst_106 : f32 to vector<112x128xf32>
    %114 = arith.select %112, %113, %85 : vector<112x128xi1>, vector<112x128xf32>
    %115 = tpu.iota {dimensions = array<i32: 0>} : vector<112x1xi32>
    %c13_i32 = arith.constant 13 : i32
    %116 = vector.broadcast %c13_i32 : i32 to vector<112x1xi32>
    %117 = arith.cmpi eq, %115, %116 : vector<112x1xi32>
    %c27_i32 = arith.constant 27 : i32
    %118 = vector.broadcast %c27_i32 : i32 to vector<112x1xi32>
    %119 = arith.cmpi eq, %115, %118 : vector<112x1xi32>
    %120 = arith.ori %117, %119 : vector<112x1xi1>
    %c41_i32 = arith.constant 41 : i32
    %121 = vector.broadcast %c41_i32 : i32 to vector<112x1xi32>
    %122 = arith.cmpi eq, %115, %121 : vector<112x1xi32>
    %123 = arith.ori %120, %122 : vector<112x1xi1>
    %c55_i32 = arith.constant 55 : i32
    %124 = vector.broadcast %c55_i32 : i32 to vector<112x1xi32>
    %125 = arith.cmpi eq, %115, %124 : vector<112x1xi32>
    %126 = arith.ori %123, %125 : vector<112x1xi1>
    %c69_i32 = arith.constant 69 : i32
    %127 = vector.broadcast %c69_i32 : i32 to vector<112x1xi32>
    %128 = arith.cmpi eq, %115, %127 : vector<112x1xi32>
    %129 = arith.ori %126, %128 : vector<112x1xi1>
    %c83_i32 = arith.constant 83 : i32
    %130 = vector.broadcast %c83_i32 : i32 to vector<112x1xi32>
    %131 = arith.cmpi eq, %115, %130 : vector<112x1xi32>
    %132 = arith.ori %129, %131 : vector<112x1xi1>
    %c97_i32 = arith.constant 97 : i32
    %133 = vector.broadcast %c97_i32 : i32 to vector<112x1xi32>
    %134 = arith.cmpi eq, %115, %133 : vector<112x1xi32>
    %135 = arith.ori %132, %134 : vector<112x1xi1>
    %c111_i32 = arith.constant 111 : i32
    %136 = vector.broadcast %c111_i32 : i32 to vector<112x1xi32>
    %137 = arith.cmpi eq, %115, %136 : vector<112x1xi32>
    %138 = arith.ori %135, %137 : vector<112x1xi1>
    %cst_107 = arith.constant 0.000000e+00 : f32
    %139 = vector.shape_cast %138 : vector<112x1xi1> to vector<112x1xi1>
    %140 = vector.broadcast %139 : vector<112x1xi1> to vector<112x128xi1>
    %141 = vector.broadcast %cst_107 : f32 to vector<112x128xf32>
    %142 = arith.select %140, %141, %86 : vector<112x128xi1>, vector<112x128xf32>
    %143 = tpu.concatenate %114, %82, %142 in 1 : vector<112x128xf32>, vector<112x128xf32>, vector<112x128xf32> -> vector<112x384xf32>
    %144 = arith.truncf %143 : vector<112x384xf32> to vector<112x384xbf16>
    %c0_108 = arith.constant 0 : index
    %c0_109 = arith.constant 0 : index
    %145 = vector.load %arg4[%c0_108, %c0_109] : memref<384x128xbf16, #tpu.memory_space<vmem>>, vector<384x128xbf16>
    %cst_110 = arith.constant dense<0.000000e+00> : vector<112x128xf32>
    %146 = tpu.matmul %144, %145, %cst_110 {dimension_numbers = #tpu.dot_dimension_numbers<[1], [0], [0], [1], [0, 0, 1, 1], [], []>} : vector<112x384xbf16>, vector<384x128xbf16>, vector<112x128xf32> -> vector<112x128xf32>
    %c0_111 = arith.constant 0 : index
    %c0_112 = arith.constant 0 : index
    %147 = vector.load %arg5[%c0_111, %c0_112] : memref<1x128xf32, #tpu.memory_space<vmem>>, vector<1x128xf32>
    %148 = vector.broadcast %147 : vector<1x128xf32> to vector<112x128xf32>
    %149 = arith.addf %146, %148 : vector<112x128xf32>
    %cst_113 = arith.constant 0.000000e+00 : f32
    %150 = vector.broadcast %cst_113 : f32 to vector<112x128xf32>
    %151 = arith.maximumf %149, %150 : vector<112x128xf32>
    %c1_114 = arith.constant 1 : index
    %c0_115 = arith.constant 0 : index
    %152 = vector.load %arg9[%c1_114, %c0_115] : memref<114x128xf32, #tpu.memory_space<vmem>>, vector<112x128xf32>
    tpu.vector_store %arg9[%c1_114, %c0_115], %151 {strides = array<i32>} : memref<114x128xf32, #tpu.memory_space<vmem>>, vector<112x128xf32>,
    %c113_116 = arith.constant 113 : index
    %c0_117 = arith.constant 0 : index
    %153 = vector.load %arg9[%c113_116, %c0_117] : memref<114x128xf32, #tpu.memory_space<vmem>>, vector<1x128xf32>
    tpu.vector_store %arg9[%c113_116, %c0_117], %0 {strides = array<i32>} : memref<114x128xf32, #tpu.memory_space<vmem>>, vector<1x128xf32>,
    %c0_118 = arith.constant 0 : index
    %c0_119 = arith.constant 0 : index
    %154 = vector.load %arg9[%c0_118, %c0_119] : memref<114x128xf32, #tpu.memory_space<vmem>>, vector<112x128xf32>
    %c2_120 = arith.constant 2 : index
    %c0_121 = arith.constant 0 : index
    %155 = vector.load %arg9[%c2_120, %c0_121] : memref<114x128xf32, #tpu.memory_space<vmem>>, vector<112x128xf32>
    %156 = tpu.iota {dimensions = array<i32: 0>} : vector<112x1xi32>
    %c0_i32_122 = arith.constant 0 : i32
    %157 = vector.broadcast %c0_i32_122 : i32 to vector<112x1xi32>
    %158 = arith.cmpi eq, %156, %157 : vector<112x1xi32>
    %c14_i32_123 = arith.constant 14 : i32
    %159 = vector.broadcast %c14_i32_123 : i32 to vector<112x1xi32>
    %160 = arith.cmpi eq, %156, %159 : vector<112x1xi32>
    %161 = arith.ori %158, %160 : vector<112x1xi1>
    %c28_i32_124 = arith.constant 28 : i32
    %162 = vector.broadcast %c28_i32_124 : i32 to vector<112x1xi32>
    %163 = arith.cmpi eq, %156, %162 : vector<112x1xi32>
    %164 = arith.ori %161, %163 : vector<112x1xi1>
    %c42_i32_125 = arith.constant 42 : i32
    %165 = vector.broadcast %c42_i32_125 : i32 to vector<112x1xi32>
    %166 = arith.cmpi eq, %156, %165 : vector<112x1xi32>
    %167 = arith.ori %164, %166 : vector<112x1xi1>
    %c56_i32_126 = arith.constant 56 : i32
    %168 = vector.broadcast %c56_i32_126 : i32 to vector<112x1xi32>
    %169 = arith.cmpi eq, %156, %168 : vector<112x1xi32>
    %170 = arith.ori %167, %169 : vector<112x1xi1>
    %c70_i32_127 = arith.constant 70 : i32
    %171 = vector.broadcast %c70_i32_127 : i32 to vector<112x1xi32>
    %172 = arith.cmpi eq, %156, %171 : vector<112x1xi32>
    %173 = arith.ori %170, %172 : vector<112x1xi1>
    %c84_i32_128 = arith.constant 84 : i32
    %174 = vector.broadcast %c84_i32_128 : i32 to vector<112x1xi32>
    %175 = arith.cmpi eq, %156, %174 : vector<112x1xi32>
    %176 = arith.ori %173, %175 : vector<112x1xi1>
    %c98_i32_129 = arith.constant 98 : i32
    %177 = vector.broadcast %c98_i32_129 : i32 to vector<112x1xi32>
    %178 = arith.cmpi eq, %156, %177 : vector<112x1xi32>
    %179 = arith.ori %176, %178 : vector<112x1xi1>
    %cst_130 = arith.constant 0.000000e+00 : f32
    %180 = vector.shape_cast %179 : vector<112x1xi1> to vector<112x1xi1>
    %181 = vector.broadcast %180 : vector<112x1xi1> to vector<112x128xi1>
    %182 = vector.broadcast %cst_130 : f32 to vector<112x128xf32>
    %183 = arith.select %181, %182, %154 : vector<112x128xi1>, vector<112x128xf32>
    %184 = tpu.iota {dimensions = array<i32: 0>} : vector<112x1xi32>
    %c13_i32_131 = arith.constant 13 : i32
    %185 = vector.broadcast %c13_i32_131 : i32 to vector<112x1xi32>
    %186 = arith.cmpi eq, %184, %185 : vector<112x1xi32>
    %c27_i32_132 = arith.constant 27 : i32
    %187 = vector.broadcast %c27_i32_132 : i32 to vector<112x1xi32>
    %188 = arith.cmpi eq, %184, %187 : vector<112x1xi32>
    %189 = arith.ori %186, %188 : vector<112x1xi1>
    %c41_i32_133 = arith.constant 41 : i32
    %190 = vector.broadcast %c41_i32_133 : i32 to vector<112x1xi32>
    %191 = arith.cmpi eq, %184, %190 : vector<112x1xi32>
    %192 = arith.ori %189, %191 : vector<112x1xi1>
    %c55_i32_134 = arith.constant 55 : i32
    %193 = vector.broadcast %c55_i32_134 : i32 to vector<112x1xi32>
    %194 = arith.cmpi eq, %184, %193 : vector<112x1xi32>
    %195 = arith.ori %192, %194 : vector<112x1xi1>
    %c69_i32_135 = arith.constant 69 : i32
    %196 = vector.broadcast %c69_i32_135 : i32 to vector<112x1xi32>
    %197 = arith.cmpi eq, %184, %196 : vector<112x1xi32>
    %198 = arith.ori %195, %197 : vector<112x1xi1>
    %c83_i32_136 = arith.constant 83 : i32
    %199 = vector.broadcast %c83_i32_136 : i32 to vector<112x1xi32>
    %200 = arith.cmpi eq, %184, %199 : vector<112x1xi32>
    %201 = arith.ori %198, %200 : vector<112x1xi1>
    %c97_i32_137 = arith.constant 97 : i32
    %202 = vector.broadcast %c97_i32_137 : i32 to vector<112x1xi32>
    %203 = arith.cmpi eq, %184, %202 : vector<112x1xi32>
    %204 = arith.ori %201, %203 : vector<112x1xi1>
    %c111_i32_138 = arith.constant 111 : i32
    %205 = vector.broadcast %c111_i32_138 : i32 to vector<112x1xi32>
    %206 = arith.cmpi eq, %184, %205 : vector<112x1xi32>
    %207 = arith.ori %204, %206 : vector<112x1xi1>
    %cst_139 = arith.constant 0.000000e+00 : f32
    %208 = vector.shape_cast %207 : vector<112x1xi1> to vector<112x1xi1>
    %209 = vector.broadcast %208 : vector<112x1xi1> to vector<112x128xi1>
    %210 = vector.broadcast %cst_139 : f32 to vector<112x128xf32>
    %211 = arith.select %209, %210, %155 : vector<112x128xi1>, vector<112x128xf32>
    %212 = tpu.concatenate %183, %151, %211 in 1 : vector<112x128xf32>, vector<112x128xf32>, vector<112x128xf32> -> vector<112x384xf32>
    %213 = arith.truncf %212 : vector<112x384xf32> to vector<112x384xbf16>
    %c0_140 = arith.constant 0 : index
    %c0_141 = arith.constant 0 : index
    %214 = vector.load %arg4[%c0_140, %c0_141] : memref<384x128xbf16, #tpu.memory_space<vmem>>, vector<384x128xbf16>
    %cst_142 = arith.constant dense<0.000000e+00> : vector<112x128xf32>
    %215 = tpu.matmul %213, %214, %cst_142 {dimension_numbers = #tpu.dot_dimension_numbers<[1], [0], [0], [1], [0, 0, 1, 1], [], []>} : vector<112x384xbf16>, vector<384x128xbf16>, vector<112x128xf32> -> vector<112x128xf32>
    %c0_143 = arith.constant 0 : index
    %c0_144 = arith.constant 0 : index
    %216 = vector.load %arg5[%c0_143, %c0_144] : memref<1x128xf32, #tpu.memory_space<vmem>>, vector<1x128xf32>
    %217 = vector.broadcast %216 : vector<1x128xf32> to vector<112x128xf32>
    %218 = arith.addf %215, %217 : vector<112x128xf32>
    %c0_145 = arith.constant 0 : index
    %c0_146 = arith.constant 0 : index
    %219 = vector.load %arg11[%c0_145, %c0_146] : memref<114x128xf32, #tpu.memory_space<vmem>>, vector<112x128xf32>
    tpu.vector_store %arg11[%c0_145, %c0_146], %218 {strides = array<i32>} : memref<114x128xf32, #tpu.memory_space<vmem>>, vector<112x128xf32>,
    %c0_147 = arith.constant 0 : index
    %c0_148 = arith.constant 0 : index
    %220 = tpu.strided_load %arg11[%c0_147, %c0_148] {strides = array<i32: 2, 1>} : memref<114x128xf32, #tpu.memory_space<vmem>>, vector<7x128xf32>
    %c1_149 = arith.constant 1 : index
    %c0_150 = arith.constant 0 : index
    %221 = tpu.strided_load %arg11[%c1_149, %c0_150] {strides = array<i32: 2, 1>} : memref<114x128xf32, #tpu.memory_space<vmem>>, vector<7x128xf32>
    %c2_151 = arith.constant 2 : index
    %c0_152 = arith.constant 0 : index
    %222 = tpu.strided_load %arg11[%c2_151, %c0_152] {strides = array<i32: 2, 1>} : memref<114x128xf32, #tpu.memory_space<vmem>>, vector<7x128xf32>
    %223 = tpu.iota {dimensions = array<i32: 0>} : vector<7x1xi32>
    %c6_i32 = arith.constant 6 : i32
    %224 = vector.broadcast %c6_i32 : i32 to vector<7x1xi32>
    %225 = arith.cmpi eq, %223, %224 : vector<7x1xi32>
    %cst_153 = arith.constant 0.000000e+00 : f32
    %226 = vector.shape_cast %225 : vector<7x1xi1> to vector<7x1xi1>
    %227 = vector.broadcast %226 : vector<7x1xi1> to vector<7x128xi1>
    %228 = vector.broadcast %cst_153 : f32 to vector<7x128xf32>
    %229 = arith.select %227, %228, %222 : vector<7x128xi1>, vector<7x128xf32>
    %230 = arith.maximumf %220, %221 : vector<7x128xf32>
    %231 = arith.maximumf %230, %229 : vector<7x128xf32>
    %c0_154 = arith.constant 0 : index
    %c0_155 = arith.constant 0 : index
    %232 = vector.load %arg12[%c0_154, %c0_155] : memref<112x128xf32, #tpu.memory_space<vmem>>, vector<7x128xf32>
    tpu.vector_store %arg12[%c0_154, %c0_155], %231 {strides = array<i32>} : memref<112x128xf32, #tpu.memory_space<vmem>>, vector<7x128xf32>,
    %c14_156 = arith.constant 14 : index
    %c0_157 = arith.constant 0 : index
    %233 = tpu.strided_load %arg11[%c14_156, %c0_157] {strides = array<i32: 2, 1>} : memref<114x128xf32, #tpu.memory_space<vmem>>, vector<7x128xf32>
    %c15 = arith.constant 15 : index
    %c0_158 = arith.constant 0 : index
    %234 = tpu.strided_load %arg11[%c15, %c0_158] {strides = array<i32: 2, 1>} : memref<114x128xf32, #tpu.memory_space<vmem>>, vector<7x128xf32>
    %c16_159 = arith.constant 16 : index
    %c0_160 = arith.constant 0 : index
    %235 = tpu.strided_load %arg11[%c16_159, %c0_160] {strides = array<i32: 2, 1>} : memref<114x128xf32, #tpu.memory_space<vmem>>, vector<7x128xf32>
    %236 = tpu.iota {dimensions = array<i32: 0>} : vector<7x1xi32>
    %c6_i32_161 = arith.constant 6 : i32
    %237 = vector.broadcast %c6_i32_161 : i32 to vector<7x1xi32>
    %238 = arith.cmpi eq, %236, %237 : vector<7x1xi32>
    %cst_162 = arith.constant 0.000000e+00 : f32
    %239 = vector.shape_cast %238 : vector<7x1xi1> to vector<7x1xi1>
    %240 = vector.broadcast %239 : vector<7x1xi1> to vector<7x128xi1>
    %241 = vector.broadcast %cst_162 : f32 to vector<7x128xf32>
    %242 = arith.select %240, %241, %235 : vector<7x128xi1>, vector<7x128xf32>
    %243 = arith.maximumf %233, %234 : vector<7x128xf32>
    %244 = arith.maximumf %243, %242 : vector<7x128xf32>
    %c7 = arith.constant 7 : index
    %c0_163 = arith.constant 0 : index
    %245 = vector.load %arg12[%c7, %c0_163] : memref<112x128xf32, #tpu.memory_space<vmem>>, vector<7x128xf32>
    tpu.vector_store %arg12[%c7, %c0_163], %244 {strides = array<i32>} : memref<112x128xf32, #tpu.memory_space<vmem>>, vector<7x128xf32>,
    %c28_164 = arith.constant 28 : index
    %c0_165 = arith.constant 0 : index
    %246 = tpu.strided_load %arg11[%c28_164, %c0_165] {strides = array<i32: 2, 1>} : memref<114x128xf32, #tpu.memory_space<vmem>>, vector<7x128xf32>
    %c29 = arith.constant 29 : index
    %c0_166 = arith.constant 0 : index
    %247 = tpu.strided_load %arg11[%c29, %c0_166] {strides = array<i32: 2, 1>} : memref<114x128xf32, #tpu.memory_space<vmem>>, vector<7x128xf32>
    %c30 = arith.constant 30 : index
    %c0_167 = arith.constant 0 : index
    %248 = tpu.strided_load %arg11[%c30, %c0_167] {strides = array<i32: 2, 1>} : memref<114x128xf32, #tpu.memory_space<vmem>>, vector<7x128xf32>
    %249 = tpu.iota {dimensions = array<i32: 0>} : vector<7x1xi32>
    %c6_i32_168 = arith.constant 6 : i32
    %250 = vector.broadcast %c6_i32_168 : i32 to vector<7x1xi32>
    %251 = arith.cmpi eq, %249, %250 : vector<7x1xi32>
    %cst_169 = arith.constant 0.000000e+00 : f32
    %252 = vector.shape_cast %251 : vector<7x1xi1> to vector<7x1xi1>
    %253 = vector.broadcast %252 : vector<7x1xi1> to vector<7x128xi1>
    %254 = vector.broadcast %cst_169 : f32 to vector<7x128xf32>
    %255 = arith.select %253, %254, %248 : vector<7x128xi1>, vector<7x128xf32>
    %256 = arith.maximumf %246, %247 : vector<7x128xf32>
    %257 = arith.maximumf %256, %255 : vector<7x128xf32>
    %c14_170 = arith.constant 14 : index
    %c0_171 = arith.constant 0 : index
    %258 = vector.load %arg12[%c14_170, %c0_171] : memref<112x128xf32, #tpu.memory_space<vmem>>, vector<7x128xf32>
    tpu.vector_store %arg12[%c14_170, %c0_171], %257 {strides = array<i32>} : memref<112x128xf32, #tpu.memory_space<vmem>>, vector<7x128xf32>,
    %c42_172 = arith.constant 42 : index
    %c0_173 = arith.constant 0 : index
    %259 = tpu.strided_load %arg11[%c42_172, %c0_173] {strides = array<i32: 2, 1>} : memref<114x128xf32, #tpu.memory_space<vmem>>, vector<7x128xf32>
    %c43 = arith.constant 43 : index
    %c0_174 = arith.constant 0 : index
    %260 = tpu.strided_load %arg11[%c43, %c0_174] {strides = array<i32: 2, 1>} : memref<114x128xf32, #tpu.memory_space<vmem>>, vector<7x128xf32>
    %c44 = arith.constant 44 : index
    %c0_175 = arith.constant 0 : index
    %261 = tpu.strided_load %arg11[%c44, %c0_175] {strides = array<i32: 2, 1>} : memref<114x128xf32, #tpu.memory_space<vmem>>, vector<7x128xf32>
    %262 = tpu.iota {dimensions = array<i32: 0>} : vector<7x1xi32>
    %c6_i32_176 = arith.constant 6 : i32
    %263 = vector.broadcast %c6_i32_176 : i32 to vector<7x1xi32>
    %264 = arith.cmpi eq, %262, %263 : vector<7x1xi32>
    %cst_177 = arith.constant 0.000000e+00 : f32
    %265 = vector.shape_cast %264 : vector<7x1xi1> to vector<7x1xi1>
    %266 = vector.broadcast %265 : vector<7x1xi1> to vector<7x128xi1>
    %267 = vector.broadcast %cst_177 : f32 to vector<7x128xf32>
    %268 = arith.select %266, %267, %261 : vector<7x128xi1>, vector<7x128xf32>
    %269 = arith.maximumf %259, %260 : vector<7x128xf32>
    %270 = arith.maximumf %269, %268 : vector<7x128xf32>
    %c21 = arith.constant 21 : index
    %c0_178 = arith.constant 0 : index
    %271 = vector.load %arg12[%c21, %c0_178] : memref<112x128xf32, #tpu.memory_space<vmem>>, vector<7x128xf32>
    tpu.vector_store %arg12[%c21, %c0_178], %270 {strides = array<i32>} : memref<112x128xf32, #tpu.memory_space<vmem>>, vector<7x128xf32>,
    %c56_179 = arith.constant 56 : index
    %c0_180 = arith.constant 0 : index
    %272 = tpu.strided_load %arg11[%c56_179, %c0_180] {strides = array<i32: 2, 1>} : memref<114x128xf32, #tpu.memory_space<vmem>>, vector<7x128xf32>
    %c57 = arith.constant 57 : index
    %c0_181 = arith.constant 0 : index
    %273 = tpu.strided_load %arg11[%c57, %c0_181] {strides = array<i32: 2, 1>} : memref<114x128xf32, #tpu.memory_space<vmem>>, vector<7x128xf32>
    %c58 = arith.constant 58 : index
    %c0_182 = arith.constant 0 : index
    %274 = tpu.strided_load %arg11[%c58, %c0_182] {strides = array<i32: 2, 1>} : memref<114x128xf32, #tpu.memory_space<vmem>>, vector<7x128xf32>
    %275 = tpu.iota {dimensions = array<i32: 0>} : vector<7x1xi32>
    %c6_i32_183 = arith.constant 6 : i32
    %276 = vector.broadcast %c6_i32_183 : i32 to vector<7x1xi32>
    %277 = arith.cmpi eq, %275, %276 : vector<7x1xi32>
    %cst_184 = arith.constant 0.000000e+00 : f32
    %278 = vector.shape_cast %277 : vector<7x1xi1> to vector<7x1xi1>
    %279 = vector.broadcast %278 : vector<7x1xi1> to vector<7x128xi1>
    %280 = vector.broadcast %cst_184 : f32 to vector<7x128xf32>
    %281 = arith.select %279, %280, %274 : vector<7x128xi1>, vector<7x128xf32>
    %282 = arith.maximumf %272, %273 : vector<7x128xf32>
    %283 = arith.maximumf %282, %281 : vector<7x128xf32>
    %c28_185 = arith.constant 28 : index
    %c0_186 = arith.constant 0 : index
    %284 = vector.load %arg12[%c28_185, %c0_186] : memref<112x128xf32, #tpu.memory_space<vmem>>, vector<7x128xf32>
    tpu.vector_store %arg12[%c28_185, %c0_186], %283 {strides = array<i32>} : memref<112x128xf32, #tpu.memory_space<vmem>>, vector<7x128xf32>,
    %c70_187 = arith.constant 70 : index
    %c0_188 = arith.constant 0 : index
    %285 = tpu.strided_load %arg11[%c70_187, %c0_188] {strides = array<i32: 2, 1>} : memref<114x128xf32, #tpu.memory_space<vmem>>, vector<7x128xf32>
    %c71 = arith.constant 71 : index
    %c0_189 = arith.constant 0 : index
    %286 = tpu.strided_load %arg11[%c71, %c0_189] {strides = array<i32: 2, 1>} : memref<114x128xf32, #tpu.memory_space<vmem>>, vector<7x128xf32>
    %c72 = arith.constant 72 : index
    %c0_190 = arith.constant 0 : index
    %287 = tpu.strided_load %arg11[%c72, %c0_190] {strides = array<i32: 2, 1>} : memref<114x128xf32, #tpu.memory_space<vmem>>, vector<7x128xf32>
    %288 = tpu.iota {dimensions = array<i32: 0>} : vector<7x1xi32>
    %c6_i32_191 = arith.constant 6 : i32
    %289 = vector.broadcast %c6_i32_191 : i32 to vector<7x1xi32>
    %290 = arith.cmpi eq, %288, %289 : vector<7x1xi32>
    %cst_192 = arith.constant 0.000000e+00 : f32
    %291 = vector.shape_cast %290 : vector<7x1xi1> to vector<7x1xi1>
    %292 = vector.broadcast %291 : vector<7x1xi1> to vector<7x128xi1>
    %293 = vector.broadcast %cst_192 : f32 to vector<7x128xf32>
    %294 = arith.select %292, %293, %287 : vector<7x128xi1>, vector<7x128xf32>
    %295 = arith.maximumf %285, %286 : vector<7x128xf32>
    %296 = arith.maximumf %295, %294 : vector<7x128xf32>
    %c35 = arith.constant 35 : index
    %c0_193 = arith.constant 0 : index
    %297 = vector.load %arg12[%c35, %c0_193] : memref<112x128xf32, #tpu.memory_space<vmem>>, vector<7x128xf32>
    tpu.vector_store %arg12[%c35, %c0_193], %296 {strides = array<i32>} : memref<112x128xf32, #tpu.memory_space<vmem>>, vector<7x128xf32>,
    %c84_194 = arith.constant 84 : index
    %c0_195 = arith.constant 0 : index
    %298 = tpu.strided_load %arg11[%c84_194, %c0_195] {strides = array<i32: 2, 1>} : memref<114x128xf32, #tpu.memory_space<vmem>>, vector<7x128xf32>
    %c85 = arith.constant 85 : index
    %c0_196 = arith.constant 0 : index
    %299 = tpu.strided_load %arg11[%c85, %c0_196] {strides = array<i32: 2, 1>} : memref<114x128xf32, #tpu.memory_space<vmem>>, vector<7x128xf32>
    %c86 = arith.constant 86 : index
    %c0_197 = arith.constant 0 : index
    %300 = tpu.strided_load %arg11[%c86, %c0_197] {strides = array<i32: 2, 1>} : memref<114x128xf32, #tpu.memory_space<vmem>>, vector<7x128xf32>
    %301 = tpu.iota {dimensions = array<i32: 0>} : vector<7x1xi32>
    %c6_i32_198 = arith.constant 6 : i32
    %302 = vector.broadcast %c6_i32_198 : i32 to vector<7x1xi32>
    %303 = arith.cmpi eq, %301, %302 : vector<7x1xi32>
    %cst_199 = arith.constant 0.000000e+00 : f32
    %304 = vector.shape_cast %303 : vector<7x1xi1> to vector<7x1xi1>
    %305 = vector.broadcast %304 : vector<7x1xi1> to vector<7x128xi1>
    %306 = vector.broadcast %cst_199 : f32 to vector<7x128xf32>
    %307 = arith.select %305, %306, %300 : vector<7x128xi1>, vector<7x128xf32>
    %308 = arith.maximumf %298, %299 : vector<7x128xf32>
    %309 = arith.maximumf %308, %307 : vector<7x128xf32>
    %c42_200 = arith.constant 42 : index
    %c0_201 = arith.constant 0 : index
    %310 = vector.load %arg12[%c42_200, %c0_201] : memref<112x128xf32, #tpu.memory_space<vmem>>, vector<7x128xf32>
    tpu.vector_store %arg12[%c42_200, %c0_201], %309 {strides = array<i32>} : memref<112x128xf32, #tpu.memory_space<vmem>>, vector<7x128xf32>,
    %c98_202 = arith.constant 98 : index
    %c0_203 = arith.constant 0 : index
    %311 = tpu.strided_load %arg11[%c98_202, %c0_203] {strides = array<i32: 2, 1>} : memref<114x128xf32, #tpu.memory_space<vmem>>, vector<7x128xf32>
    %c99 = arith.constant 99 : index
    %c0_204 = arith.constant 0 : index
    %312 = tpu.strided_load %arg11[%c99, %c0_204] {strides = array<i32: 2, 1>} : memref<114x128xf32, #tpu.memory_space<vmem>>, vector<7x128xf32>
    %c100 = arith.constant 100 : index
    %c0_205 = arith.constant 0 : index
    %313 = tpu.strided_load %arg11[%c100, %c0_205] {strides = array<i32: 2, 1>} : memref<114x128xf32, #tpu.memory_space<vmem>>, vector<7x128xf32>
    %314 = tpu.iota {dimensions = array<i32: 0>} : vector<7x1xi32>
    %c6_i32_206 = arith.constant 6 : i32
    %315 = vector.broadcast %c6_i32_206 : i32 to vector<7x1xi32>
    %316 = arith.cmpi eq, %314, %315 : vector<7x1xi32>
    %cst_207 = arith.constant 0.000000e+00 : f32
    %317 = vector.shape_cast %316 : vector<7x1xi1> to vector<7x1xi1>
    %318 = vector.broadcast %317 : vector<7x1xi1> to vector<7x128xi1>
    %319 = vector.broadcast %cst_207 : f32 to vector<7x128xf32>
    %320 = arith.select %318, %319, %313 : vector<7x128xi1>, vector<7x128xf32>
    %321 = arith.maximumf %311, %312 : vector<7x128xf32>
    %322 = arith.maximumf %321, %320 : vector<7x128xf32>
    %c49_208 = arith.constant 49 : index
    %c0_209 = arith.constant 0 : index
    %323 = vector.load %arg12[%c49_208, %c0_209] : memref<112x128xf32, #tpu.memory_space<vmem>>, vector<7x128xf32>
    tpu.vector_store %arg12[%c49_208, %c0_209], %322 {strides = array<i32>} : memref<112x128xf32, #tpu.memory_space<vmem>>, vector<7x128xf32>,
    %c0_210 = arith.constant 0 : index
    %c0_211 = arith.constant 0 : index
    %324 = vector.load %arg12[%c0_210, %c0_211] : memref<112x128xf32, #tpu.memory_space<vmem>>, vector<56x128xf32>
    %cst_212 = arith.constant 0.000000e+00 : f32
    %325 = vector.broadcast %cst_212 : f32 to vector<56x128xf32>
    %326 = arith.maximumf %324, %325 : vector<56x128xf32>
    %c1_213 = arith.constant 1 : index
    %c0_214 = arith.constant 0 : index
    %327 = vector.load %arg9[%c1_213, %c0_214] : memref<114x128xf32, #tpu.memory_space<vmem>>, vector<56x128xf32>
    tpu.vector_store %arg9[%c1_213, %c0_214], %326 {strides = array<i32>} : memref<114x128xf32, #tpu.memory_space<vmem>>, vector<56x128xf32>,
    %c57_215 = arith.constant 57 : index
    %c0_216 = arith.constant 0 : index
    %328 = vector.load %arg9[%c57_215, %c0_216] : memref<114x128xf32, #tpu.memory_space<vmem>>, vector<1x128xf32>
    tpu.vector_store %arg9[%c57_215, %c0_216], %0 {strides = array<i32>} : memref<114x128xf32, #tpu.memory_space<vmem>>, vector<1x128xf32>,
    %c0_217 = arith.constant 0 : index
    %c0_218 = arith.constant 0 : index
    %329 = vector.load %arg9[%c0_217, %c0_218] : memref<114x128xf32, #tpu.memory_space<vmem>>, vector<56x128xf32>
    %c2_219 = arith.constant 2 : index
    %c0_220 = arith.constant 0 : index
    %330 = vector.load %arg9[%c2_219, %c0_220] : memref<114x128xf32, #tpu.memory_space<vmem>>, vector<56x128xf32>
    %331 = tpu.iota {dimensions = array<i32: 0>} : vector<56x1xi32>
    %c0_i32_221 = arith.constant 0 : i32
    %332 = vector.broadcast %c0_i32_221 : i32 to vector<56x1xi32>
    %333 = arith.cmpi eq, %331, %332 : vector<56x1xi32>
    %c7_i32 = arith.constant 7 : i32
    %334 = vector.broadcast %c7_i32 : i32 to vector<56x1xi32>
    %335 = arith.cmpi eq, %331, %334 : vector<56x1xi32>
    %336 = arith.ori %333, %335 : vector<56x1xi1>
    %c14_i32_222 = arith.constant 14 : i32
    %337 = vector.broadcast %c14_i32_222 : i32 to vector<56x1xi32>
    %338 = arith.cmpi eq, %331, %337 : vector<56x1xi32>
    %339 = arith.ori %336, %338 : vector<56x1xi1>
    %c21_i32 = arith.constant 21 : i32
    %340 = vector.broadcast %c21_i32 : i32 to vector<56x1xi32>
    %341 = arith.cmpi eq, %331, %340 : vector<56x1xi32>
    %342 = arith.ori %339, %341 : vector<56x1xi1>
    %c28_i32_223 = arith.constant 28 : i32
    %343 = vector.broadcast %c28_i32_223 : i32 to vector<56x1xi32>
    %344 = arith.cmpi eq, %331, %343 : vector<56x1xi32>
    %345 = arith.ori %342, %344 : vector<56x1xi1>
    %c35_i32 = arith.constant 35 : i32
    %346 = vector.broadcast %c35_i32 : i32 to vector<56x1xi32>
    %347 = arith.cmpi eq, %331, %346 : vector<56x1xi32>
    %348 = arith.ori %345, %347 : vector<56x1xi1>
    %c42_i32_224 = arith.constant 42 : i32
    %349 = vector.broadcast %c42_i32_224 : i32 to vector<56x1xi32>
    %350 = arith.cmpi eq, %331, %349 : vector<56x1xi32>
    %351 = arith.ori %348, %350 : vector<56x1xi1>
    %c49_i32 = arith.constant 49 : i32
    %352 = vector.broadcast %c49_i32 : i32 to vector<56x1xi32>
    %353 = arith.cmpi eq, %331, %352 : vector<56x1xi32>
    %354 = arith.ori %351, %353 : vector<56x1xi1>
    %cst_225 = arith.constant 0.000000e+00 : f32
    %355 = vector.shape_cast %354 : vector<56x1xi1> to vector<56x1xi1>
    %356 = vector.broadcast %355 : vector<56x1xi1> to vector<56x128xi1>
    %357 = vector.broadcast %cst_225 : f32 to vector<56x128xf32>
    %358 = arith.select %356, %357, %329 : vector<56x128xi1>, vector<56x128xf32>
    %359 = tpu.iota {dimensions = array<i32: 0>} : vector<56x1xi32>
    %c6_i32_226 = arith.constant 6 : i32
    %360 = vector.broadcast %c6_i32_226 : i32 to vector<56x1xi32>
    %361 = arith.cmpi eq, %359, %360 : vector<56x1xi32>
    %c13_i32_227 = arith.constant 13 : i32
    %362 = vector.broadcast %c13_i32_227 : i32 to vector<56x1xi32>
    %363 = arith.cmpi eq, %359, %362 : vector<56x1xi32>
    %364 = arith.ori %361, %363 : vector<56x1xi1>
    %c20_i32 = arith.constant 20 : i32
    %365 = vector.broadcast %c20_i32 : i32 to vector<56x1xi32>
    %366 = arith.cmpi eq, %359, %365 : vector<56x1xi32>
    %367 = arith.ori %364, %366 : vector<56x1xi1>
    %c27_i32_228 = arith.constant 27 : i32
    %368 = vector.broadcast %c27_i32_228 : i32 to vector<56x1xi32>
    %369 = arith.cmpi eq, %359, %368 : vector<56x1xi32>
    %370 = arith.ori %367, %369 : vector<56x1xi1>
    %c34_i32 = arith.constant 34 : i32
    %371 = vector.broadcast %c34_i32 : i32 to vector<56x1xi32>
    %372 = arith.cmpi eq, %359, %371 : vector<56x1xi32>
    %373 = arith.ori %370, %372 : vector<56x1xi1>
    %c41_i32_229 = arith.constant 41 : i32
    %374 = vector.broadcast %c41_i32_229 : i32 to vector<56x1xi32>
    %375 = arith.cmpi eq, %359, %374 : vector<56x1xi32>
    %376 = arith.ori %373, %375 : vector<56x1xi1>
    %c48_i32 = arith.constant 48 : i32
    %377 = vector.broadcast %c48_i32 : i32 to vector<56x1xi32>
    %378 = arith.cmpi eq, %359, %377 : vector<56x1xi32>
    %379 = arith.ori %376, %378 : vector<56x1xi1>
    %c55_i32_230 = arith.constant 55 : i32
    %380 = vector.broadcast %c55_i32_230 : i32 to vector<56x1xi32>
    %381 = arith.cmpi eq, %359, %380 : vector<56x1xi32>
    %382 = arith.ori %379, %381 : vector<56x1xi1>
    %cst_231 = arith.constant 0.000000e+00 : f32
    %383 = vector.shape_cast %382 : vector<56x1xi1> to vector<56x1xi1>
    %384 = vector.broadcast %383 : vector<56x1xi1> to vector<56x128xi1>
    %385 = vector.broadcast %cst_231 : f32 to vector<56x128xf32>
    %386 = arith.select %384, %385, %330 : vector<56x128xi1>, vector<56x128xf32>
    %387 = tpu.concatenate %358, %326, %386 in 1 : vector<56x128xf32>, vector<56x128xf32>, vector<56x128xf32> -> vector<56x384xf32>
    %388 = arith.truncf %387 : vector<56x384xf32> to vector<56x384xbf16>
    %c0_232 = arith.constant 0 : index
    %c0_233 = arith.constant 0 : index
    %389 = vector.load %arg4[%c0_232, %c0_233] : memref<384x128xbf16, #tpu.memory_space<vmem>>, vector<384x128xbf16>
    %cst_234 = arith.constant dense<0.000000e+00> : vector<56x128xf32>
    %390 = tpu.matmul %388, %389, %cst_234 {dimension_numbers = #tpu.dot_dimension_numbers<[1], [0], [0], [1], [0, 0, 1, 1], [], []>} : vector<56x384xbf16>, vector<384x128xbf16>, vector<56x128xf32> -> vector<56x128xf32>
    %c0_235 = arith.constant 0 : index
    %c0_236 = arith.constant 0 : index
    %391 = vector.load %arg5[%c0_235, %c0_236] : memref<1x128xf32, #tpu.memory_space<vmem>>, vector<1x128xf32>
    %392 = vector.broadcast %391 : vector<1x128xf32> to vector<56x128xf32>
    %393 = arith.addf %390, %392 : vector<56x128xf32>
    %cst_237 = arith.constant 0.000000e+00 : f32
    %394 = vector.broadcast %cst_237 : f32 to vector<56x128xf32>
    %395 = arith.maximumf %393, %394 : vector<56x128xf32>
    %c1_238 = arith.constant 1 : index
    %c0_239 = arith.constant 0 : index
    %396 = vector.load %arg9[%c1_238, %c0_239] : memref<114x128xf32, #tpu.memory_space<vmem>>, vector<56x128xf32>
    tpu.vector_store %arg9[%c1_238, %c0_239], %395 {strides = array<i32>} : memref<114x128xf32, #tpu.memory_space<vmem>>, vector<56x128xf32>,
    %c57_240 = arith.constant 57 : index
    %c0_241 = arith.constant 0 : index
    %397 = vector.load %arg9[%c57_240, %c0_241] : memref<114x128xf32, #tpu.memory_space<vmem>>, vector<1x128xf32>
    tpu.vector_store %arg9[%c57_240, %c0_241], %0 {strides = array<i32>} : memref<114x128xf32, #tpu.memory_space<vmem>>, vector<1x128xf32>,
    %c0_242 = arith.constant 0 : index
    %c0_243 = arith.constant 0 : index
    %398 = vector.load %arg9[%c0_242, %c0_243] : memref<114x128xf32, #tpu.memory_space<vmem>>, vector<56x128xf32>
    %c2_244 = arith.constant 2 : index
    %c0_245 = arith.constant 0 : index
    %399 = vector.load %arg9[%c2_244, %c0_245] : memref<114x128xf32, #tpu.memory_space<vmem>>, vector<56x128xf32>
    %400 = tpu.iota {dimensions = array<i32: 0>} : vector<56x1xi32>
    %c0_i32_246 = arith.constant 0 : i32
    %401 = vector.broadcast %c0_i32_246 : i32 to vector<56x1xi32>
    %402 = arith.cmpi eq, %400, %401 : vector<56x1xi32>
    %c7_i32_247 = arith.constant 7 : i32
    %403 = vector.broadcast %c7_i32_247 : i32 to vector<56x1xi32>
    %404 = arith.cmpi eq, %400, %403 : vector<56x1xi32>
    %405 = arith.ori %402, %404 : vector<56x1xi1>
    %c14_i32_248 = arith.constant 14 : i32
    %406 = vector.broadcast %c14_i32_248 : i32 to vector<56x1xi32>
    %407 = arith.cmpi eq, %400, %406 : vector<56x1xi32>
    %408 = arith.ori %405, %407 : vector<56x1xi1>
    %c21_i32_249 = arith.constant 21 : i32
    %409 = vector.broadcast %c21_i32_249 : i32 to vector<56x1xi32>
    %410 = arith.cmpi eq, %400, %409 : vector<56x1xi32>
    %411 = arith.ori %408, %410 : vector<56x1xi1>
    %c28_i32_250 = arith.constant 28 : i32
    %412 = vector.broadcast %c28_i32_250 : i32 to vector<56x1xi32>
    %413 = arith.cmpi eq, %400, %412 : vector<56x1xi32>
    %414 = arith.ori %411, %413 : vector<56x1xi1>
    %c35_i32_251 = arith.constant 35 : i32
    %415 = vector.broadcast %c35_i32_251 : i32 to vector<56x1xi32>
    %416 = arith.cmpi eq, %400, %415 : vector<56x1xi32>
    %417 = arith.ori %414, %416 : vector<56x1xi1>
    %c42_i32_252 = arith.constant 42 : i32
    %418 = vector.broadcast %c42_i32_252 : i32 to vector<56x1xi32>
    %419 = arith.cmpi eq, %400, %418 : vector<56x1xi32>
    %420 = arith.ori %417, %419 : vector<56x1xi1>
    %c49_i32_253 = arith.constant 49 : i32
    %421 = vector.broadcast %c49_i32_253 : i32 to vector<56x1xi32>
    %422 = arith.cmpi eq, %400, %421 : vector<56x1xi32>
    %423 = arith.ori %420, %422 : vector<56x1xi1>
    %cst_254 = arith.constant 0.000000e+00 : f32
    %424 = vector.shape_cast %423 : vector<56x1xi1> to vector<56x1xi1>
    %425 = vector.broadcast %424 : vector<56x1xi1> to vector<56x128xi1>
    %426 = vector.broadcast %cst_254 : f32 to vector<56x128xf32>
    %427 = arith.select %425, %426, %398 : vector<56x128xi1>, vector<56x128xf32>
    %428 = tpu.iota {dimensions = array<i32: 0>} : vector<56x1xi32>
    %c6_i32_255 = arith.constant 6 : i32
    %429 = vector.broadcast %c6_i32_255 : i32 to vector<56x1xi32>
    %430 = arith.cmpi eq, %428, %429 : vector<56x1xi32>
    %c13_i32_256 = arith.constant 13 : i32
    %431 = vector.broadcast %c13_i32_256 : i32 to vector<56x1xi32>
    %432 = arith.cmpi eq, %428, %431 : vector<56x1xi32>
    %433 = arith.ori %430, %432 : vector<56x1xi1>
    %c20_i32_257 = arith.constant 20 : i32
    %434 = vector.broadcast %c20_i32_257 : i32 to vector<56x1xi32>
    %435 = arith.cmpi eq, %428, %434 : vector<56x1xi32>
    %436 = arith.ori %433, %435 : vector<56x1xi1>
    %c27_i32_258 = arith.constant 27 : i32
    %437 = vector.broadcast %c27_i32_258 : i32 to vector<56x1xi32>
    %438 = arith.cmpi eq, %428, %437 : vector<56x1xi32>
    %439 = arith.ori %436, %438 : vector<56x1xi1>
    %c34_i32_259 = arith.constant 34 : i32
    %440 = vector.broadcast %c34_i32_259 : i32 to vector<56x1xi32>
    %441 = arith.cmpi eq, %428, %440 : vector<56x1xi32>
    %442 = arith.ori %439, %441 : vector<56x1xi1>
    %c41_i32_260 = arith.constant 41 : i32
    %443 = vector.broadcast %c41_i32_260 : i32 to vector<56x1xi32>
    %444 = arith.cmpi eq, %428, %443 : vector<56x1xi32>
    %445 = arith.ori %442, %444 : vector<56x1xi1>
    %c48_i32_261 = arith.constant 48 : i32
    %446 = vector.broadcast %c48_i32_261 : i32 to vector<56x1xi32>
    %447 = arith.cmpi eq, %428, %446 : vector<56x1xi32>
    %448 = arith.ori %445, %447 : vector<56x1xi1>
    %c55_i32_262 = arith.constant 55 : i32
    %449 = vector.broadcast %c55_i32_262 : i32 to vector<56x1xi32>
    %450 = arith.cmpi eq, %428, %449 : vector<56x1xi32>
    %451 = arith.ori %448, %450 : vector<56x1xi1>
    %cst_263 = arith.constant 0.000000e+00 : f32
    %452 = vector.shape_cast %451 : vector<56x1xi1> to vector<56x1xi1>
    %453 = vector.broadcast %452 : vector<56x1xi1> to vector<56x128xi1>
    %454 = vector.broadcast %cst_263 : f32 to vector<56x128xf32>
    %455 = arith.select %453, %454, %399 : vector<56x128xi1>, vector<56x128xf32>
    %456 = tpu.concatenate %427, %395, %455 in 1 : vector<56x128xf32>, vector<56x128xf32>, vector<56x128xf32> -> vector<56x384xf32>
    %457 = arith.truncf %456 : vector<56x384xf32> to vector<56x384xbf16>
    %c0_264 = arith.constant 0 : index
    %c0_265 = arith.constant 0 : index
    %458 = vector.load %arg4[%c0_264, %c0_265] : memref<384x128xbf16, #tpu.memory_space<vmem>>, vector<384x128xbf16>
    %cst_266 = arith.constant dense<0.000000e+00> : vector<56x128xf32>
    %459 = tpu.matmul %457, %458, %cst_266 {dimension_numbers = #tpu.dot_dimension_numbers<[1], [0], [0], [1], [0, 0, 1, 1], [], []>} : vector<56x384xbf16>, vector<384x128xbf16>, vector<56x128xf32> -> vector<56x128xf32>
    %c0_267 = arith.constant 0 : index
    %c0_268 = arith.constant 0 : index
    %460 = vector.load %arg5[%c0_267, %c0_268] : memref<1x128xf32, #tpu.memory_space<vmem>>, vector<1x128xf32>
    %461 = vector.broadcast %460 : vector<1x128xf32> to vector<56x128xf32>
    %462 = arith.addf %459, %461 : vector<56x128xf32>
    %463 = arith.addf %462, %324 : vector<56x128xf32>
    %c0_269 = arith.constant 0 : index
    %c0_270 = arith.constant 0 : index
    %464 = vector.load %arg11[%c0_269, %c0_270] : memref<114x128xf32, #tpu.memory_space<vmem>>, vector<56x128xf32>
    tpu.vector_store %arg11[%c0_269, %c0_270], %463 {strides = array<i32>} : memref<114x128xf32, #tpu.memory_space<vmem>>, vector<56x128xf32>,
    %c0_271 = arith.constant 0 : index
    %c0_272 = arith.constant 0 : index
    %465 = tpu.strided_load %arg11[%c0_271, %c0_272] {strides = array<i32: 2, 1>} : memref<114x128xf32, #tpu.memory_space<vmem>>, vector<3x128xf32>
    %c1_273 = arith.constant 1 : index
    %c0_274 = arith.constant 0 : index
    %466 = tpu.strided_load %arg11[%c1_273, %c0_274] {strides = array<i32: 2, 1>} : memref<114x128xf32, #tpu.memory_space<vmem>>, vector<3x128xf32>
    %c2_275 = arith.constant 2 : index
    %c0_276 = arith.constant 0 : index
    %467 = tpu.strided_load %arg11[%c2_275, %c0_276] {strides = array<i32: 2, 1>} : memref<114x128xf32, #tpu.memory_space<vmem>>, vector<3x128xf32>
    %468 = arith.maximumf %465, %466 : vector<3x128xf32>
    %469 = arith.maximumf %468, %467 : vector<3x128xf32>
    %c0_277 = arith.constant 0 : index
    %c0_278 = arith.constant 0 : index
    %470 = vector.load %arg12[%c0_277, %c0_278] : memref<112x128xf32, #tpu.memory_space<vmem>>, vector<3x128xf32>
    tpu.vector_store %arg12[%c0_277, %c0_278], %469 {strides = array<i32>} : memref<112x128xf32, #tpu.memory_space<vmem>>, vector<3x128xf32>,
    %c7_279 = arith.constant 7 : index
    %c0_280 = arith.constant 0 : index
    %471 = tpu.strided_load %arg11[%c7_279, %c0_280] {strides = array<i32: 2, 1>} : memref<114x128xf32, #tpu.memory_space<vmem>>, vector<3x128xf32>
    %c8 = arith.constant 8 : index
    %c0_281 = arith.constant 0 : index
    %472 = tpu.strided_load %arg11[%c8, %c0_281] {strides = array<i32: 2, 1>} : memref<114x128xf32, #tpu.memory_space<vmem>>, vector<3x128xf32>
    %c9 = arith.constant 9 : index
    %c0_282 = arith.constant 0 : index
    %473 = tpu.strided_load %arg11[%c9, %c0_282] {strides = array<i32: 2, 1>} : memref<114x128xf32, #tpu.memory_space<vmem>>, vector<3x128xf32>
    %474 = arith.maximumf %471, %472 : vector<3x128xf32>
    %475 = arith.maximumf %474, %473 : vector<3x128xf32>
    %c3 = arith.constant 3 : index
    %c0_283 = arith.constant 0 : index
    %476 = vector.load %arg12[%c3, %c0_283] : memref<112x128xf32, #tpu.memory_space<vmem>>, vector<3x128xf32>
    tpu.vector_store %arg12[%c3, %c0_283], %475 {strides = array<i32>} : memref<112x128xf32, #tpu.memory_space<vmem>>, vector<3x128xf32>,
    %c14_284 = arith.constant 14 : index
    %c0_285 = arith.constant 0 : index
    %477 = tpu.strided_load %arg11[%c14_284, %c0_285] {strides = array<i32: 2, 1>} : memref<114x128xf32, #tpu.memory_space<vmem>>, vector<3x128xf32>
    %c15_286 = arith.constant 15 : index
    %c0_287 = arith.constant 0 : index
    %478 = tpu.strided_load %arg11[%c15_286, %c0_287] {strides = array<i32: 2, 1>} : memref<114x128xf32, #tpu.memory_space<vmem>>, vector<3x128xf32>
    %c16_288 = arith.constant 16 : index
    %c0_289 = arith.constant 0 : index
    %479 = tpu.strided_load %arg11[%c16_288, %c0_289] {strides = array<i32: 2, 1>} : memref<114x128xf32, #tpu.memory_space<vmem>>, vector<3x128xf32>
    %480 = arith.maximumf %477, %478 : vector<3x128xf32>
    %481 = arith.maximumf %480, %479 : vector<3x128xf32>
    %c6 = arith.constant 6 : index
    %c0_290 = arith.constant 0 : index
    %482 = vector.load %arg12[%c6, %c0_290] : memref<112x128xf32, #tpu.memory_space<vmem>>, vector<3x128xf32>
    tpu.vector_store %arg12[%c6, %c0_290], %481 {strides = array<i32>} : memref<112x128xf32, #tpu.memory_space<vmem>>, vector<3x128xf32>,
    %c21_291 = arith.constant 21 : index
    %c0_292 = arith.constant 0 : index
    %483 = tpu.strided_load %arg11[%c21_291, %c0_292] {strides = array<i32: 2, 1>} : memref<114x128xf32, #tpu.memory_space<vmem>>, vector<3x128xf32>
    %c22 = arith.constant 22 : index
    %c0_293 = arith.constant 0 : index
    %484 = tpu.strided_load %arg11[%c22, %c0_293] {strides = array<i32: 2, 1>} : memref<114x128xf32, #tpu.memory_space<vmem>>, vector<3x128xf32>
    %c23 = arith.constant 23 : index
    %c0_294 = arith.constant 0 : index
    %485 = tpu.strided_load %arg11[%c23, %c0_294] {strides = array<i32: 2, 1>} : memref<114x128xf32, #tpu.memory_space<vmem>>, vector<3x128xf32>
    %486 = arith.maximumf %483, %484 : vector<3x128xf32>
    %487 = arith.maximumf %486, %485 : vector<3x128xf32>
    %c9_295 = arith.constant 9 : index
    %c0_296 = arith.constant 0 : index
    %488 = vector.load %arg12[%c9_295, %c0_296] : memref<112x128xf32, #tpu.memory_space<vmem>>, vector<3x128xf32>
    tpu.vector_store %arg12[%c9_295, %c0_296], %487 {strides = array<i32>} : memref<112x128xf32, #tpu.memory_space<vmem>>, vector<3x128xf32>,
    %c28_297 = arith.constant 28 : index
    %c0_298 = arith.constant 0 : index
    %489 = tpu.strided_load %arg11[%c28_297, %c0_298] {strides = array<i32: 2, 1>} : memref<114x128xf32, #tpu.memory_space<vmem>>, vector<3x128xf32>
    %c29_299 = arith.constant 29 : index
    %c0_300 = arith.constant 0 : index
    %490 = tpu.strided_load %arg11[%c29_299, %c0_300] {strides = array<i32: 2, 1>} : memref<114x128xf32, #tpu.memory_space<vmem>>, vector<3x128xf32>
    %c30_301 = arith.constant 30 : index
    %c0_302 = arith.constant 0 : index
    %491 = tpu.strided_load %arg11[%c30_301, %c0_302] {strides = array<i32: 2, 1>} : memref<114x128xf32, #tpu.memory_space<vmem>>, vector<3x128xf32>
    %492 = arith.maximumf %489, %490 : vector<3x128xf32>
    %493 = arith.maximumf %492, %491 : vector<3x128xf32>
    %c12 = arith.constant 12 : index
    %c0_303 = arith.constant 0 : index
    %494 = vector.load %arg12[%c12, %c0_303] : memref<112x128xf32, #tpu.memory_space<vmem>>, vector<3x128xf32>
    tpu.vector_store %arg12[%c12, %c0_303], %493 {strides = array<i32>} : memref<112x128xf32, #tpu.memory_space<vmem>>, vector<3x128xf32>,
    %c35_304 = arith.constant 35 : index
    %c0_305 = arith.constant 0 : index
    %495 = tpu.strided_load %arg11[%c35_304, %c0_305] {strides = array<i32: 2, 1>} : memref<114x128xf32, #tpu.memory_space<vmem>>, vector<3x128xf32>
    %c36 = arith.constant 36 : index
    %c0_306 = arith.constant 0 : index
    %496 = tpu.strided_load %arg11[%c36, %c0_306] {strides = array<i32: 2, 1>} : memref<114x128xf32, #tpu.memory_space<vmem>>, vector<3x128xf32>
    %c37 = arith.constant 37 : index
    %c0_307 = arith.constant 0 : index
    %497 = tpu.strided_load %arg11[%c37, %c0_307] {strides = array<i32: 2, 1>} : memref<114x128xf32, #tpu.memory_space<vmem>>, vector<3x128xf32>
    %498 = arith.maximumf %495, %496 : vector<3x128xf32>
    %499 = arith.maximumf %498, %497 : vector<3x128xf32>
    %c15_308 = arith.constant 15 : index
    %c0_309 = arith.constant 0 : index
    %500 = vector.load %arg12[%c15_308, %c0_309] : memref<112x128xf32, #tpu.memory_space<vmem>>, vector<3x128xf32>
    tpu.vector_store %arg12[%c15_308, %c0_309], %499 {strides = array<i32>} : memref<112x128xf32, #tpu.memory_space<vmem>>, vector<3x128xf32>,
    %c42_310 = arith.constant 42 : index
    %c0_311 = arith.constant 0 : index
    %501 = tpu.strided_load %arg11[%c42_310, %c0_311] {strides = array<i32: 2, 1>} : memref<114x128xf32, #tpu.memory_space<vmem>>, vector<3x128xf32>
    %c43_312 = arith.constant 43 : index
    %c0_313 = arith.constant 0 : index
    %502 = tpu.strided_load %arg11[%c43_312, %c0_313] {strides = array<i32: 2, 1>} : memref<114x128xf32, #tpu.memory_space<vmem>>, vector<3x128xf32>
    %c44_314 = arith.constant 44 : index
    %c0_315 = arith.constant 0 : index
    %503 = tpu.strided_load %arg11[%c44_314, %c0_315] {strides = array<i32: 2, 1>} : memref<114x128xf32, #tpu.memory_space<vmem>>, vector<3x128xf32>
    %504 = arith.maximumf %501, %502 : vector<3x128xf32>
    %505 = arith.maximumf %504, %503 : vector<3x128xf32>
    %c18_316 = arith.constant 18 : index
    %c0_317 = arith.constant 0 : index
    %506 = vector.load %arg12[%c18_316, %c0_317] : memref<112x128xf32, #tpu.memory_space<vmem>>, vector<3x128xf32>
    tpu.vector_store %arg12[%c18_316, %c0_317], %505 {strides = array<i32>} : memref<112x128xf32, #tpu.memory_space<vmem>>, vector<3x128xf32>,
    %c49_318 = arith.constant 49 : index
    %c0_319 = arith.constant 0 : index
    %507 = tpu.strided_load %arg11[%c49_318, %c0_319] {strides = array<i32: 2, 1>} : memref<114x128xf32, #tpu.memory_space<vmem>>, vector<3x128xf32>
    %c50_320 = arith.constant 50 : index
    %c0_321 = arith.constant 0 : index
    %508 = tpu.strided_load %arg11[%c50_320, %c0_321] {strides = array<i32: 2, 1>} : memref<114x128xf32, #tpu.memory_space<vmem>>, vector<3x128xf32>
    %c51 = arith.constant 51 : index
    %c0_322 = arith.constant 0 : index
    %509 = tpu.strided_load %arg11[%c51, %c0_322] {strides = array<i32: 2, 1>} : memref<114x128xf32, #tpu.memory_space<vmem>>, vector<3x128xf32>
    %510 = arith.maximumf %507, %508 : vector<3x128xf32>
    %511 = arith.maximumf %510, %509 : vector<3x128xf32>
    %c21_323 = arith.constant 21 : index
    %c0_324 = arith.constant 0 : index
    %512 = vector.load %arg12[%c21_323, %c0_324] : memref<112x128xf32, #tpu.memory_space<vmem>>, vector<3x128xf32>
    tpu.vector_store %arg12[%c21_323, %c0_324], %511 {strides = array<i32>} : memref<112x128xf32, #tpu.memory_space<vmem>>, vector<3x128xf32>,
    %c0_325 = arith.constant 0 : index
    %c0_326 = arith.constant 0 : index
    %513 = vector.load %arg12[%c0_325, %c0_326] : memref<112x128xf32, #tpu.memory_space<vmem>>, vector<24x128xf32>
    %cst_327 = arith.constant 0.000000e+00 : f32
    %514 = vector.broadcast %cst_327 : f32 to vector<24x128xf32>
    %515 = arith.maximumf %513, %514 : vector<24x128xf32>
    %c1_328 = arith.constant 1 : index
    %c0_329 = arith.constant 0 : index
    %516 = vector.load %arg9[%c1_328, %c0_329] : memref<114x128xf32, #tpu.memory_space<vmem>>, vector<24x128xf32>
    tpu.vector_store %arg9[%c1_328, %c0_329], %515 {strides = array<i32>} : memref<114x128xf32, #tpu.memory_space<vmem>>, vector<24x128xf32>,
    %c25 = arith.constant 25 : index
    %c0_330 = arith.constant 0 : index
    %517 = vector.load %arg9[%c25, %c0_330] : memref<114x128xf32, #tpu.memory_space<vmem>>, vector<1x128xf32>
    tpu.vector_store %arg9[%c25, %c0_330], %0 {strides = array<i32>} : memref<114x128xf32, #tpu.memory_space<vmem>>, vector<1x128xf32>,
    %c0_331 = arith.constant 0 : index
    %c0_332 = arith.constant 0 : index
    %518 = vector.load %arg9[%c0_331, %c0_332] : memref<114x128xf32, #tpu.memory_space<vmem>>, vector<24x128xf32>
    %c2_333 = arith.constant 2 : index
    %c0_334 = arith.constant 0 : index
    %519 = vector.load %arg9[%c2_333, %c0_334] : memref<114x128xf32, #tpu.memory_space<vmem>>, vector<24x128xf32>
    %520 = tpu.iota {dimensions = array<i32: 0>} : vector<24x1xi32>
    %c0_i32_335 = arith.constant 0 : i32
    %521 = vector.broadcast %c0_i32_335 : i32 to vector<24x1xi32>
    %522 = arith.cmpi eq, %520, %521 : vector<24x1xi32>
    %c3_i32 = arith.constant 3 : i32
    %523 = vector.broadcast %c3_i32 : i32 to vector<24x1xi32>
    %524 = arith.cmpi eq, %520, %523 : vector<24x1xi32>
    %525 = arith.ori %522, %524 : vector<24x1xi1>
    %c6_i32_336 = arith.constant 6 : i32
    %526 = vector.broadcast %c6_i32_336 : i32 to vector<24x1xi32>
    %527 = arith.cmpi eq, %520, %526 : vector<24x1xi32>
    %528 = arith.ori %525, %527 : vector<24x1xi1>
    %c9_i32 = arith.constant 9 : i32
    %529 = vector.broadcast %c9_i32 : i32 to vector<24x1xi32>
    %530 = arith.cmpi eq, %520, %529 : vector<24x1xi32>
    %531 = arith.ori %528, %530 : vector<24x1xi1>
    %c12_i32 = arith.constant 12 : i32
    %532 = vector.broadcast %c12_i32 : i32 to vector<24x1xi32>
    %533 = arith.cmpi eq, %520, %532 : vector<24x1xi32>
    %534 = arith.ori %531, %533 : vector<24x1xi1>
    %c15_i32 = arith.constant 15 : i32
    %535 = vector.broadcast %c15_i32 : i32 to vector<24x1xi32>
    %536 = arith.cmpi eq, %520, %535 : vector<24x1xi32>
    %537 = arith.ori %534, %536 : vector<24x1xi1>
    %c18_i32 = arith.constant 18 : i32
    %538 = vector.broadcast %c18_i32 : i32 to vector<24x1xi32>
    %539 = arith.cmpi eq, %520, %538 : vector<24x1xi32>
    %540 = arith.ori %537, %539 : vector<24x1xi1>
    %c21_i32_337 = arith.constant 21 : i32
    %541 = vector.broadcast %c21_i32_337 : i32 to vector<24x1xi32>
    %542 = arith.cmpi eq, %520, %541 : vector<24x1xi32>
    %543 = arith.ori %540, %542 : vector<24x1xi1>
    %cst_338 = arith.constant 0.000000e+00 : f32
    %544 = vector.shape_cast %543 : vector<24x1xi1> to vector<24x1xi1>
    %545 = vector.broadcast %544 : vector<24x1xi1> to vector<24x128xi1>
    %546 = vector.broadcast %cst_338 : f32 to vector<24x128xf32>
    %547 = arith.select %545, %546, %518 : vector<24x128xi1>, vector<24x128xf32>
    %548 = tpu.iota {dimensions = array<i32: 0>} : vector<24x1xi32>
    %c2_i32 = arith.constant 2 : i32
    %549 = vector.broadcast %c2_i32 : i32 to vector<24x1xi32>
    %550 = arith.cmpi eq, %548, %549 : vector<24x1xi32>
    %c5_i32 = arith.constant 5 : i32
    %551 = vector.broadcast %c5_i32 : i32 to vector<24x1xi32>
    %552 = arith.cmpi eq, %548, %551 : vector<24x1xi32>
    %553 = arith.ori %550, %552 : vector<24x1xi1>
    %c8_i32 = arith.constant 8 : i32
    %554 = vector.broadcast %c8_i32 : i32 to vector<24x1xi32>
    %555 = arith.cmpi eq, %548, %554 : vector<24x1xi32>
    %556 = arith.ori %553, %555 : vector<24x1xi1>
    %c11_i32 = arith.constant 11 : i32
    %557 = vector.broadcast %c11_i32 : i32 to vector<24x1xi32>
    %558 = arith.cmpi eq, %548, %557 : vector<24x1xi32>
    %559 = arith.ori %556, %558 : vector<24x1xi1>
    %c14_i32_339 = arith.constant 14 : i32
    %560 = vector.broadcast %c14_i32_339 : i32 to vector<24x1xi32>
    %561 = arith.cmpi eq, %548, %560 : vector<24x1xi32>
    %562 = arith.ori %559, %561 : vector<24x1xi1>
    %c17_i32 = arith.constant 17 : i32
    %563 = vector.broadcast %c17_i32 : i32 to vector<24x1xi32>
    %564 = arith.cmpi eq, %548, %563 : vector<24x1xi32>
    %565 = arith.ori %562, %564 : vector<24x1xi1>
    %c20_i32_340 = arith.constant 20 : i32
    %566 = vector.broadcast %c20_i32_340 : i32 to vector<24x1xi32>
    %567 = arith.cmpi eq, %548, %566 : vector<24x1xi32>
    %568 = arith.ori %565, %567 : vector<24x1xi1>
    %c23_i32 = arith.constant 23 : i32
    %569 = vector.broadcast %c23_i32 : i32 to vector<24x1xi32>
    %570 = arith.cmpi eq, %548, %569 : vector<24x1xi32>
    %571 = arith.ori %568, %570 : vector<24x1xi1>
    %cst_341 = arith.constant 0.000000e+00 : f32
    %572 = vector.shape_cast %571 : vector<24x1xi1> to vector<24x1xi1>
    %573 = vector.broadcast %572 : vector<24x1xi1> to vector<24x128xi1>
    %574 = vector.broadcast %cst_341 : f32 to vector<24x128xf32>
    %575 = arith.select %573, %574, %519 : vector<24x128xi1>, vector<24x128xf32>
    %576 = tpu.concatenate %547, %515, %575 in 1 : vector<24x128xf32>, vector<24x128xf32>, vector<24x128xf32> -> vector<24x384xf32>
    %577 = arith.truncf %576 : vector<24x384xf32> to vector<24x384xbf16>
    %c0_342 = arith.constant 0 : index
    %c0_343 = arith.constant 0 : index
    %578 = vector.load %arg4[%c0_342, %c0_343] : memref<384x128xbf16, #tpu.memory_space<vmem>>, vector<384x128xbf16>
    %cst_344 = arith.constant dense<0.000000e+00> : vector<24x128xf32>
    %579 = tpu.matmul %577, %578, %cst_344 {dimension_numbers = #tpu.dot_dimension_numbers<[1], [0], [0], [1], [0, 0, 1, 1], [], []>} : vector<24x384xbf16>, vector<384x128xbf16>, vector<24x128xf32> -> vector<24x128xf32>
    %c0_345 = arith.constant 0 : index
    %c0_346 = arith.constant 0 : index
    %580 = vector.load %arg5[%c0_345, %c0_346] : memref<1x128xf32, #tpu.memory_space<vmem>>, vector<1x128xf32>
    %581 = vector.broadcast %580 : vector<1x128xf32> to vector<24x128xf32>
    %582 = arith.addf %579, %581 : vector<24x128xf32>
    %cst_347 = arith.constant 0.000000e+00 : f32
    %583 = vector.broadcast %cst_347 : f32 to vector<24x128xf32>
    %584 = arith.maximumf %582, %583 : vector<24x128xf32>
    %c1_348 = arith.constant 1 : index
    %c0_349 = arith.constant 0 : index
    %585 = vector.load %arg9[%c1_348, %c0_349] : memref<114x128xf32, #tpu.memory_space<vmem>>, vector<24x128xf32>
    tpu.vector_store %arg9[%c1_348, %c0_349], %584 {strides = array<i32>} : memref<114x128xf32, #tpu.memory_space<vmem>>, vector<24x128xf32>,
    %c25_350 = arith.constant 25 : index
    %c0_351 = arith.constant 0 : index
    %586 = vector.load %arg9[%c25_350, %c0_351] : memref<114x128xf32, #tpu.memory_space<vmem>>, vector<1x128xf32>
    tpu.vector_store %arg9[%c25_350, %c0_351], %0 {strides = array<i32>} : memref<114x128xf32, #tpu.memory_space<vmem>>, vector<1x128xf32>,
    %c0_352 = arith.constant 0 : index
    %c0_353 = arith.constant 0 : index
    %587 = vector.load %arg9[%c0_352, %c0_353] : memref<114x128xf32, #tpu.memory_space<vmem>>, vector<24x128xf32>
    %c2_354 = arith.constant 2 : index
    %c0_355 = arith.constant 0 : index
    %588 = vector.load %arg9[%c2_354, %c0_355] : memref<114x128xf32, #tpu.memory_space<vmem>>, vector<24x128xf32>
    %589 = tpu.iota {dimensions = array<i32: 0>} : vector<24x1xi32>
    %c0_i32_356 = arith.constant 0 : i32
    %590 = vector.broadcast %c0_i32_356 : i32 to vector<24x1xi32>
    %591 = arith.cmpi eq, %589, %590 : vector<24x1xi32>
    %c3_i32_357 = arith.constant 3 : i32
    %592 = vector.broadcast %c3_i32_357 : i32 to vector<24x1xi32>
    %593 = arith.cmpi eq, %589, %592 : vector<24x1xi32>
    %594 = arith.ori %591, %593 : vector<24x1xi1>
    %c6_i32_358 = arith.constant 6 : i32
    %595 = vector.broadcast %c6_i32_358 : i32 to vector<24x1xi32>
    %596 = arith.cmpi eq, %589, %595 : vector<24x1xi32>
    %597 = arith.ori %594, %596 : vector<24x1xi1>
    %c9_i32_359 = arith.constant 9 : i32
    %598 = vector.broadcast %c9_i32_359 : i32 to vector<24x1xi32>
    %599 = arith.cmpi eq, %589, %598 : vector<24x1xi32>
    %600 = arith.ori %597, %599 : vector<24x1xi1>
    %c12_i32_360 = arith.constant 12 : i32
    %601 = vector.broadcast %c12_i32_360 : i32 to vector<24x1xi32>
    %602 = arith.cmpi eq, %589, %601 : vector<24x1xi32>
    %603 = arith.ori %600, %602 : vector<24x1xi1>
    %c15_i32_361 = arith.constant 15 : i32
    %604 = vector.broadcast %c15_i32_361 : i32 to vector<24x1xi32>
    %605 = arith.cmpi eq, %589, %604 : vector<24x1xi32>
    %606 = arith.ori %603, %605 : vector<24x1xi1>
    %c18_i32_362 = arith.constant 18 : i32
    %607 = vector.broadcast %c18_i32_362 : i32 to vector<24x1xi32>
    %608 = arith.cmpi eq, %589, %607 : vector<24x1xi32>
    %609 = arith.ori %606, %608 : vector<24x1xi1>
    %c21_i32_363 = arith.constant 21 : i32
    %610 = vector.broadcast %c21_i32_363 : i32 to vector<24x1xi32>
    %611 = arith.cmpi eq, %589, %610 : vector<24x1xi32>
    %612 = arith.ori %609, %611 : vector<24x1xi1>
    %cst_364 = arith.constant 0.000000e+00 : f32
    %613 = vector.shape_cast %612 : vector<24x1xi1> to vector<24x1xi1>
    %614 = vector.broadcast %613 : vector<24x1xi1> to vector<24x128xi1>
    %615 = vector.broadcast %cst_364 : f32 to vector<24x128xf32>
    %616 = arith.select %614, %615, %587 : vector<24x128xi1>, vector<24x128xf32>
    %617 = tpu.iota {dimensions = array<i32: 0>} : vector<24x1xi32>
    %c2_i32_365 = arith.constant 2 : i32
    %618 = vector.broadcast %c2_i32_365 : i32 to vector<24x1xi32>
    %619 = arith.cmpi eq, %617, %618 : vector<24x1xi32>
    %c5_i32_366 = arith.constant 5 : i32
    %620 = vector.broadcast %c5_i32_366 : i32 to vector<24x1xi32>
    %621 = arith.cmpi eq, %617, %620 : vector<24x1xi32>
    %622 = arith.ori %619, %621 : vector<24x1xi1>
    %c8_i32_367 = arith.constant 8 : i32
    %623 = vector.broadcast %c8_i32_367 : i32 to vector<24x1xi32>
    %624 = arith.cmpi eq, %617, %623 : vector<24x1xi32>
    %625 = arith.ori %622, %624 : vector<24x1xi1>
    %c11_i32_368 = arith.constant 11 : i32
    %626 = vector.broadcast %c11_i32_368 : i32 to vector<24x1xi32>
    %627 = arith.cmpi eq, %617, %626 : vector<24x1xi32>
    %628 = arith.ori %625, %627 : vector<24x1xi1>
    %c14_i32_369 = arith.constant 14 : i32
    %629 = vector.broadcast %c14_i32_369 : i32 to vector<24x1xi32>
    %630 = arith.cmpi eq, %617, %629 : vector<24x1xi32>
    %631 = arith.ori %628, %630 : vector<24x1xi1>
    %c17_i32_370 = arith.constant 17 : i32
    %632 = vector.broadcast %c17_i32_370 : i32 to vector<24x1xi32>
    %633 = arith.cmpi eq, %617, %632 : vector<24x1xi32>
    %634 = arith.ori %631, %633 : vector<24x1xi1>
    %c20_i32_371 = arith.constant 20 : i32
    %635 = vector.broadcast %c20_i32_371 : i32 to vector<24x1xi32>
    %636 = arith.cmpi eq, %617, %635 : vector<24x1xi32>
    %637 = arith.ori %634, %636 : vector<24x1xi1>
    %c23_i32_372 = arith.constant 23 : i32
    %638 = vector.broadcast %c23_i32_372 : i32 to vector<24x1xi32>
    %639 = arith.cmpi eq, %617, %638 : vector<24x1xi32>
    %640 = arith.ori %637, %639 : vector<24x1xi1>
    %cst_373 = arith.constant 0.000000e+00 : f32
    %641 = vector.shape_cast %640 : vector<24x1xi1> to vector<24x1xi1>
    %642 = vector.broadcast %641 : vector<24x1xi1> to vector<24x128xi1>
    %643 = vector.broadcast %cst_373 : f32 to vector<24x128xf32>
    %644 = arith.select %642, %643, %588 : vector<24x128xi1>, vector<24x128xf32>
    %645 = tpu.concatenate %616, %584, %644 in 1 : vector<24x128xf32>, vector<24x128xf32>, vector<24x128xf32> -> vector<24x384xf32>
    %646 = arith.truncf %645 : vector<24x384xf32> to vector<24x384xbf16>
    %c0_374 = arith.constant 0 : index
    %c0_375 = arith.constant 0 : index
    %647 = vector.load %arg4[%c0_374, %c0_375] : memref<384x128xbf16, #tpu.memory_space<vmem>>, vector<384x128xbf16>
    %cst_376 = arith.constant dense<0.000000e+00> : vector<24x128xf32>
    %648 = tpu.matmul %646, %647, %cst_376 {dimension_numbers = #tpu.dot_dimension_numbers<[1], [0], [0], [1], [0, 0, 1, 1], [], []>} : vector<24x384xbf16>, vector<384x128xbf16>, vector<24x128xf32> -> vector<24x128xf32>
    %c0_377 = arith.constant 0 : index
    %c0_378 = arith.constant 0 : index
    %649 = vector.load %arg5[%c0_377, %c0_378] : memref<1x128xf32, #tpu.memory_space<vmem>>, vector<1x128xf32>
    %650 = vector.broadcast %649 : vector<1x128xf32> to vector<24x128xf32>
    %651 = arith.addf %648, %650 : vector<24x128xf32>
    %652 = arith.addf %651, %513 : vector<24x128xf32>
    %c0_379 = arith.constant 0 : index
    %c0_380 = arith.constant 0 : index
    %653 = vector.load %arg11[%c0_379, %c0_380] : memref<114x128xf32, #tpu.memory_space<vmem>>, vector<24x128xf32>
    tpu.vector_store %arg11[%c0_379, %c0_380], %652 {strides = array<i32>} : memref<114x128xf32, #tpu.memory_space<vmem>>, vector<24x128xf32>,
    %c0_381 = arith.constant 0 : index
    %c0_382 = arith.constant 0 : index
    %654 = tpu.strided_load %arg11[%c0_381, %c0_382] {strides = array<i32: 2, 1>} : memref<114x128xf32, #tpu.memory_space<vmem>>, vector<1x128xf32>
    %c1_383 = arith.constant 1 : index
    %c0_384 = arith.constant 0 : index
    %655 = tpu.strided_load %arg11[%c1_383, %c0_384] {strides = array<i32: 2, 1>} : memref<114x128xf32, #tpu.memory_space<vmem>>, vector<1x128xf32>
    %c2_385 = arith.constant 2 : index
    %c0_386 = arith.constant 0 : index
    %656 = tpu.strided_load %arg11[%c2_385, %c0_386] {strides = array<i32: 2, 1>} : memref<114x128xf32, #tpu.memory_space<vmem>>, vector<1x128xf32>
    %657 = arith.maximumf %654, %655 : vector<1x128xf32>
    %658 = arith.maximumf %657, %656 : vector<1x128xf32>
    %c0_387 = arith.constant 0 : index
    %c0_388 = arith.constant 0 : index
    %659 = vector.load %arg12[%c0_387, %c0_388] : memref<112x128xf32, #tpu.memory_space<vmem>>, vector<1x128xf32>
    tpu.vector_store %arg12[%c0_387, %c0_388], %658 {strides = array<i32>} : memref<112x128xf32, #tpu.memory_space<vmem>>, vector<1x128xf32>,
    %c3_389 = arith.constant 3 : index
    %c0_390 = arith.constant 0 : index
    %660 = tpu.strided_load %arg11[%c3_389, %c0_390] {strides = array<i32: 2, 1>} : memref<114x128xf32, #tpu.memory_space<vmem>>, vector<1x128xf32>
    %c4 = arith.constant 4 : index
    %c0_391 = arith.constant 0 : index
    %661 = tpu.strided_load %arg11[%c4, %c0_391] {strides = array<i32: 2, 1>} : memref<114x128xf32, #tpu.memory_space<vmem>>, vector<1x128xf32>
    %c5 = arith.constant 5 : index
    %c0_392 = arith.constant 0 : index
    %662 = tpu.strided_load %arg11[%c5, %c0_392] {strides = array<i32: 2, 1>} : memref<114x128xf32, #tpu.memory_space<vmem>>, vector<1x128xf32>
    %663 = arith.maximumf %660, %661 : vector<1x128xf32>
    %664 = arith.maximumf %663, %662 : vector<1x128xf32>
    %c1_393 = arith.constant 1 : index
    %c0_394 = arith.constant 0 : index
    %665 = vector.load %arg12[%c1_393, %c0_394] : memref<112x128xf32, #tpu.memory_space<vmem>>, vector<1x128xf32>
    tpu.vector_store %arg12[%c1_393, %c0_394], %664 {strides = array<i32>} : memref<112x128xf32, #tpu.memory_space<vmem>>, vector<1x128xf32>,
    %c6_395 = arith.constant 6 : index
    %c0_396 = arith.constant 0 : index
    %666 = tpu.strided_load %arg11[%c6_395, %c0_396] {strides = array<i32: 2, 1>} : memref<114x128xf32, #tpu.memory_space<vmem>>, vector<1x128xf32>
    %c7_397 = arith.constant 7 : index
    %c0_398 = arith.constant 0 : index
    %667 = tpu.strided_load %arg11[%c7_397, %c0_398] {strides = array<i32: 2, 1>} : memref<114x128xf32, #tpu.memory_space<vmem>>, vector<1x128xf32>
    %c8_399 = arith.constant 8 : index
    %c0_400 = arith.constant 0 : index
    %668 = tpu.strided_load %arg11[%c8_399, %c0_400] {strides = array<i32: 2, 1>} : memref<114x128xf32, #tpu.memory_space<vmem>>, vector<1x128xf32>
    %669 = arith.maximumf %666, %667 : vector<1x128xf32>
    %670 = arith.maximumf %669, %668 : vector<1x128xf32>
    %c2_401 = arith.constant 2 : index
    %c0_402 = arith.constant 0 : index
    %671 = vector.load %arg12[%c2_401, %c0_402] : memref<112x128xf32, #tpu.memory_space<vmem>>, vector<1x128xf32>
    tpu.vector_store %arg12[%c2_401, %c0_402], %670 {strides = array<i32>} : memref<112x128xf32, #tpu.memory_space<vmem>>, vector<1x128xf32>,
    %c9_403 = arith.constant 9 : index
    %c0_404 = arith.constant 0 : index
    %672 = tpu.strided_load %arg11[%c9_403, %c0_404] {strides = array<i32: 2, 1>} : memref<114x128xf32, #tpu.memory_space<vmem>>, vector<1x128xf32>
    %c10 = arith.constant 10 : index
    %c0_405 = arith.constant 0 : index
    %673 = tpu.strided_load %arg11[%c10, %c0_405] {strides = array<i32: 2, 1>} : memref<114x128xf32, #tpu.memory_space<vmem>>, vector<1x128xf32>
    %c11 = arith.constant 11 : index
    %c0_406 = arith.constant 0 : index
    %674 = tpu.strided_load %arg11[%c11, %c0_406] {strides = array<i32: 2, 1>} : memref<114x128xf32, #tpu.memory_space<vmem>>, vector<1x128xf32>
    %675 = arith.maximumf %672, %673 : vector<1x128xf32>
    %676 = arith.maximumf %675, %674 : vector<1x128xf32>
    %c3_407 = arith.constant 3 : index
    %c0_408 = arith.constant 0 : index
    %677 = vector.load %arg12[%c3_407, %c0_408] : memref<112x128xf32, #tpu.memory_space<vmem>>, vector<1x128xf32>
    tpu.vector_store %arg12[%c3_407, %c0_408], %676 {strides = array<i32>} : memref<112x128xf32, #tpu.memory_space<vmem>>, vector<1x128xf32>,
    %c12_409 = arith.constant 12 : index
    %c0_410 = arith.constant 0 : index
    %678 = tpu.strided_load %arg11[%c12_409, %c0_410] {strides = array<i32: 2, 1>} : memref<114x128xf32, #tpu.memory_space<vmem>>, vector<1x128xf32>
    %c13 = arith.constant 13 : index
    %c0_411 = arith.constant 0 : index
    %679 = tpu.strided_load %arg11[%c13, %c0_411] {strides = array<i32: 2, 1>} : memref<114x128xf32, #tpu.memory_space<vmem>>, vector<1x128xf32>
    %c14_412 = arith.constant 14 : index
    %c0_413 = arith.constant 0 : index
    %680 = tpu.strided_load %arg11[%c14_412, %c0_413] {strides = array<i32: 2, 1>} : memref<114x128xf32, #tpu.memory_space<vmem>>, vector<1x128xf32>
    %681 = arith.maximumf %678, %679 : vector<1x128xf32>
    %682 = arith.maximumf %681, %680 : vector<1x128xf32>
    %c4_414 = arith.constant 4 : index
    %c0_415 = arith.constant 0 : index
    %683 = vector.load %arg12[%c4_414, %c0_415] : memref<112x128xf32, #tpu.memory_space<vmem>>, vector<1x128xf32>
    tpu.vector_store %arg12[%c4_414, %c0_415], %682 {strides = array<i32>} : memref<112x128xf32, #tpu.memory_space<vmem>>, vector<1x128xf32>,
    %c15_416 = arith.constant 15 : index
    %c0_417 = arith.constant 0 : index
    %684 = tpu.strided_load %arg11[%c15_416, %c0_417] {strides = array<i32: 2, 1>} : memref<114x128xf32, #tpu.memory_space<vmem>>, vector<1x128xf32>
    %c16_418 = arith.constant 16 : index
    %c0_419 = arith.constant 0 : index
    %685 = tpu.strided_load %arg11[%c16_418, %c0_419] {strides = array<i32: 2, 1>} : memref<114x128xf32, #tpu.memory_space<vmem>>, vector<1x128xf32>
    %c17_420 = arith.constant 17 : index
    %c0_421 = arith.constant 0 : index
    %686 = tpu.strided_load %arg11[%c17_420, %c0_421] {strides = array<i32: 2, 1>} : memref<114x128xf32, #tpu.memory_space<vmem>>, vector<1x128xf32>
    %687 = arith.maximumf %684, %685 : vector<1x128xf32>
    %688 = arith.maximumf %687, %686 : vector<1x128xf32>
    %c5_422 = arith.constant 5 : index
    %c0_423 = arith.constant 0 : index
    %689 = vector.load %arg12[%c5_422, %c0_423] : memref<112x128xf32, #tpu.memory_space<vmem>>, vector<1x128xf32>
    tpu.vector_store %arg12[%c5_422, %c0_423], %688 {strides = array<i32>} : memref<112x128xf32, #tpu.memory_space<vmem>>, vector<1x128xf32>,
    %c18_424 = arith.constant 18 : index
    %c0_425 = arith.constant 0 : index
    %690 = tpu.strided_load %arg11[%c18_424, %c0_425] {strides = array<i32: 2, 1>} : memref<114x128xf32, #tpu.memory_space<vmem>>, vector<1x128xf32>
    %c19 = arith.constant 19 : index
    %c0_426 = arith.constant 0 : index
    %691 = tpu.strided_load %arg11[%c19, %c0_426] {strides = array<i32: 2, 1>} : memref<114x128xf32, #tpu.memory_space<vmem>>, vector<1x128xf32>
    %c20 = arith.constant 20 : index
    %c0_427 = arith.constant 0 : index
    %692 = tpu.strided_load %arg11[%c20, %c0_427] {strides = array<i32: 2, 1>} : memref<114x128xf32, #tpu.memory_space<vmem>>, vector<1x128xf32>
    %693 = arith.maximumf %690, %691 : vector<1x128xf32>
    %694 = arith.maximumf %693, %692 : vector<1x128xf32>
    %c6_428 = arith.constant 6 : index
    %c0_429 = arith.constant 0 : index
    %695 = vector.load %arg12[%c6_428, %c0_429] : memref<112x128xf32, #tpu.memory_space<vmem>>, vector<1x128xf32>
    tpu.vector_store %arg12[%c6_428, %c0_429], %694 {strides = array<i32>} : memref<112x128xf32, #tpu.memory_space<vmem>>, vector<1x128xf32>,
    %c21_430 = arith.constant 21 : index
    %c0_431 = arith.constant 0 : index
    %696 = tpu.strided_load %arg11[%c21_430, %c0_431] {strides = array<i32: 2, 1>} : memref<114x128xf32, #tpu.memory_space<vmem>>, vector<1x128xf32>
    %c22_432 = arith.constant 22 : index
    %c0_433 = arith.constant 0 : index
    %697 = tpu.strided_load %arg11[%c22_432, %c0_433] {strides = array<i32: 2, 1>} : memref<114x128xf32, #tpu.memory_space<vmem>>, vector<1x128xf32>
    %c23_434 = arith.constant 23 : index
    %c0_435 = arith.constant 0 : index
    %698 = tpu.strided_load %arg11[%c23_434, %c0_435] {strides = array<i32: 2, 1>} : memref<114x128xf32, #tpu.memory_space<vmem>>, vector<1x128xf32>
    %699 = arith.maximumf %696, %697 : vector<1x128xf32>
    %700 = arith.maximumf %699, %698 : vector<1x128xf32>
    %c7_436 = arith.constant 7 : index
    %c0_437 = arith.constant 0 : index
    %701 = vector.load %arg12[%c7_436, %c0_437] : memref<112x128xf32, #tpu.memory_space<vmem>>, vector<1x128xf32>
    tpu.vector_store %arg12[%c7_436, %c0_437], %700 {strides = array<i32>} : memref<112x128xf32, #tpu.memory_space<vmem>>, vector<1x128xf32>,
    %c0_438 = arith.constant 0 : index
    %c0_439 = arith.constant 0 : index
    %702 = vector.load %arg12[%c0_438, %c0_439] : memref<112x128xf32, #tpu.memory_space<vmem>>, vector<8x128xf32>
    %cst_440 = arith.constant 0.000000e+00 : f32
    %703 = vector.broadcast %cst_440 : f32 to vector<8x128xf32>
    %704 = arith.maximumf %702, %703 : vector<8x128xf32>
    %c1_441 = arith.constant 1 : index
    %c0_442 = arith.constant 0 : index
    %705 = vector.load %arg9[%c1_441, %c0_442] : memref<114x128xf32, #tpu.memory_space<vmem>>, vector<8x128xf32>
    tpu.vector_store %arg9[%c1_441, %c0_442], %704 {strides = array<i32>} : memref<114x128xf32, #tpu.memory_space<vmem>>, vector<8x128xf32>,
    %c9_443 = arith.constant 9 : index
    %c0_444 = arith.constant 0 : index
    %706 = vector.load %arg9[%c9_443, %c0_444] : memref<114x128xf32, #tpu.memory_space<vmem>>, vector<1x128xf32>
    tpu.vector_store %arg9[%c9_443, %c0_444], %0 {strides = array<i32>} : memref<114x128xf32, #tpu.memory_space<vmem>>, vector<1x128xf32>,
    %c0_445 = arith.constant 0 : index
    %c0_446 = arith.constant 0 : index
    %707 = vector.load %arg9[%c0_445, %c0_446] : memref<114x128xf32, #tpu.memory_space<vmem>>, vector<8x128xf32>
    %c2_447 = arith.constant 2 : index
    %c0_448 = arith.constant 0 : index
    %708 = vector.load %arg9[%c2_447, %c0_448] : memref<114x128xf32, #tpu.memory_space<vmem>>, vector<8x128xf32>
    %709 = tpu.iota {dimensions = array<i32: 0>} : vector<8x1xi32>
    %c0_i32_449 = arith.constant 0 : i32
    %710 = vector.broadcast %c0_i32_449 : i32 to vector<8x1xi32>
    %711 = arith.cmpi eq, %709, %710 : vector<8x1xi32>
    %c1_i32 = arith.constant 1 : i32
    %712 = vector.broadcast %c1_i32 : i32 to vector<8x1xi32>
    %713 = arith.cmpi eq, %709, %712 : vector<8x1xi32>
    %714 = arith.ori %711, %713 : vector<8x1xi1>
    %c2_i32_450 = arith.constant 2 : i32
    %715 = vector.broadcast %c2_i32_450 : i32 to vector<8x1xi32>
    %716 = arith.cmpi eq, %709, %715 : vector<8x1xi32>
    %717 = arith.ori %714, %716 : vector<8x1xi1>
    %c3_i32_451 = arith.constant 3 : i32
    %718 = vector.broadcast %c3_i32_451 : i32 to vector<8x1xi32>
    %719 = arith.cmpi eq, %709, %718 : vector<8x1xi32>
    %720 = arith.ori %717, %719 : vector<8x1xi1>
    %c4_i32 = arith.constant 4 : i32
    %721 = vector.broadcast %c4_i32 : i32 to vector<8x1xi32>
    %722 = arith.cmpi eq, %709, %721 : vector<8x1xi32>
    %723 = arith.ori %720, %722 : vector<8x1xi1>
    %c5_i32_452 = arith.constant 5 : i32
    %724 = vector.broadcast %c5_i32_452 : i32 to vector<8x1xi32>
    %725 = arith.cmpi eq, %709, %724 : vector<8x1xi32>
    %726 = arith.ori %723, %725 : vector<8x1xi1>
    %c6_i32_453 = arith.constant 6 : i32
    %727 = vector.broadcast %c6_i32_453 : i32 to vector<8x1xi32>
    %728 = arith.cmpi eq, %709, %727 : vector<8x1xi32>
    %729 = arith.ori %726, %728 : vector<8x1xi1>
    %c7_i32_454 = arith.constant 7 : i32
    %730 = vector.broadcast %c7_i32_454 : i32 to vector<8x1xi32>
    %731 = arith.cmpi eq, %709, %730 : vector<8x1xi32>
    %732 = arith.ori %729, %731 : vector<8x1xi1>
    %cst_455 = arith.constant 0.000000e+00 : f32
    %733 = vector.shape_cast %732 : vector<8x1xi1> to vector<8x1xi1>
    %734 = vector.broadcast %733 : vector<8x1xi1> to vector<8x128xi1>
    %735 = vector.broadcast %cst_455 : f32 to vector<8x128xf32>
    %736 = arith.select %734, %735, %707 : vector<8x128xi1>, vector<8x128xf32>
    %737 = tpu.iota {dimensions = array<i32: 0>} : vector<8x1xi32>
    %c0_i32_456 = arith.constant 0 : i32
    %738 = vector.broadcast %c0_i32_456 : i32 to vector<8x1xi32>
    %739 = arith.cmpi eq, %737, %738 : vector<8x1xi32>
    %c1_i32_457 = arith.constant 1 : i32
    %740 = vector.broadcast %c1_i32_457 : i32 to vector<8x1xi32>
    %741 = arith.cmpi eq, %737, %740 : vector<8x1xi32>
    %742 = arith.ori %739, %741 : vector<8x1xi1>
    %c2_i32_458 = arith.constant 2 : i32
    %743 = vector.broadcast %c2_i32_458 : i32 to vector<8x1xi32>
    %744 = arith.cmpi eq, %737, %743 : vector<8x1xi32>
    %745 = arith.ori %742, %744 : vector<8x1xi1>
    %c3_i32_459 = arith.constant 3 : i32
    %746 = vector.broadcast %c3_i32_459 : i32 to vector<8x1xi32>
    %747 = arith.cmpi eq, %737, %746 : vector<8x1xi32>
    %748 = arith.ori %745, %747 : vector<8x1xi1>
    %c4_i32_460 = arith.constant 4 : i32
    %749 = vector.broadcast %c4_i32_460 : i32 to vector<8x1xi32>
    %750 = arith.cmpi eq, %737, %749 : vector<8x1xi32>
    %751 = arith.ori %748, %750 : vector<8x1xi1>
    %c5_i32_461 = arith.constant 5 : i32
    %752 = vector.broadcast %c5_i32_461 : i32 to vector<8x1xi32>
    %753 = arith.cmpi eq, %737, %752 : vector<8x1xi32>
    %754 = arith.ori %751, %753 : vector<8x1xi1>
    %c6_i32_462 = arith.constant 6 : i32
    %755 = vector.broadcast %c6_i32_462 : i32 to vector<8x1xi32>
    %756 = arith.cmpi eq, %737, %755 : vector<8x1xi32>
    %757 = arith.ori %754, %756 : vector<8x1xi1>
    %c7_i32_463 = arith.constant 7 : i32
    %758 = vector.broadcast %c7_i32_463 : i32 to vector<8x1xi32>
    %759 = arith.cmpi eq, %737, %758 : vector<8x1xi32>
    %760 = arith.ori %757, %759 : vector<8x1xi1>
    %cst_464 = arith.constant 0.000000e+00 : f32
    %761 = vector.shape_cast %760 : vector<8x1xi1> to vector<8x1xi1>
    %762 = vector.broadcast %761 : vector<8x1xi1> to vector<8x128xi1>
    %763 = vector.broadcast %cst_464 : f32 to vector<8x128xf32>
    %764 = arith.select %762, %763, %708 : vector<8x128xi1>, vector<8x128xf32>
    %765 = tpu.concatenate %736, %704, %764 in 1 : vector<8x128xf32>, vector<8x128xf32>, vector<8x128xf32> -> vector<8x384xf32>
    %766 = arith.truncf %765 : vector<8x384xf32> to vector<8x384xbf16>
    %c0_465 = arith.constant 0 : index
    %c0_466 = arith.constant 0 : index
    %767 = vector.load %arg4[%c0_465, %c0_466] : memref<384x128xbf16, #tpu.memory_space<vmem>>, vector<384x128xbf16>
    %cst_467 = arith.constant dense<0.000000e+00> : vector<8x128xf32>
    %768 = tpu.matmul %766, %767, %cst_467 {dimension_numbers = #tpu.dot_dimension_numbers<[1], [0], [0], [1], [0, 0, 1, 1], [], []>} : vector<8x384xbf16>, vector<384x128xbf16>, vector<8x128xf32> -> vector<8x128xf32>
    %c0_468 = arith.constant 0 : index
    %c0_469 = arith.constant 0 : index
    %769 = vector.load %arg5[%c0_468, %c0_469] : memref<1x128xf32, #tpu.memory_space<vmem>>, vector<1x128xf32>
    %770 = vector.broadcast %769 : vector<1x128xf32> to vector<8x128xf32>
    %771 = arith.addf %768, %770 : vector<8x128xf32>
    %cst_470 = arith.constant 0.000000e+00 : f32
    %772 = vector.broadcast %cst_470 : f32 to vector<8x128xf32>
    %773 = arith.maximumf %771, %772 : vector<8x128xf32>
    %c1_471 = arith.constant 1 : index
    %c0_472 = arith.constant 0 : index
    %774 = vector.load %arg9[%c1_471, %c0_472] : memref<114x128xf32, #tpu.memory_space<vmem>>, vector<8x128xf32>
    tpu.vector_store %arg9[%c1_471, %c0_472], %773 {strides = array<i32>} : memref<114x128xf32, #tpu.memory_space<vmem>>, vector<8x128xf32>,
    %c9_473 = arith.constant 9 : index
    %c0_474 = arith.constant 0 : index
    %775 = vector.load %arg9[%c9_473, %c0_474] : memref<114x128xf32, #tpu.memory_space<vmem>>, vector<1x128xf32>
    tpu.vector_store %arg9[%c9_473, %c0_474], %0 {strides = array<i32>} : memref<114x128xf32, #tpu.memory_space<vmem>>, vector<1x128xf32>,
    %c0_475 = arith.constant 0 : index
    %c0_476 = arith.constant 0 : index
    %776 = vector.load %arg9[%c0_475, %c0_476] : memref<114x128xf32, #tpu.memory_space<vmem>>, vector<8x128xf32>
    %c2_477 = arith.constant 2 : index
    %c0_478 = arith.constant 0 : index
    %777 = vector.load %arg9[%c2_477, %c0_478] : memref<114x128xf32, #tpu.memory_space<vmem>>, vector<8x128xf32>
    %778 = tpu.iota {dimensions = array<i32: 0>} : vector<8x1xi32>
    %c0_i32_479 = arith.constant 0 : i32
    %779 = vector.broadcast %c0_i32_479 : i32 to vector<8x1xi32>
    %780 = arith.cmpi eq, %778, %779 : vector<8x1xi32>
    %c1_i32_480 = arith.constant 1 : i32
    %781 = vector.broadcast %c1_i32_480 : i32 to vector<8x1xi32>
    %782 = arith.cmpi eq, %778, %781 : vector<8x1xi32>
    %783 = arith.ori %780, %782 : vector<8x1xi1>
    %c2_i32_481 = arith.constant 2 : i32
    %784 = vector.broadcast %c2_i32_481 : i32 to vector<8x1xi32>
    %785 = arith.cmpi eq, %778, %784 : vector<8x1xi32>
    %786 = arith.ori %783, %785 : vector<8x1xi1>
    %c3_i32_482 = arith.constant 3 : i32
    %787 = vector.broadcast %c3_i32_482 : i32 to vector<8x1xi32>
    %788 = arith.cmpi eq, %778, %787 : vector<8x1xi32>
    %789 = arith.ori %786, %788 : vector<8x1xi1>
    %c4_i32_483 = arith.constant 4 : i32
    %790 = vector.broadcast %c4_i32_483 : i32 to vector<8x1xi32>
    %791 = arith.cmpi eq, %778, %790 : vector<8x1xi32>
    %792 = arith.ori %789, %791 : vector<8x1xi1>
    %c5_i32_484 = arith.constant 5 : i32
    %793 = vector.broadcast %c5_i32_484 : i32 to vector<8x1xi32>
    %794 = arith.cmpi eq, %778, %793 : vector<8x1xi32>
    %795 = arith.ori %792, %794 : vector<8x1xi1>
    %c6_i32_485 = arith.constant 6 : i32
    %796 = vector.broadcast %c6_i32_485 : i32 to vector<8x1xi32>
    %797 = arith.cmpi eq, %778, %796 : vector<8x1xi32>
    %798 = arith.ori %795, %797 : vector<8x1xi1>
    %c7_i32_486 = arith.constant 7 : i32
    %799 = vector.broadcast %c7_i32_486 : i32 to vector<8x1xi32>
    %800 = arith.cmpi eq, %778, %799 : vector<8x1xi32>
    %801 = arith.ori %798, %800 : vector<8x1xi1>
    %cst_487 = arith.constant 0.000000e+00 : f32
    %802 = vector.shape_cast %801 : vector<8x1xi1> to vector<8x1xi1>
    %803 = vector.broadcast %802 : vector<8x1xi1> to vector<8x128xi1>
    %804 = vector.broadcast %cst_487 : f32 to vector<8x128xf32>
    %805 = arith.select %803, %804, %776 : vector<8x128xi1>, vector<8x128xf32>
    %806 = tpu.iota {dimensions = array<i32: 0>} : vector<8x1xi32>
    %c0_i32_488 = arith.constant 0 : i32
    %807 = vector.broadcast %c0_i32_488 : i32 to vector<8x1xi32>
    %808 = arith.cmpi eq, %806, %807 : vector<8x1xi32>
    %c1_i32_489 = arith.constant 1 : i32
    %809 = vector.broadcast %c1_i32_489 : i32 to vector<8x1xi32>
    %810 = arith.cmpi eq, %806, %809 : vector<8x1xi32>
    %811 = arith.ori %808, %810 : vector<8x1xi1>
    %c2_i32_490 = arith.constant 2 : i32
    %812 = vector.broadcast %c2_i32_490 : i32 to vector<8x1xi32>
    %813 = arith.cmpi eq, %806, %812 : vector<8x1xi32>
    %814 = arith.ori %811, %813 : vector<8x1xi1>
    %c3_i32_491 = arith.constant 3 : i32
    %815 = vector.broadcast %c3_i32_491 : i32 to vector<8x1xi32>
    %816 = arith.cmpi eq, %806, %815 : vector<8x1xi32>
    %817 = arith.ori %814, %816 : vector<8x1xi1>
    %c4_i32_492 = arith.constant 4 : i32
    %818 = vector.broadcast %c4_i32_492 : i32 to vector<8x1xi32>
    %819 = arith.cmpi eq, %806, %818 : vector<8x1xi32>
    %820 = arith.ori %817, %819 : vector<8x1xi1>
    %c5_i32_493 = arith.constant 5 : i32
    %821 = vector.broadcast %c5_i32_493 : i32 to vector<8x1xi32>
    %822 = arith.cmpi eq, %806, %821 : vector<8x1xi32>
    %823 = arith.ori %820, %822 : vector<8x1xi1>
    %c6_i32_494 = arith.constant 6 : i32
    %824 = vector.broadcast %c6_i32_494 : i32 to vector<8x1xi32>
    %825 = arith.cmpi eq, %806, %824 : vector<8x1xi32>
    %826 = arith.ori %823, %825 : vector<8x1xi1>
    %c7_i32_495 = arith.constant 7 : i32
    %827 = vector.broadcast %c7_i32_495 : i32 to vector<8x1xi32>
    %828 = arith.cmpi eq, %806, %827 : vector<8x1xi32>
    %829 = arith.ori %826, %828 : vector<8x1xi1>
    %cst_496 = arith.constant 0.000000e+00 : f32
    %830 = vector.shape_cast %829 : vector<8x1xi1> to vector<8x1xi1>
    %831 = vector.broadcast %830 : vector<8x1xi1> to vector<8x128xi1>
    %832 = vector.broadcast %cst_496 : f32 to vector<8x128xf32>
    %833 = arith.select %831, %832, %777 : vector<8x128xi1>, vector<8x128xf32>
    %834 = tpu.concatenate %805, %773, %833 in 1 : vector<8x128xf32>, vector<8x128xf32>, vector<8x128xf32> -> vector<8x384xf32>
    %835 = arith.truncf %834 : vector<8x384xf32> to vector<8x384xbf16>
    %c0_497 = arith.constant 0 : index
    %c0_498 = arith.constant 0 : index
    %836 = vector.load %arg4[%c0_497, %c0_498] : memref<384x128xbf16, #tpu.memory_space<vmem>>, vector<384x128xbf16>
    %cst_499 = arith.constant dense<0.000000e+00> : vector<8x128xf32>
    %837 = tpu.matmul %835, %836, %cst_499 {dimension_numbers = #tpu.dot_dimension_numbers<[1], [0], [0], [1], [0, 0, 1, 1], [], []>} : vector<8x384xbf16>, vector<384x128xbf16>, vector<8x128xf32> -> vector<8x128xf32>
    %c0_500 = arith.constant 0 : index
    %c0_501 = arith.constant 0 : index
    %838 = vector.load %arg5[%c0_500, %c0_501] : memref<1x128xf32, #tpu.memory_space<vmem>>, vector<1x128xf32>
    %839 = vector.broadcast %838 : vector<1x128xf32> to vector<8x128xf32>
    %840 = arith.addf %837, %839 : vector<8x128xf32>
    %841 = arith.addf %840, %702 : vector<8x128xf32>
    %c0_502 = arith.constant 0 : index
    %c0_503 = arith.constant 0 : index
    %842 = vector.load %arg6[%c0_502, %c0_503] : memref<128x2xf32, #tpu.memory_space<vmem>>, vector<128x2xf32>
    %cst_504 = arith.constant dense<0.000000e+00> : vector<8x2xf32>
    %843 = tpu.matmul %841, %842, %cst_504 {dimension_numbers = #tpu.dot_dimension_numbers<[1], [0], [0], [1], [0, 0, 1, 1], [], []>} : vector<8x128xf32>, vector<128x2xf32>, vector<8x2xf32> -> vector<8x2xf32>
    %c0_505 = arith.constant 0 : index
    %c0_506 = arith.constant 0 : index
    %844 = vector.load %arg7[%c0_505, %c0_506] : memref<1x2xf32, #tpu.memory_space<vmem>>, vector<1x2xf32>
    %845 = vector.broadcast %844 : vector<1x2xf32> to vector<8x2xf32>
    %846 = arith.addf %843, %845 : vector<8x2xf32>
    %847 = math.absf %846 : vector<8x2xf32>
    %cst_507 = arith.constant 0.000000e+00 : f32
    %848 = vector.broadcast %cst_507 : f32 to vector<8x2xf32>
    %849 = arith.subf %848, %847 : vector<8x2xf32>
    %850 = math.exp %849 : vector<8x2xf32>
    %cst_508 = arith.constant 0.000000e+00 : f32
    %851 = vector.broadcast %cst_508 : f32 to vector<8x2xf32>
    %852 = arith.cmpf oge, %846, %851 : vector<8x2xf32>
    %cst_509 = arith.constant 1.000000e+00 : f32
    %853 = vector.broadcast %cst_509 : f32 to vector<8x2xf32>
    %854 = arith.select %852, %853, %850 : vector<8x2xi1>, vector<8x2xf32>
    %cst_510 = arith.constant 1.000000e+00 : f32
    %855 = vector.broadcast %cst_510 : f32 to vector<8x2xf32>
    %856 = arith.addf %855, %850 : vector<8x2xf32>
    %857 = arith.divf %854, %856 : vector<8x2xf32>
    %c0_511 = arith.constant 0 : index
    %c0_512 = arith.constant 0 : index
    %c0_513 = arith.constant 0 : index
    %858 = vector.load %arg8[%c0_511, %c0_512, %c0_513] : memref<1x8x2xf32, #tpu.memory_space<vmem>>, vector<1x8x2xf32>
    %859 = vector.shape_cast %858 : vector<1x8x2xf32> to vector<8x2xf32>
    %860 = vector.shape_cast %857 : vector<8x2xf32> to vector<1x8x2xf32>
    tpu.vector_store %arg8[%c0_511, %c0_512, %c0_513], %860 {strides = array<i32>} : memref<1x8x2xf32, #tpu.memory_space<vmem>>, vector<1x8x2xf32>,
    return
  }
  func.func @transform_0(%arg0: i32) -> (i32, i32, i32) {
    %c0_i32 = arith.constant 0 : i32
    %c0_i32_0 = arith.constant 0 : i32
    %c0_i32_1 = arith.constant 0 : i32
    return %arg0, %c0_i32, %c0_i32_0 : i32, i32, i32
  }
  func.func @transform_1(%arg0: i32) -> (i32, i32) {
    %c0_i32 = arith.constant 0 : i32
    %c0_i32_0 = arith.constant 0 : i32
    %c0_i32_1 = arith.constant 0 : i32
    return %c0_i32, %c0_i32_0 : i32, i32
  }
  func.func @transform_2(%arg0: i32) -> (i32, i32) {
    %c0_i32 = arith.constant 0 : i32
    %c0_i32_0 = arith.constant 0 : i32
    %c0_i32_1 = arith.constant 0 : i32
    return %c0_i32, %c0_i32_0 : i32, i32
  }
  func.func @transform_3(%arg0: i32) -> (i32, i32) {
    %c0_i32 = arith.constant 0 : i32
    %c0_i32_0 = arith.constant 0 : i32
    %c0_i32_1 = arith.constant 0 : i32
    return %c0_i32, %c0_i32_0 : i32, i32
  }
  func.func @transform_4(%arg0: i32) -> (i32, i32) {
    %c0_i32 = arith.constant 0 : i32
    %c0_i32_0 = arith.constant 0 : i32
    %c0_i32_1 = arith.constant 0 : i32
    return %c0_i32, %c0_i32_0 : i32, i32
  }
  func.func @transform_5(%arg0: i32) -> (i32, i32) {
    %c0_i32 = arith.constant 0 : i32
    %c0_i32_0 = arith.constant 0 : i32
    %c0_i32_1 = arith.constant 0 : i32
    return %c0_i32, %c0_i32_0 : i32, i32
  }
  func.func @transform_6(%arg0: i32) -> (i32, i32) {
    %c0_i32 = arith.constant 0 : i32
    %c0_i32_0 = arith.constant 0 : i32
    %c0_i32_1 = arith.constant 0 : i32
    return %c0_i32, %c0_i32_0 : i32, i32
  }
  func.func @transform_7(%arg0: i32) -> (i32, i32, i32) {
    %c0_i32 = arith.constant 0 : i32
    %c0_i32_0 = arith.constant 0 : i32
    %c0_i32_1 = arith.constant 0 : i32
    return %arg0, %c0_i32, %c0_i32_0 : i32, i32, i32
  }
}

</mosaic_0001>

<bundles_post_ra>
// kernel: dpcnn_forward.1
= control target key start
LH: loop header
LB: loop body
LE: loop exit
PB: predicated region body
PF: predicated region fallthrough
CT: control target
= control target key end

     0   :  { %s6684_s24 = smov 0   ;;  %s8207_s0 = inlined_call_operand.vmem [shape: f32[2,128,128], index: 0, kind: input, shape index: {}]   ;;  %s8208_s1 = inlined_call_operand.vmem [shape: bf16[384,128], index: 1, kind: input, shape index: {}]   ;;  %s8209_s2 = inlined_call_operand.vmem [shape: f32[1,128], index: 2, kind: input, shape index: {}]   ;;  %s8210_s3 = inlined_call_operand.vmem [shape: bf16[384,128], index: 3, kind: input, shape index: {}]   ;;  %s8211_s4 = inlined_call_operand.vmem [shape: f32[1,128], index: 4, kind: input, shape index: {}]   ;;  %s8212_s5 = inlined_call_operand.vmem [shape: f32[128,2], index: 5, kind: input, shape index: {}]   ;;  %s8213_s6 = inlined_call_operand.vmem [shape: f32[1,2], index: 6, kind: input, shape index: {}]   ;;  %s8214_s7 = inlined_call_operand.vmem [shape: f32[2,8,2], index: 7, kind: output, shape index: {}]  }
   0x1 LB: > { %s5091_s25 = sadd.s32 4294967295, %s6637_s24   ;;  %p5095_p0 = scmp.ge.s32.totalorder %s6637_s24, 1  ;;  %s6637_s24 = sphi %s6684_s24, %s17_s24  }
   0x2   : > { %p237_p1 = scmp.lt.s32.totalorder %s6637_s24, 3 }
   0x4   : > { %p238_p2 = pnand %p5095_p0, %p237_p1 }
   0x5   : > { %v6411_v0 = vld [vmem:[%s8208_s1 + $0x40] sm:$0xff] (!%p238_p2)   ;;  %v6639_v2 = vmov (!%p238_p2), 0.0   ;;  %v6414_v4 = vld [vmem:[%s8208_s1 + $0x48] sm:$0xff] (!%p238_p2)   ;;  %vm8227_vm0 = vmmov (!%p238_p2), 0   ;;  %v6417_v7 = vld [vmem:[%s8208_s1 + $0x50] sm:$0xff] (!%p238_p2)   ;;  %p268_p3 = scmp.lt.s32.totalorder (!%p238_p2), %s5091_s25, 1 }
   0x6   : > { %241 = sbr.rel (%p238_p2) target bundleno = 2503 (0x9c7), region = 48  ;;  %v6412_v1 = vld [vmem:[%s8208_s1] sm:$0xff] (!%p238_p2)   ;;  %6079 = vmatprep.subr.bf16.mxu1 (!%p238_p2), %v6639_v2  ;;  %278 = vst [vmem:[#allocation2] sm:$0x1] (!%p238_p2), %v6639_v2  ;;  %996 = vst [vmem:[#allocation2 + $0x71] sm:$0x1] (!%p238_p2), %v6639_v2  ;;  %5601 = vmatprep.subr.bf16.mxu0 (!%p238_p2), %v6411_v0 }
   0x7   : > { %v6413_v3 = vld [vmem:[%s8208_s1 + $0x80] sm:$0xff] (!%p238_p2)   ;;  %5602 = vmatpush3.bf16.msra.mxu0 (!%p238_p2), %v6412_v1  ;;  %6095 = vmatprep.mubr.msk.bf16.mxu1 (!%p238_p2), %vm8227_vm0, %v6639_v2  ;;  %v6415_v5 = vld [vmem:[%s8208_s1 + $0x8] sm:$0xff] (!%p238_p2)   ;;  %v6418_v8 = vld [vmem:[%s8208_s1 + $0x10] sm:$0xff] (!%p238_p2)   ;;  %vm295_vm1 = vcmask (!%p238_p2), 1045504   ;;  %vm335_vm2 = vcmask (!%p238_p2), 1043456   ;;  %vm375_vm3 = vcmask (!%p238_p2), 1041408  }
   0x8   : > { %6080 = vmatpush3.bf16.msra.mxu1 (!%p238_p2), %v6413_v3  ;;  %5603 = vmatprep.subr.bf16.mxu0 (!%p238_p2), %v6414_v4  ;;  %v6416_v6 = vld [vmem:[%s8208_s1 + $0x88] sm:$0xff] (!%p238_p2)   ;;  %v6419_v9 = vld [vmem:[%s8208_s1 + $0x90] sm:$0xff] (!%p238_p2)   ;;  %v6420_v10 = vld [vmem:[%s8208_s1 + $0x58] sm:$0xff] (!%p238_p2)   ;;  %vm6641_vm11 = vmmov (!%p238_p2), 1  }
   0x9   : > { %6081 = vmatprep.subr.bf16.mxu1 (!%p238_p2), %v6639_v2  ;;  %v6421_v11 = vld [vmem:[%s8208_s1 + $0x18] sm:$0xff] (!%p238_p2)   ;;  %v6423_v13 = vld [vmem:[%s8208_s1 + $0x60] sm:$0xff] (!%p238_p2)   ;;  %v6426_v16 = vld [vmem:[%s8208_s1 + $0x68] sm:$0xff] (!%p238_p2)  }
   0xa   : > { %v6422_v12 = vld [vmem:[%s8208_s1 + $0x98] sm:$0xff] (!%p238_p2)   ;;  %v6424_v14 = vld [vmem:[%s8208_s1 + $0x20] sm:$0xff] (!%p238_p2)   ;;  %v6427_v17 = vld [vmem:[%s8208_s1 + $0x28] sm:$0xff] (!%p238_p2)  }
   0xb   : > { %5604 = vmatpush3.bf16.msra.mxu0 (!%p238_p2), %v6415_v5  ;;  %v6425_v15 = vld [vmem:[%s8208_s1 + $0xa0] sm:$0xff] (!%p238_p2)   ;;  %v6428_v18 = vld [vmem:[%s8208_s1 + $0xa8] sm:$0xff] (!%p238_p2)   ;;  %v6429_v19 = vld [vmem:[%s8208_s1 + $0x70] sm:$0xff] (!%p238_p2)  }
   0xc   : > { %6082 = vmatpush3.bf16.msra.mxu1 (!%p238_p2), %v6416_v6  ;;  %5605 = vmatprep.subr.bf16.mxu0 (!%p238_p2), %v6417_v7  ;;  %v6430_v20 = vld [vmem:[%s8208_s1 + $0x30] sm:$0xff] (!%p238_p2)   ;;  %v6432_v25 = vld [vmem:[%s8208_s1 + $0x78] sm:$0xff] (!%p238_p2)  }
   0xd   : > { %6083 = vmatprep.subr.bf16.mxu1 %v6639_v2  ;;  %s8321_s25 = smov (!%p268_p3, %s5091_s25), 1  ;;  %v6431_v21 = vld [vmem:[%s8208_s1 + $0xb0] sm:$0xff]   ;;  %v6433_v27 = vld [vmem:[%s8208_s1 + $0x38] sm:$0xff]  }
   0xe   : > { %s5583_s14 = sshll.u32 %s8321_s25, 7  ;;  %v6434_v31 = vld [vmem:[%s8208_s1 + $0xb8] sm:$0xff]   ;;  %s5098_s19 = sshll.u32 %s8321_s25, 3 }
   0xf   : > { %5606 = vmatpush3.bf16.msra.mxu0 %v6418_v8  ;;  %s6768_s23 = scalar_lea.vmem %s8207_s0, %s5583_s14  ;;  %s276_s22 = scalar_lea.vmem %s8214_s7, %s5098_s19 }
  0x10   : > { %6084 = vmatpush3.bf16.msra.mxu1 %v6419_v9  ;;  %5607 = vmatprep.subr.bf16.mxu0 %v6420_v10  ;;  %v6778_v22 = vld [vmem:[%s6768_s23 + $0x1] sm:$0xff]  ;;  %v284_v23 = vld [vmem:[%s6768_s23 + $0x9] sm:$0x3f]  ;;  %v305_v24 = vld [vmem:[%s6768_s23 + $0x11] sm:$0xff] }
  0x11   : > { %6085 = vmatprep.subr.bf16.mxu1 %v6639_v2  ;;  %286 = vst [vmem:[#allocation3 + $0x20] sm:$0x3f] %v284_v23  ;;  %v309_v26 = vrot.slane %v305_v24, 2  ;;  %v6790_v28 = vld [vmem:[%s6768_s23] sm:$0xff]  ;;  %v280_v29 = vld [vmem:[%s6768_s23 + $0x8] sm:$0x3f] }
  0x12   : > { %v291_v30 = vld [vmem:[%s6768_s23 + $0x10] sm:$0xff]  ;;  %282 = vst [vmem:[#allocation3 + $0x18] sm:$0x3f] %v280_v29  ;;  %v6798_v33 = vld [vmem:[%s6768_s23 + $0x2] sm:$0xff]  ;;  %v288_v34 = vld [vmem:[%s6768_s23 + $0xa] sm:$0x3f] }
  0x13   : > { %5608 = vmatpush3.bf16.msra.mxu0 %v6421_v11  ;;  %315 = vst [vmem:[#allocation3 + $0x20] sm:$0xc0] %v309_v26  ;;  %v296_v32 = vrot.slane %v291_v30, 2  ;;  %v318_v35 = vld [vmem:[%s6768_s23 + $0x12] sm:$0xff]  ;;  %290 = vst [vmem:[#allocation3 + $0x28] sm:$0x3f] %v288_v34 }
  0x14   : > { %6086 = vmatpush3.bf16.msra.mxu1 %v6422_v12  ;;  %5609 = vmatprep.subr.bf16.mxu0 %v6423_v13  ;;  %v322_v36 = vrot.slane %v318_v35, 2  ;;  %v306_v37 = vld [vmem:[%s6768_s23 + $0x19] sm:$0x3f]  ;;  %v345_v38 = vld [vmem:[%s6768_s23 + $0x21] sm:$0xff]  ;;  %v346_v48 = vld [vmem:[%s6768_s23 + $0x29] sm:$0x3f] }
  0x15   : > { %6087 = vmatprep.subr.bf16.mxu1 %v6639_v2  ;;  %v292_v39 = vld [vmem:[%s6768_s23 + $0x18] sm:$0x3f]  ;;  %302 = vst [vmem:[#allocation3 + $0x18] sm:$0xc0] %v296_v32  ;;  %v310_v40 = vrot.slane %v306_v37, 2  ;;  %v349_v41 = vrot.slane %v345_v38, 4 }
  0x16   : > { %v297_v42 = vrot.slane %v292_v39, 2  ;;  %v331_v43 = vld [vmem:[%s6768_s23 + $0x20] sm:$0xff]  ;;  %v319_v44 = vld [vmem:[%s6768_s23 + $0x1a] sm:$0x3f]  ;;  %328 = vst [vmem:[#allocation3 + $0x28] sm:$0xc0] %v322_v36 }
  0x17   : > { %5610 = vmatpush3.bf16.msra.mxu0 %v6424_v14  ;;  %v336_v45 = vrot.slane %v331_v43, 4  ;;  %v323_v46 = vrot.slane %v319_v44, 2  ;;  %v358_v47 = vld [vmem:[%s6768_s23 + $0x22] sm:$0xff]  ;;  %v383_v49 = vld [vmem:[%s6768_s23 + $0x31] sm:$0xff]  ;;  %v6812_v50 = vsel %vm295_vm1, %v309_v26, %v310_v40  ;;  %317 = vst [vmem:[#allocation3 + $0x50] sm:$0xf] %v310_v40 }
  0x18   : > { %6088 = vmatpush3.bf16.msra.mxu1 %v6425_v15  ;;  %5611 = vmatprep.subr.bf16.mxu0 %v6426_v16  ;;  %355 = vst [vmem:[#allocation3 + $0x50] sm:$0xf0] %v349_v41  ;;  %v6815_v51 = vsel %vm295_vm1, %v296_v32, %v297_v42  ;;  %304 = vst [vmem:[#allocation3 + $0x48] sm:$0xf] %v297_v42  ;;  %v362_v52 = vrot.slane %v358_v47, 4  ;;  %v350_v53 = vrot.slane %v346_v48, 4 }
  0x19   : > { %6089 = vmatprep.subr.bf16.mxu1 %v6639_v2  ;;  %v332_v54 = vld [vmem:[%s6768_s23 + $0x28] sm:$0x3f]  ;;  %v371_v55 = vld [vmem:[%s6768_s23 + $0x30] sm:$0xff]  ;;  %342 = vst [vmem:[#allocation3 + $0x48] sm:$0xf0] %v336_v45  ;;  %v6821_v57 = vsel %vm295_vm1, %v322_v36, %v323_v46  ;;  %v387_v58 = vrot.slane %v383_v49, 6 }
  0x1a   : > { %v394_v56 = vld [vmem:[%s6768_s23 + $0x32] sm:$0xff]  ;;  %330 = vst [vmem:[#allocation3 + $0x58] sm:$0xf] %v323_v46  ;;  %v337_v59 = vrot.slane %v332_v54, 4  ;;  %v376_v60 = vrot.slane %v371_v55, 6  ;;  %v6825_v62 = vld [vmem:[%s6768_s23 + $0x41] sm:$0xff]  ;;  %v6828_v63 = vsel %vm335_vm2, %v349_v41, %v350_v53 }
  0x1b   : > { %5612 = vmatpush3.bf16.msra.mxu0 %v6427_v17  ;;  %v359_v61 = vld [vmem:[%s6768_s23 + $0x2a] sm:$0x3f]  ;;  %368 = vst [vmem:[#allocation3 + $0x58] sm:$0xf0] %v362_v52  ;;  %357 = vst [vmem:[#allocation3 + $0x80] sm:$0x3] %v350_v53 }
  0x1c   : > { %6090 = vmatpush3.bf16.msra.mxu1 %v6428_v18  ;;  %5613 = vmatprep.subr.bf16.mxu0 %v6429_v19  ;;  %v363_v0 = vrot.slane %v359_v61, 4  ;;  %v398_v1 = vrot.slane %v394_v56, 6  ;;  %v384_v3 = vld [vmem:[%s6768_s23 + $0x39] sm:$0x3f]  ;;  %392 = vst [vmem:[#allocation3 + $0x80] sm:$0xfc] %v387_v58  ;;  %v6833_v6 = vsel %vm335_vm2, %v336_v45, %v337_v59 }
  0x1d   : > { %6091 = vmatprep.subr.bf16.mxu1 %v6639_v2  ;;  %v372_v4 = vld [vmem:[%s6768_s23 + $0x38] sm:$0x3f]  ;;  %344 = vst [vmem:[#allocation3 + $0x78] sm:$0x3] %v337_v59  ;;  %381 = vst [vmem:[#allocation3 + $0x78] sm:$0xfc] %v376_v60 }
  0x1e   : > { %v532_v5 = vld [vmem:[#allocation3 + $0x20] sm:$0xff]  ;;  %v388_v7 = vrot.slane %v384_v3, 6  ;;  %v377_v8 = vrot.slane %v372_v4, 6  ;;  %v6836_v9 = vld [vmem:[%s6768_s23 + $0x40] sm:$0xff]  ;;  %v6842_v12 = vsel %vm335_vm2, %v362_v52, %v363_v0  ;;  %370 = vst [vmem:[#allocation3 + $0x88] sm:$0x3] %v363_v0 }
  0x1f   : > { %5614 = vmatpush3.bf16.msra.mxu0 %v6430_v20  ;;  %v395_v10 = vld [vmem:[%s6768_s23 + $0x3a] sm:$0x3f]  ;;  %v571_v11 = vpack.c.bf16 %v532_v5, %v6778_v22  ;;  %403 = vst [vmem:[#allocation3 + $0x88] sm:$0xfc] %v398_v1  ;;  %v6845_v14 = vld [vmem:[%s6768_s23 + $0x42] sm:$0xff]  ;;  %v430_v16 = vld [vmem:[%s6768_s23 + $0x51] sm:$0xff] }
  0x20   : > { %6092 = vmatpush3.bf16.msra.mxu1 %v6431_v21  ;;  %5615 = vmatprep.subr.bf16.mxu0 %v6432_v25  ;;  %v399_v13 = vrot.slane %v395_v10, 6  ;;  %v410_v15 = vld [vmem:[%s6768_s23 + $0x49] sm:$0x3f]  ;;  %v531_v17 = vld [vmem:[#allocation3 + $0x18] sm:$0xff]  ;;  %v6850_v18 = vsel %vm375_vm3, %v387_v58, %v388_v7  ;;  %v6853_v19 = vsel %vm375_vm3, %v376_v60, %v377_v8  ;;  %v431_v20 = vld [vmem:[%s6768_s23 + $0x59] sm:$0x3f] }
  0x21   : > { %6093 = vmatprep.subr.bf16.mxu1 %v6639_v2  ;;  %412 = vst [vmem:[#allocation3 + $0xc8] sm:$0x3f] %v410_v15  ;;  %v434_v21 = vrot.slane %v430_v16, 2  ;;  %v406_v22 = vld [vmem:[%s6768_s23 + $0x48] sm:$0x3f]  ;;  %822 = vmatprep.mubr.bf16.mxu0 %v571_v11  ;;  %v570_v23 = vpack.c.bf16 %v531_v17, %v6790_v28  ;;  %v533_v24 = vld [vmem:[#allocation3 + $0x28] sm:$0xff] }
  0x22   : > { %v6859_v25 = vsel %vm375_vm3, %v398_v1, %v399_v13  ;;  %408 = vst [vmem:[#allocation3 + $0xc0] sm:$0x3f] %v406_v22  ;;  %v417_v26 = vld [vmem:[%s6768_s23 + $0x50] sm:$0xff]  ;;  %v572_v29 = vpack.c.bf16 %v533_v24, %v6798_v33  ;;  %v538_v30 = vld [vmem:[#allocation3 + $0x50] sm:$0xff]  ;;  %v537_v36 = vld [vmem:[#allocation3 + $0x48] sm:$0xff] }
  0x23   : > { %5616 = vmatpush3.bf16.msra.mxu0 %v6433_v27  ;;  %v418_v27 = vld [vmem:[%s6768_s23 + $0x58] sm:$0x3f]  ;;  %440 = vst [vmem:[#allocation3 + $0xc8] sm:$0xc0] %v434_v21  ;;  %v421_v32 = vrot.slane %v417_v26, 2  ;;  %v574_v28 = vpack.c.bf16 %v538_v30, %v6812_v50  ;;  %v469_v40 = vld [vmem:[%s6768_s23 + $0x61] sm:$0xff]  ;;  %v573_v52 = vpack.c.bf16 %v537_v36, %v6815_v51  ;;  %v579_v36 = vpack.c.bf16 %v6836_v9, %v6853_v19 }
  0x24   : > { %6094 = vmatpush3.bf16.msra.mxu1 %v6434_v31  ;;  %v435_v31 = vrot.slane %v431_v20, 2  ;;  %v414_v34 = vld [vmem:[%s6768_s23 + $0x4a] sm:$0x3f]  ;;  %v443_v35 = vld [vmem:[%s6768_s23 + $0x52] sm:$0xff]  ;;  %v422_v37 = vrot.slane %v418_v27, 2  ;;  %v473_v44 = vrot.slane %v469_v40, 4 }
  0x25   : > { %6123 = vmatprep.subr.bf16.mxu1 %v6639_v2  ;;  %416 = vst [vmem:[#allocation3 + $0xd0] sm:$0x3f] %v414_v34  ;;  %v444_v38 = vld [vmem:[%s6768_s23 + $0x5a] sm:$0x3f]  ;;  %v447_v39 = vrot.slane %v443_v35, 2  ;;  %v539_v33 = vld [vmem:[#allocation3 + $0x58] sm:$0xff]  ;;  %v580_v34 = vpack.c.bf16 %v6825_v62, %v6850_v18 }
  0x26   : > { %823 = vmatmul.mubr.bf16.vlgmr.msra.gmra.mrb[0].mxu0 %v570_v23  ;;  %v6870_v41 = vsel %vm295_vm1, %v434_v21, %v435_v31  ;;  %442 = vst [vmem:[#allocation3 + $0xf8] sm:$0xf] %v435_v31  ;;  %427 = vst [vmem:[#allocation3 + $0xc0] sm:$0xc0] %v421_v32  ;;  %v448_v42 = vrot.slane %v444_v38, 2  ;;  %v456_v45 = vld [vmem:[%s6768_s23 + $0x60] sm:$0xff]  ;;  %v6877_v47 = vsel %vm295_vm1, %v421_v32, %v422_v37 }
  0x27   : > { %6096 = vmatmul.mubr.bf16.vlgmr.msra.gmra.mrb[0].mxu1 %v572_v29  ;;  %v470_v43 = vld [vmem:[%s6768_s23 + $0x69] sm:$0x3f]  ;;  %830 = vmatprep.mubr.bf16.mxu0 %v574_v28  ;;  %v544_v46 = vld [vmem:[#allocation3 + $0x80] sm:$0xff]  ;;  %429 = vst [vmem:[#allocation3 + $0xf0] sm:$0xf] %v422_v37  ;;  %v460_v50 = vrot.slane %v456_v45, 4  ;;  %v575_v53 = vpack.c.bf16 %v539_v33, %v6821_v57  ;;  %v581_v38 = vpack.c.bf16 %v6845_v14, %v6859_v25 }
  0x28   : > { %6099 = vmatprep.mubr.msk.bf16.mxu1 %vm8227_vm0, %v6639_v2  ;;  %453 = vst [vmem:[#allocation3 + $0xd0] sm:$0xc0] %v447_v39  ;;  %v474_v48 = vrot.slane %v470_v43, 4  ;;  %v457_v49 = vld [vmem:[%s6768_s23 + $0x68] sm:$0x3f]  ;;  %v6883_v54 = vsel %vm295_vm1, %v447_v39, %v448_v42  ;;  %v577_v59 = vpack.c.bf16 %v544_v46, %v6828_v63  ;;  %v506_v61 = vld [vmem:[%s6768_s23 + $0x71] sm:$0xff] }
  0x29   : > { %455 = vst [vmem:[#allocation3 + $0x100] sm:$0xf] %v448_v42  ;;  %479 = vst [vmem:[#allocation3 + $0xf8] sm:$0xf0] %v473_v44  ;;  %v461_v55 = vrot.slane %v457_v49, 4  ;;  %v482_v56 = vld [vmem:[%s6768_s23 + $0x62] sm:$0xff] }
  0x2a   : > { %v483_v58 = vld [vmem:[%s6768_s23 + $0x6a] sm:$0x3f]  ;;  %v6889_v60 = vsel %vm335_vm2, %v473_v44, %v474_v48  ;;  %481 = vst [vmem:[#allocation3 + $0x128] sm:$0x3] %v474_v48  ;;  %466 = vst [vmem:[#allocation3 + $0xf0] sm:$0xf0] %v460_v50 }
  0x2b   : > { %v486_v51 = vrot.slane %v482_v56, 4  ;;  %v487_v57 = vrot.slane %v483_v58, 4  ;;  %v507_v0 = vld [vmem:[%s6768_s23 + $0x79] sm:$0x3f]  ;;  %v495_v1 = vld [vmem:[%s6768_s23 + $0x70] sm:$0xff]  ;;  %v6895_v3 = vsel %vm335_vm2, %v460_v50, %v461_v55  ;;  %v510_v4 = vrot.slane %v506_v61, 6 }
  0x2c   : > { %468 = vst [vmem:[#allocation3 + $0x120] sm:$0x3] %v461_v55  ;;  %v511_v5 = vrot.slane %v507_v0, 6  ;;  %v496_v7 = vld [vmem:[%s6768_s23 + $0x78] sm:$0x3f]  ;;  %v499_v8 = vrot.slane %v495_v1, 6 }
  0x2d   : > { %v517_v63 = vld [vmem:[%s6768_s23 + $0x72] sm:$0xff]  ;;  %v6900_v10 = vsel %vm335_vm2, %v486_v51, %v487_v57  ;;  %492 = vst [vmem:[#allocation3 + $0x100] sm:$0xf0] %v486_v51  ;;  %494 = vst [vmem:[#allocation3 + $0x130] sm:$0x3] %v487_v57  ;;  %v500_v11 = vrot.slane %v496_v7, 6 }
  0x2e   : > { %v518_v13 = vld [vmem:[%s6768_s23 + $0x7a] sm:$0x3f]  ;;  %v521_v15 = vrot.slane %v517_v63, 6  ;;  %v6435_v16 = vld [vmem:[%s8210_s3 + $0x40] sm:$0xff]   ;;  %v6907_v17 = vsel %vm375_vm3, %v510_v4, %v511_v5  ;;  %515 = vst [vmem:[#allocation3 + $0x128] sm:$0xfc] %v510_v4  ;;  %831 = vmatmul.mubr.bf16.gmra.mrb[4].mxu0 %v573_v52  ;;  %v1025_v4 = vlaneseq }
  0x2f   : > { %504 = vst [vmem:[#allocation3 + $0x120] sm:$0xfc] %v499_v8  ;;  %v522_v20 = vrot.slane %v518_v13, 6  ;;  %v6436_v21 = vld [vmem:[%s8210_s3] sm:$0xff]   ;;  %v6913_v22 = vsel %vm375_vm3, %v499_v8, %v500_v11  ;;  %5674 = vmatprep.subr.bf16.mxu0 %v6435_v16  ;;  %6100 = vmatmul.mubr.bf16.gmra.mrb[4].mxu1 %v575_v53  ;;  %v543_v23 = vld [vmem:[#allocation3 + $0x78] sm:$0xff]  ;;  %v6438_v29 = vld [vmem:[%s8210_s3 + $0x48] sm:$0xff]  }
  0x30   : > { %526 = vst [vmem:[#allocation3 + $0x130] sm:$0xfc] %v521_v15  ;;  %838 = vmatprep.mubr.bf16.mxu0 %v577_v59  ;;  %6103 = vmatprep.mubr.msk.bf16.mxu1 %vm8227_vm0, %v6639_v2  ;;  %v545_v26 = vld [vmem:[#allocation3 + $0x88] sm:$0xff]  ;;  %v576_v30 = vpack.c.bf16 %v543_v23, %v6833_v6  ;;  %v6439_v31 = vld [vmem:[%s8210_s3 + $0x8] sm:$0xff]   ;;  %v6441_v28 = vld [vmem:[%s8210_s3 + $0x50] sm:$0xff]  }
  0x31   : > { %v6916_v24 = vsel %vm375_vm3, %v521_v15, %v522_v20  ;;  %5675 = vmatpush3.bf16.msra.mxu0 %v6436_v21  ;;  %v6437_v27 = vld [vmem:[%s8210_s3 + $0x80] sm:$0xff]   ;;  %v578_v32 = vpack.c.bf16 %v545_v26, %v6842_v12  ;;  %v6440_v35 = vld [vmem:[%s8210_s3 + $0x88] sm:$0xff]   ;;  %v6442_v62 = vld [vmem:[%s8210_s3 + $0x10] sm:$0xff]  }
  0x32   : > { %6124 = vmatpush3.bf16.msra.mxu1 %v6437_v27  ;;  %5676 = vmatprep.subr.bf16.mxu0 %v6438_v29  ;;  %v553_v6 = vld [vmem:[#allocation3 + $0xc8] sm:$0xff]  ;;  %v6443_v12 = vld [vmem:[%s8210_s3 + $0x90] sm:$0xff]   ;;  %v6444_v18 = vld [vmem:[%s8210_s3 + $0x58] sm:$0xff]  }
  0x33   : > { %6125 = vmatprep.subr.bf16.mxu1 %v6639_v2  ;;  %v6445_v37 = vld [vmem:[%s8210_s3 + $0x18] sm:$0xff]   ;;  %v583_v39 = vpack.c.bf16 %v6870_v41, %v553_v6  ;;  %v6447_v9 = vld [vmem:[%s8210_s3 + $0x60] sm:$0xff]   ;;  %v554_v14 = vld [vmem:[#allocation3 + $0xd0] sm:$0xff] }
  0x34   : > { %v6446_v40 = vld [vmem:[%s8210_s3 + $0x98] sm:$0xff]   ;;  %v6448_v33 = vld [vmem:[%s8210_s3 + $0x20] sm:$0xff]   ;;  %v559_v25 = vld [vmem:[#allocation3 + $0xf8] sm:$0xff]  ;;  %v584_v42 = vpack.c.bf16 %v6883_v54, %v554_v14 }
  0x35   : > { %5677 = vmatpush3.bf16.msra.mxu0 %v6439_v31  ;;  %v552_v19 = vld [vmem:[#allocation3 + $0xc0] sm:$0xff]  ;;  %v586_v43 = vpack.c.bf16 %v6889_v60, %v559_v25  ;;  %v558_v44 = vld [vmem:[#allocation3 + $0xf0] sm:$0xff]  ;;  %v565_v46 = vld [vmem:[#allocation3 + $0x128] sm:$0xff] }
  0x36   : > { %839 = vmatmul.mubr.bf16.gmra.mrb[8].mxu0 %v576_v30  ;;  %6126 = vmatpush3.bf16.msra.mxu1 %v6440_v35  ;;  %v582_v41 = vpack.c.bf16 %v6877_v47, %v552_v19  ;;  %v560_v45 = vld [vmem:[#allocation3 + $0x100] sm:$0xff]  ;;  %v585_v48 = vpack.c.bf16 %v6895_v3, %v558_v44  ;;  %v589_v50 = vpack.c.bf16 %v6907_v17, %v565_v46  ;;  %v6449_v55 = vld [vmem:[%s8210_s3 + $0xa0] sm:$0xff]   ;;  %v6450_v56 = vld [vmem:[%s8210_s3 + $0x68] sm:$0xff]   ;;  %v7029_v17 = vshrl.u32 %v1025_v4, 7 }
  0x37   : > { %6104 = vmatmul.mubr.bf16.gmra.mrb[8].mxu1 %v578_v32  ;;  %846 = vmatprep.mubr.bf16.mxu0 %v580_v34  ;;  %v587_v49 = vpack.c.bf16 %v6900_v10, %v560_v45  ;;  %v564_v47 = vld [vmem:[#allocation3 + $0x120] sm:$0xff]  ;;  %v566_v52 = vld [vmem:[#allocation3 + $0x130] sm:$0xff]  ;;  %v6453_v59 = vld [vmem:[%s8210_s3 + $0x70] sm:$0xff]  }
  0x38   : > { %6107 = vmatprep.mubr.msk.bf16.mxu1 %vm8227_vm0, %v6639_v2  ;;  %5678 = vmatprep.subr.bf16.mxu0 %v6441_v28  ;;  %v588_v53 = vpack.c.bf16 %v6913_v22, %v564_v47  ;;  %v590_v54 = vpack.c.bf16 %v6916_v24, %v566_v52  ;;  %v6451_v58 = vld [vmem:[%s8210_s3 + $0x28] sm:$0xff]   ;;  %v6454_v60 = vld [vmem:[%s8210_s3 + $0x30] sm:$0xff]   ;;  %v6456_v57 = vld [vmem:[%s8210_s3 + $0x78] sm:$0xff]   ;;  %v7034_v26 = vadd.s32 8, %v7029_v17  ;;  %vm8222_vm5 = vcmp.eq.s32.totalorder %v7029_v17, 0 }
  0x39   : > { %5679 = vmatpush3.bf16.msra.mxu0 %v6442_v62  ;;  %6127 = vmatprep.subr.bf16.mxu1 %v6639_v2  ;;  %v6452_v51 = vld [vmem:[%s8210_s3 + $0xa8] sm:$0xff]   ;;  %v6457_v61 = vld [vmem:[%s8210_s3 + $0x38] sm:$0xff]   ;;  %v6455_v0 = vld [vmem:[%s8210_s3 + $0xb0] sm:$0xff]   ;;  %v7057_v52 = vadd.s32 24, %v7029_v17 }
  0x3a   : > { %6128 = vmatpush3.bf16.msra.mxu1 %v6443_v12  ;;  %5680 = vmatprep.subr.bf16.mxu0 %v6444_v18  ;;  %v6458_v1 = vld [vmem:[%s8210_s3 + $0xb8] sm:$0xff]   ;;  %v6459_v3 = vld [vmem:[%s8210_s3 + $0x40] sm:$0xff]   ;;  %vm8215_vm4 = vcmp.eq.s32.totalorder %v7034_v26, 14  ;;  %vm7048_vm7 = vmneg %vm8222_vm5  ;;  %vm8220_vm9 = vcmp.ne.s32.totalorder %v7034_v26, 13 }
  0x3b   : > { %6129 = vmatprep.subr.bf16.mxu1 %v6639_v2  ;;  %v7027_v8 = vld [vmem:[%s8209_s2] ss:$0 sm:$0xff]  ;;  %vm7042_vm6 = vmneg %vm8215_vm4  ;;  %vm8219_vm10 = vcmp.ne.s32.totalorder %v7057_v52, 28  ;;  %vm8217_vm14 = vcmp.ne.s32.totalorder %v7057_v52, 27 }
  0x3c   : > { %vm8223_vm8 = vmpackc.low %vm7042_vm6, %vm7048_vm7 }
  0x3d   : > { %5681 = vmatpush3.bf16.msra.mxu0 %v6445_v37  ;;  %vm7080_vm12 = vmpackc.low %vm8220_vm9, %vm6641_vm11 }
  0x3e   : > { %847 = vmatmul.mubr.bf16.gmra.mrb[12].mxu0 %v579_v36  ;;  %6130 = vmatpush3.bf16.msra.mxu1 %v6446_v40  ;;  %vm7090_vm13 = vmpackc.low %vm8219_vm10, %vm6641_vm11 }
  0x3f   : > { %6108 = vmatmul.mubr.bf16.gmra.mrb[12].mxu1 %v581_v38  ;;  %854 = vmatprep.mubr.bf16.mxu0 %v583_v39  ;;  %vm7123_vm1 = vmpackc.low %vm8217_vm14, %vm6641_vm11 }
  0x40   : > { %6111 = vmatprep.mubr.msk.bf16.mxu1 %vm8227_vm0, %v6639_v2  ;;  %5682 = vmatprep.subr.bf16.mxu0 %v6447_v9 }
  0x41   : > { %5683 = vmatpush3.bf16.msra.mxu0 %v6448_v33  ;;  %6131 = vmatprep.subr.bf16.mxu1 %v6639_v2 }
  0x42   : > { %6132 = vmatpush3.bf16.msra.mxu1 %v6449_v55  ;;  %5684 = vmatprep.subr.bf16.mxu0 %v6450_v56 }
  0x43   : > { %6133 = vmatprep.subr.bf16.mxu1 %v6639_v2 }
  0x45   : > { %5685 = vmatpush3.bf16.msra.mxu0 %v6451_v58 }
  0x46   : > { %855 = vmatmul.mubr.bf16.gmra.mrb[16].mxu0 %v582_v41  ;;  %5686 = vmatprep.subr.bf16.mxu0 %v6453_v59 }
  0x47   : > { %6112 = vmatmul.mubr.bf16.gmra.mrb[16].mxu1 %v584_v42  ;;  %862 = vmatprep.mubr.bf16.mxu0 %v586_v43 }
  0x48   : > { %6115 = vmatprep.mubr.msk.bf16.mxu1 %vm8227_vm0, %v6639_v2  ;;  %6134 = vmatpush3.bf16.msra.mxu1 %v6452_v51 }
  0x49   : > { %5687 = vmatpush3.bf16.msra.mxu0 %v6454_v60  ;;  %6135 = vmatprep.subr.bf16.mxu1 %v6639_v2  ;;  %v6462_v60 = vld [vmem:[%s8210_s3 + $0x48] sm:$0xff]  }
  0x4a   : > { %5688 = vmatprep.subr.bf16.mxu0 %v6456_v57 }
  0x4c   : > { %6136 = vmatpush3.bf16.msra.mxu1 %v6455_v0 }
  0x4d   : > { %5689 = vmatpush3.bf16.msra.mxu0 %v6457_v61  ;;  %6137 = vmatprep.subr.bf16.mxu1 %v6639_v2  ;;  %v6463_v61 = vld [vmem:[%s8210_s3 + $0x8] sm:$0xff]  }
  0x4e   : > { %863 = vmatmul.mubr.bf16.gmra.mrb[20].mxu0 %v585_v48  ;;  %5747 = vmatprep.subr.bf16.mxu0 %v6459_v3 }
  0x4f   : > { %6116 = vmatmul.mubr.bf16.gmra.mrb[20].mxu1 %v587_v49  ;;  %870 = vmatprep.mubr.bf16.mxu0 %v589_v50 }
  0x50   : > { %6119 = vmatprep.mubr.msk.bf16.mxu1 %vm8227_vm0, %v6639_v2  ;;  %6138 = vmatpush3.bf16.msra.mxu1 %v6458_v1 }
  0x51   : > { %6167 = vmatprep.subr.bf16.mxu1 %v6639_v2 }
  0x56   : > { %871 = vmatmul.mubr.bf16.gmra.mrb[24].mxu0 %v588_v53  ;;  %v6460_v53 = vld [vmem:[%s8210_s3] sm:$0xff]  }
  0x57   : > { %6120 = vmatmul.mubr.bf16.gmra.mrb[24].mxu1 %v590_v54 }
  0x58   : > { %6139 = vmatprep.mubr.msk.bf16.mxu1 %vm8227_vm0, %v6639_v2 }
  0xf9   : > { %v5617_v5 = vpop.f32.mrb[0].mxu0 }
  0xfa   : > { %v5618_v7 = vpop.f32.mrb[1].mxu0  ;;  %v913_v63 = vpop.f32.mrb[0].mxu1 }
  0xfb   : > { %v5619_v10 = vadd.f32 %v5618_v7, %v5617_v5  ;;  %v5620_v11 = vpop.f32.mrb[2].mxu0  ;;  %v6097_v13 = vpop.f32.mrb[1].mxu1 }
  0xfc   : > { %v5621_v15 = vpop.f32.mrb[3].mxu0  ;;  %v916_v16 = vpop.f32.mrb[2].mxu1 }
  0xfd   : > { %v825_v20 = vadd.f32 %v5619_v10, %v7027_v8  ;;  %v5622_v21 = vadd.f32 %v5621_v15, %v5620_v11  ;;  %v6098_v22 = vpop.f32.mrb[3].mxu1  ;;  %v6461_v11 = vld [vmem:[%s8210_s3 + $0x80] sm:$0xff]  }
  0xff   : > { %v914_v23 = vadd.f32 %v913_v63, %v825_v20  ;;  %v828_v24 = vadd.f32 %v5622_v21, %v7027_v8 }
 0x101   : > { %v968_v27 = vmax.f32 %v914_v23, 0.0  ;;  %v917_v29 = vadd.f32 %v916_v16, %v828_v24  ;;  %v5623_v30 = vpop.f32.mrb[4].mxu0 }
 0x102   : > { %v5624_v31 = vpop.f32.mrb[5].mxu0  ;;  %v921_v32 = vpop.f32.mrb[4].mxu1 }
 0x103   : > { %982 = vst [vmem:[#allocation2 + $0x1] sm:$0xff] %v968_v27  ;;  %v969_v34 = vmax.f32 %v917_v29, 0.0  ;;  %v5625_v35 = vadd.f32 %v5624_v31, %v5623_v30  ;;  %v5626_v6 = vpop.f32.mrb[6].mxu0  ;;  %v6101_v28 = vpop.f32.mrb[5].mxu1  ;;  %v7095_v30 = vadd.s32 40, %v7029_v17  ;;  %v6465_v31 = vld [vmem:[%s8210_s3 + $0x50] sm:$0xff]  }
 0x104   : > { %v5627_v62 = vpop.f32.mrb[7].mxu0  ;;  %v924_v12 = vpop.f32.mrb[6].mxu1 }
 0x105   : > { %983 = vst [vmem:[#allocation2 + $0x9] sm:$0xff] %v969_v34  ;;  %v1545_v18 = vpack.c.bf16 %v969_v34, %v968_v27  ;;  %v833_v36 = vadd.f32 %v5625_v35, %v7027_v8  ;;  %v5628_v37 = vadd.f32 %v5627_v62, %v5626_v6  ;;  %v6102_v38 = vpop.f32.mrb[7].mxu1  ;;  %v6466_v62 = vld [vmem:[%s8210_s3 + $0x10] sm:$0xff]   ;;  %vm8216_vm15 = vcmp.ne.s32.totalorder %v7095_v30, 42 }
 0x106   : > { %vm7133_vm2 = vmpackc.low %vm8216_vm15, %vm6641_vm11  ;;  %vm8218_vm3 = vcmp.ne.s32.totalorder %v7095_v30, 41 }
 0x107   : > { %v922_v39 = vadd.f32 %v921_v32, %v833_v36  ;;  %v836_v40 = vadd.f32 %v5628_v37, %v7027_v8  ;;  %1796 = vmatprep.mubr.bf16.mxu0 %v1545_v18  ;;  %v6468_v18 = vld [vmem:[%s8210_s3 + $0x58] sm:$0xff]   ;;  %vm7167_vm15 = vmpackc.low %vm8218_vm3, %vm6641_vm11 }
 0x109   : > { %v970_v33 = vmax.f32 %v922_v39, 0.0  ;;  %v925_v14 = vadd.f32 %v924_v12, %v836_v40  ;;  %v5629_v25 = vpop.f32.mrb[8].mxu0  ;;  %v6464_v12 = vld [vmem:[%s8210_s3 + $0x88] sm:$0xff]  }
 0x10a   : > { %v5630_v41 = vpop.f32.mrb[9].mxu0  ;;  %v929_v42 = vpop.f32.mrb[8].mxu1  ;;  %v997_v47 = vld [vmem:[#allocation2] sm:$0xff] }
 0x10b   : > { %984 = vst [vmem:[#allocation2 + $0x11] sm:$0xff] %v970_v33  ;;  %v971_v43 = vmax.f32 %v925_v14, 0.0  ;;  %v5631_v44 = vadd.f32 %v5630_v41, %v5629_v25  ;;  %v5632_v45 = vpop.f32.mrb[10].mxu0  ;;  %v6105_v46 = vpop.f32.mrb[9].mxu1 }
 0x10c   : > { %v998_v48 = vld [vmem:[#allocation2 + $0x8] sm:$0xff]  ;;  %v5633_v49 = vpop.f32.mrb[11].mxu0  ;;  %v932_v50 = vpop.f32.mrb[10].mxu1 }
 0x10d   : > { %985 = vst [vmem:[#allocation2 + $0x19] sm:$0xff] %v971_v43  ;;  %v1548_v54 = vpack.c.bf16 %v971_v43, %v970_v33  ;;  %v841_v55 = vadd.f32 %v5631_v44, %v7027_v8  ;;  %v5634_v56 = vadd.f32 %v5633_v49, %v5632_v45  ;;  %v6106_v58 = vpop.f32.mrb[11].mxu1  ;;  %v5152_v59 = vpack.c.bf16 %v998_v48, %v997_v47  ;;  %v1011_v5 = vld [vmem:[#allocation2 + $0x2] sm:$0xff]  ;;  %v6467_v43 = vld [vmem:[%s8210_s3 + $0x90] sm:$0xff]  }
 0x10e   : > { %v6469_v58 = vld [vmem:[%s8210_s3 + $0x18] sm:$0xff]  }
 0x10f   : > { %v930_v51 = vadd.f32 %v929_v42, %v841_v55  ;;  %v844_v57 = vadd.f32 %v5634_v56, %v7027_v8  ;;  %5153 = vmatmul.mubr.msk.bf16.vlgmr.msra.gmra.mrb[28].mxu0 %vm8223_vm8, %v5152_v59  ;;  %v1033_v56 = vadd.s32 56, %v7029_v17 }
 0x110   : > { %1804 = vmatprep.mubr.bf16.mxu0 %v1548_v54  ;;  %5748 = vmatpush3.bf16.msra.mxu0 %v6460_v53 }
 0x111   : > { %v972_v0 = vmax.f32 %v930_v51, 0.0  ;;  %v933_v1 = vadd.f32 %v932_v50, %v844_v57  ;;  %v5635_v3 = vpop.f32.mrb[12].mxu0  ;;  %5749 = vmatprep.subr.bf16.mxu0 %v6462_v60  ;;  %vm5586_vm4 = vcmp.ne.s32.totalorder %v1033_v56, 56 }
 0x112   : > { %v1012_v7 = vld [vmem:[#allocation2 + $0xa] sm:$0xff]  ;;  %v5636_v63 = vpop.f32.mrb[13].mxu0  ;;  %v937_v10 = vpop.f32.mrb[12].mxu1  ;;  %vm7174_vm14 = vmpackc.low %vm5586_vm4, %vm6641_vm11 }
 0x113   : > { %986 = vst [vmem:[#allocation2 + $0x21] sm:$0xff] %v972_v0  ;;  %v973_v13 = vmax.f32 %v933_v1, 0.0  ;;  %v5637_v15 = vadd.f32 %v5636_v63, %v5635_v3  ;;  %v5638_v16 = vpop.f32.mrb[14].mxu0  ;;  %v6109_v20 = vpop.f32.mrb[13].mxu1  ;;  %v5180_v21 = vpack.c.bf16 %v1012_v7, %v1011_v5  ;;  %v999_v23 = vld [vmem:[#allocation2 + $0x10] sm:$0xff]  ;;  %v6470_v1 = vld [vmem:[%s8210_s3 + $0x98] sm:$0xff]  }
 0x114   : > { %v1000_v24 = vld [vmem:[#allocation2 + $0x18] sm:$0xff]  ;;  %v5639_v27 = vpop.f32.mrb[15].mxu0  ;;  %v940_v29 = vpop.f32.mrb[14].mxu1  ;;  %5750 = vmatpush3.bf16.msra.mxu0 %v6463_v61  ;;  %v7159_v7 = vadd.s32 48, %v7029_v17  ;;  %v6472_v63 = vld [vmem:[%s8210_s3 + $0x20] sm:$0xff]  }
 0x115   : > { %987 = vst [vmem:[#allocation2 + $0x29] sm:$0xff] %v973_v13  ;;  %v1551_v32 = vpack.c.bf16 %v973_v13, %v972_v0  ;;  %v849_v34 = vadd.f32 %v5637_v15, %v7027_v8  ;;  %v5640_v35 = vadd.f32 %v5639_v27, %v5638_v16  ;;  %6140 = vmatmul.mubr.msk.bf16.vlgmr.msra.gmra.mrb[28].mxu1 %vm7080_vm12, %v5180_v21  ;;  %v6110_v6 = vpop.f32.mrb[15].mxu1  ;;  %v1013_v14 = vld [vmem:[#allocation2 + $0x12] sm:$0xff]  ;;  %v6471_v0 = vld [vmem:[%s8210_s3 + $0x60] sm:$0xff]  }
 0x116   : > { %v5156_v28 = vpack.c.bf16 %v1000_v24, %v999_v23  ;;  %6143 = vmatprep.mubr.msk.bf16.mxu1 %vm8227_vm0, %v6639_v2  ;;  %6168 = vmatpush3.bf16.msra.mxu1 %v6461_v11  ;;  %vm8221_vm3 = vcmp.eq.s32.totalorder %v7159_v7, 55 }
 0x117   : > { %v938_v36 = vadd.f32 %v937_v10, %v849_v34  ;;  %v852_v37 = vadd.f32 %v5640_v35, %v7027_v8  ;;  %6169 = vmatprep.subr.bf16.mxu1 %v6639_v2  ;;  %5751 = vmatprep.subr.bf16.mxu0 %v6465_v31  ;;  %vm5190_vm4 = vmneg %vm8221_vm3 }
 0x118   : > { %5157 = vmatmul.mubr.msk.bf16.gmra.mrb[32].mxu0 %vm7090_vm13, %v5156_v28  ;;  %vm7191_vm9 = vmpackc.low %vm6641_vm11, %vm5190_vm4 }
 0x119   : > { %1812 = vmatprep.mubr.bf16.mxu0 %v1551_v32  ;;  %v974_v38 = vmax.f32 %v938_v36, 0.0  ;;  %v941_v39 = vadd.f32 %v940_v29, %v852_v37  ;;  %v5641_v40 = vpop.f32.mrb[16].mxu0  ;;  %5752 = vmatpush3.bf16.msra.mxu0 %v6466_v62 }
 0x11a   : > { %v5642_v25 = vpop.f32.mrb[17].mxu0  ;;  %v945_v41 = vpop.f32.mrb[16].mxu1  ;;  %v1014_v42 = vld [vmem:[#allocation2 + $0x1a] sm:$0xff]  ;;  %6170 = vmatpush3.bf16.msra.mxu1 %v6464_v12  ;;  %5753 = vmatprep.subr.bf16.mxu0 %v6468_v18  ;;  %v1034_v12 = vadd.s32 64, %v7029_v17 }
 0x11b   : > { %988 = vst [vmem:[#allocation2 + $0x31] sm:$0xff] %v974_v38  ;;  %v975_v44 = vmax.f32 %v941_v39, 0.0  ;;  %v5643_v45 = vadd.f32 %v5642_v25, %v5641_v40  ;;  %v5644_v46 = vpop.f32.mrb[18].mxu0  ;;  %v6113_v48 = vpop.f32.mrb[17].mxu1  ;;  %v5184_v49 = vpack.c.bf16 %v1014_v42, %v1013_v14  ;;  %6171 = vmatprep.subr.bf16.mxu1 %v6639_v2  ;;  %v1001_v54 = vld [vmem:[#allocation2 + $0x20] sm:$0xff] }
 0x11c   : > { %v5645_v47 = vpop.f32.mrb[19].mxu0  ;;  %v948_v53 = vpop.f32.mrb[18].mxu1  ;;  %v1002_v55 = vld [vmem:[#allocation2 + $0x28] sm:$0xff]  ;;  %vm5587_vm10 = vcmp.ne.s32.totalorder %v1034_v12, 70 }
 0x11d   : > { %989 = vst [vmem:[#allocation2 + $0x39] sm:$0xff] %v975_v44  ;;  %v1554_v59 = vpack.c.bf16 %v975_v44, %v974_v38  ;;  %v857_v60 = vadd.f32 %v5643_v45, %v7027_v8  ;;  %v5646_v51 = vadd.f32 %v5645_v47, %v5644_v46  ;;  %6144 = vmatmul.mubr.msk.bf16.gmra.mrb[32].mxu1 %vm7123_vm1, %v5184_v49  ;;  %v6114_v57 = vpop.f32.mrb[19].mxu1  ;;  %v1015_v20 = vld [vmem:[#allocation2 + $0x22] sm:$0xff]  ;;  %vm7197_vm3 = vmpackc.low %vm6641_vm11, %vm5587_vm10  ;;  %vm5593_vm10 = vcmp.ne.s32.totalorder %v1034_v12, 69 }
 0x11e   : > { %v5160_v61 = vpack.c.bf16 %v1002_v55, %v1001_v54  ;;  %6147 = vmatprep.mubr.msk.bf16.mxu1 %vm8227_vm0, %v6639_v2  ;;  %6172 = vmatpush3.bf16.msra.mxu1 %v6467_v43  ;;  %v1036_v57 = vadd.s32 80, %v7029_v17  ;;  %vm7211_vm5 = vmpackc.low %vm6641_vm11, %vm5593_vm10 }
 0x11f   : > { %v946_v3 = vadd.f32 %v945_v41, %v857_v60  ;;  %v860_v5 = vadd.f32 %v5646_v51, %v7027_v8  ;;  %6173 = vmatprep.subr.bf16.mxu1 %v6639_v2  ;;  %5754 = vmatpush3.bf16.msra.mxu0 %v6469_v58  ;;  %v8249_v51 = vmov 0 }
 0x120   : > { %5161 = vmatmul.mubr.msk.bf16.gmra.mrb[36].mxu0 %vm7133_vm2, %v5160_v61  ;;  %5755 = vmatprep.subr.bf16.mxu0 %v6471_v0  ;;  %v8250_v51 = vsel %vm7197_vm3, 4294967295, %v8249_v51  ;;  %vm5588_vm4 = vcmp.ne.s32.totalorder %v1036_v57, 84  ;;  %vm5594_vm10 = vcmp.ne.s32.totalorder %v1036_v57, 83 }
 0x121   : > { %1820 = vmatprep.mubr.bf16.mxu0 %v1554_v59  ;;  %v976_v10 = vmax.f32 %v946_v3, 0.0  ;;  %v949_v11 = vadd.f32 %v948_v53, %v860_v5  ;;  %v5647_v13 = vpop.f32.mrb[20].mxu0  ;;  %vm7216_vm8 = vmpackc.low %vm6641_vm11, %vm5588_vm4 }
 0x122   : > { %v5648_v15 = vpop.f32.mrb[21].mxu0  ;;  %v953_v16 = vpop.f32.mrb[20].mxu1  ;;  %v1016_v21 = vld [vmem:[#allocation2 + $0x2a] sm:$0xff]  ;;  %6174 = vmatpush3.bf16.msra.mxu1 %v6470_v1 }
 0x123   : > { %990 = vst [vmem:[#allocation2 + $0x41] sm:$0xff] %v976_v10  ;;  %v977_v24 = vmax.f32 %v949_v11, 0.0  ;;  %v5649_v27 = vadd.f32 %v5648_v15, %v5647_v13  ;;  %v5650_v29 = vpop.f32.mrb[22].mxu0  ;;  %v6117_v31 = vpop.f32.mrb[21].mxu1  ;;  %v5188_v32 = vpack.c.bf16 %v1016_v21, %v1015_v20  ;;  %6175 = vmatprep.subr.bf16.mxu1 %v6639_v2  ;;  %v1003_v6 = vld [vmem:[#allocation2 + $0x30] sm:$0xff]  ;;  %5756 = vmatpush3.bf16.msra.mxu0 %v6472_v63  ;;  %v8251_v20 = vmov 0 }
 0x124   : > { %v5651_v34 = vpop.f32.mrb[23].mxu0  ;;  %v956_v35 = vpop.f32.mrb[22].mxu1  ;;  %v1004_v28 = vld [vmem:[#allocation2 + $0x38] sm:$0xff]  ;;  %v8252_v20 = vsel %vm7211_vm5, 4294967295, %v8251_v20  ;;  %v1038_v31 = vadd.s32 96, %v7029_v17 }
 0x125   : > { %991 = vst [vmem:[#allocation2 + $0x49] sm:$0xff] %v977_v24  ;;  %v1557_v18 = vpack.c.bf16 %v977_v24, %v976_v10  ;;  %v865_v36 = vadd.f32 %v5649_v27, %v7027_v8  ;;  %v5652_v37 = vadd.f32 %v5651_v34, %v5650_v29  ;;  %6148 = vmatmul.mubr.msk.bf16.gmra.mrb[36].mxu1 %vm7167_vm15, %v5188_v32  ;;  %v6118_v38 = vpop.f32.mrb[23].mxu1  ;;  %v1017_v45 = vld [vmem:[#allocation2 + $0x32] sm:$0xff] }
 0x126   : > { %v5164_v39 = vpack.c.bf16 %v1004_v28, %v1003_v6  ;;  %6151 = vmatprep.mubr.msk.bf16.mxu1 %vm8227_vm0, %v6639_v2  ;;  %vm5589_vm4 = vcmp.ne.s32.totalorder %v1038_v31, 98  ;;  %v6484_v28 = vld [vmem:[%s8210_s3] sm:$0xff]  }
 0x127   : > { %v954_v40 = vadd.f32 %v953_v16, %v865_v36  ;;  %v868_v14 = vadd.f32 %v5652_v37, %v7027_v8  ;;  %v1039_v36 = vadd.s32 104, %v7029_v17 }
 0x128   : > { %5165 = vmatmul.mubr.msk.bf16.gmra.mrb[40].mxu0 %vm7174_vm14, %v5164_v39 }
 0x129   : > { %1828 = vmatprep.mubr.bf16.mxu0 %v1557_v18  ;;  %v978_v25 = vmax.f32 %v954_v40, 0.0  ;;  %v957_v41 = vadd.f32 %v956_v35, %v868_v14  ;;  %v5653_v42 = vpop.f32.mrb[24].mxu0  ;;  %v6486_v18 = vld [vmem:[%s8210_s3 + $0x48] sm:$0xff]  }
 0x12a   : > { %v5654_v43 = vpop.f32.mrb[25].mxu0  ;;  %v961_v44 = vpop.f32.mrb[24].mxu1  ;;  %v1018_v46 = vld [vmem:[#allocation2 + $0x3a] sm:$0xff] }
 0x12b   : > { %992 = vst [vmem:[#allocation2 + $0x51] sm:$0xff] %v978_v25  ;;  %v979_v49 = vmax.f32 %v957_v41, 0.0  ;;  %v5655_v47 = vadd.f32 %v5654_v43, %v5653_v42  ;;  %v5656_v53 = vpop.f32.mrb[26].mxu0  ;;  %v6121_v54 = vpop.f32.mrb[25].mxu1  ;;  %v5192_v55 = vpack.c.bf16 %v1018_v46, %v1017_v45  ;;  %v1005_v59 = vld [vmem:[#allocation2 + $0x40] sm:$0xff]  ;;  %v6474_v43 = vld [vmem:[%s8210_s3 + $0x68] sm:$0xff]  }
 0x12c   : > { %v5657_v56 = vpop.f32.mrb[27].mxu0  ;;  %v964_v58 = vpop.f32.mrb[26].mxu1  ;;  %v1006_v60 = vld [vmem:[#allocation2 + $0x48] sm:$0xff]  ;;  %v6473_v42 = vld [vmem:[%s8210_s3 + $0xa0] sm:$0xff]   ;;  %5757 = vmatprep.subr.bf16.mxu0 %v6474_v43  ;;  %v6477_v45 = vld [vmem:[%s8210_s3 + $0x70] sm:$0xff]  }
 0x12d   : > { %993 = vst [vmem:[#allocation2 + $0x59] sm:$0xff] %v979_v49  ;;  %v1560_v61 = vpack.c.bf16 %v979_v49, %v978_v25  ;;  %v873_v0 = vadd.f32 %v5655_v47, %v7027_v8  ;;  %v5658_v1 = vadd.f32 %v5657_v56, %v5656_v53  ;;  %6152 = vmatmul.mubr.msk.bf16.gmra.mrb[40].mxu1 %vm7191_vm9, %v5192_v55  ;;  %v6122_v3 = vpop.f32.mrb[27].mxu1  ;;  %v1019_v15 = vld [vmem:[#allocation2 + $0x42] sm:$0xff]  ;;  %v6478_v46 = vld [vmem:[%s8210_s3 + $0x30] sm:$0xff]   ;;  %v6480_v47 = vld [vmem:[%s8210_s3 + $0x78] sm:$0xff]  }
 0x12e   : > { %v5168_v5 = vpack.c.bf16 %v1006_v60, %v1005_v59  ;;  %6155 = vmatprep.mubr.msk.bf16.mxu1 %vm8227_vm0, %v6639_v2  ;;  %6176 = vmatpush3.bf16.msra.mxu1 %v6473_v42  ;;  %v6476_v49 = vld [vmem:[%s8210_s3 + $0xa8] sm:$0xff]   ;;  %v6481_v53 = vld [vmem:[%s8210_s3 + $0x38] sm:$0xff]   ;;  %v6479_v54 = vld [vmem:[%s8210_s3 + $0xb0] sm:$0xff]  }
 0x12f   : > { %v962_v63 = vadd.f32 %v961_v44, %v873_v0  ;;  %v876_v10 = vadd.f32 %v5658_v1, %v7027_v8  ;;  %v6475_v44 = vld [vmem:[%s8210_s3 + $0x28] sm:$0xff]   ;;  %6177 = vmatprep.subr.bf16.mxu1 %v6639_v2  ;;  %v6482_v55 = vld [vmem:[%s8210_s3 + $0xb8] sm:$0xff]   ;;  %v7289_v59 = vld [vmem:[%s8211_s4] ss:$0 sm:$0xff] }
 0x130   : > { %5169 = vmatmul.mubr.msk.bf16.gmra.mrb[44].mxu0 %vm7197_vm3, %v5168_v5  ;;  %vm7228_vm3 = vmpackc.low %vm6641_vm11, %vm5594_vm10  ;;  %vm5596_vm10 = vcmp.ne.s32.totalorder %v1038_v31, 97  ;;  %v6489_v25 = vld [vmem:[%s8210_s3 + $0x50] sm:$0xff]  }
 0x131   : > { %1836 = vmatprep.mubr.bf16.mxu0 %v1560_v61  ;;  %v980_v11 = vmax.f32 %v962_v63, 0.0  ;;  %v965_v13 = vadd.f32 %v964_v58, %v876_v10  ;;  %5758 = vmatpush3.bf16.msra.mxu0 %v6475_v44 }
 0x132   : > { %v1020_v16 = vld [vmem:[#allocation2 + $0x4a] sm:$0xff]  ;;  %5759 = vmatprep.subr.bf16.mxu0 %v6477_v45  ;;  %6178 = vmatpush3.bf16.msra.mxu1 %v6476_v49 }
 0x133   : > { %994 = vst [vmem:[#allocation2 + $0x61] sm:$0xff] %v980_v11  ;;  %v981_v21 = vmax.f32 %v965_v13, 0.0  ;;  %v5196_v24 = vpack.c.bf16 %v1020_v16, %v1019_v15  ;;  %v1007_v27 = vld [vmem:[#allocation2 + $0x50] sm:$0xff]  ;;  %6179 = vmatprep.subr.bf16.mxu1 %v6639_v2 }
 0x134   : > { %v1008_v8 = vld [vmem:[#allocation2 + $0x58] sm:$0xff] }
 0x135   : > { %995 = vst [vmem:[#allocation2 + $0x69] sm:$0xff] %v981_v21  ;;  %v1563_v32 = vpack.c.bf16 %v981_v21, %v980_v11  ;;  %6156 = vmatmul.mubr.msk.bf16.gmra.mrb[44].mxu1 %vm7211_vm5, %v5196_v24  ;;  %v5172_v34 = vpack.c.bf16 %v1008_v8, %v1007_v27  ;;  %v1021_v35 = vld [vmem:[#allocation2 + $0x52] sm:$0xff]  ;;  %vm7233_vm5 = vmpackc.low %vm6641_vm11, %vm5589_vm4  ;;  %vm5595_vm11 = vcmp.ne.s32.totalorder %v1039_v36, 111  ;;  %5760 = vmatpush3.bf16.msra.mxu0 %v6478_v46 }
 0x136   : > { %6159 = vmatprep.mubr.msk.bf16.mxu1 %vm8227_vm0, %v6639_v2  ;;  %vm7245_vm4 = vmpackc.low %vm5595_vm11, %vm5596_vm10  ;;  %5761 = vmatprep.subr.bf16.mxu0 %v6480_v47 }
 0x137   : > { %6180 = vmatpush3.bf16.msra.mxu1 %v6479_v54  ;;  %vm8261_vm11 = vmpackc.low %vm7042_vm6, %vm7048_vm7  ;;  %vm8262_vm7 = vnez %v8250_v51 }
 0x138   : > { %5173 = vmatmul.mubr.msk.bf16.gmra.mrb[48].mxu0 %vm7216_vm8, %v5172_v34  ;;  %6181 = vmatprep.subr.bf16.mxu1 %v6639_v2 }
 0x139   : > { %1844 = vmatprep.mubr.bf16.mxu0 %v1563_v32  ;;  %5762 = vmatpush3.bf16.msra.mxu0 %v6481_v53 }
 0x13a   : > { %v1022_v6 = vld [vmem:[#allocation2 + $0x5a] sm:$0xff] }
 0x13b   : > { %v5200_v12 = vpack.c.bf16 %v1022_v6, %v1021_v35  ;;  %v1009_v37 = vld [vmem:[#allocation2 + $0x60] sm:$0xff]  ;;  %6182 = vmatpush3.bf16.msra.mxu1 %v6482_v55 }
 0x13c   : > { %v1010_v38 = vld [vmem:[#allocation2 + $0x68] sm:$0xff] }
 0x13d   : > { %v1024_v39 = vld [vmem:[#allocation2 + $0x6a] sm:$0xff]  ;;  %6160 = vmatmul.mubr.msk.bf16.gmra.mrb[48].mxu1 %vm7228_vm3, %v5200_v12  ;;  %v5176_v40 = vpack.c.bf16 %v1010_v38, %v1009_v37  ;;  %v1023_v14 = vld [vmem:[#allocation2 + $0x62] sm:$0xff] }
 0x13e   : > { %1970 = vst [vmem:[#allocation2 + $0x71] sm:$0x1] %v6639_v2  ;;  %6163 = vmatprep.mubr.msk.bf16.mxu1 %vm8227_vm0, %v6639_v2  ;;  %v5205_v41 = vpack.c.bf16 %v1024_v39, %v1023_v14 }
 0x140   : > { %5177 = vmatmul.mubr.msk.bf16.gmra.mrb[52].mxu0 %vm7233_vm5, %v5176_v40 }
 0x145   : > { %6164 = vmatmul.mubr.msk.bf16.gmra.mrb[52].mxu1 %vm7245_vm4, %v5205_v41 }
 0x146   : > { %6183 = vmatprep.mubr.msk.bf16.mxu1 %vm8227_vm0, %v6639_v2 }
 0x1e2   : > { %v5690_v56 = vpop.f32.mrb[28].mxu0 }
 0x1e3   : > { %v5691_v58 = vpop.f32.mrb[29].mxu0 }
 0x1e4   : > { %v5692_v60 = vadd.f32 %v5691_v58, %v5690_v56  ;;  %v5693_v57 = vpop.f32.mrb[30].mxu0 }
 0x1e5   : > { %v5694_v61 = vpop.f32.mrb[31].mxu0 }
 0x1e6   : > { %v5695_v0 = vadd.f32 %v5694_v61, %v5693_v57  ;;  %v1799_v1 = vadd.f32 %v5692_v60, %v7289_v59 }
 0x1e8   : > { %v1887_v3 = vpop.f32.mrb[28].mxu1  ;;  %v1802_v5 = vadd.f32 %v5695_v0, %v7289_v59 }
 0x1e9   : > { %v1888_v63 = vadd.f32 %v1887_v3, %v1799_v1  ;;  %v6141_v10 = vpop.f32.mrb[29].mxu1 }
 0x1ea   : > { %v1890_v13 = vpop.f32.mrb[30].mxu1 }
 0x1eb   : > { %v5696_v11 = vpop.f32.mrb[32].mxu0  ;;  %v1942_v15 = vmax.f32 %v1888_v63, 0.0  ;;  %v1891_v16 = vadd.f32 %v1890_v13, %v1802_v5  ;;  %v6142_v24 = vpop.f32.mrb[31].mxu1 }
 0x1ec   : > { %v5697_v21 = vpop.f32.mrb[33].mxu0 }
 0x1ed   : > { %v5698_v27 = vadd.f32 %v5697_v21, %v5696_v11  ;;  %v5699_v8 = vpop.f32.mrb[34].mxu0  ;;  %1956 = vst [vmem:[#allocation2 + $0x1] sm:$0xff] %v1942_v15  ;;  %v1943_v31 = vmax.f32 %v1891_v16, 0.0 }
 0x1ee   : > { %v5700_v32 = vpop.f32.mrb[35].mxu0 }
 0x1ef   : > { %v5701_v34 = vadd.f32 %v5700_v32, %v5699_v8  ;;  %v1807_v35 = vadd.f32 %v5698_v27, %v7289_v59  ;;  %1957 = vst [vmem:[#allocation2 + $0x9] sm:$0xff] %v1943_v31  ;;  %v2028_v6 = vpack.c.bf16 %v1943_v31, %v1942_v15 }
 0x1f0   : > { %v1895_v12 = vpop.f32.mrb[32].mxu1 }
 0x1f1   : > { %v1810_v36 = vadd.f32 %v5701_v34, %v7289_v59  ;;  %v1896_v37 = vadd.f32 %v1895_v12, %v1807_v35  ;;  %v6145_v38 = vpop.f32.mrb[33].mxu1  ;;  %2279 = vmatprep.mubr.bf16.mxu0 %v2028_v6 }
 0x1f2   : > { %v1898_v40 = vpop.f32.mrb[34].mxu1 }
 0x1f3   : > { %v5702_v39 = vpop.f32.mrb[36].mxu0  ;;  %v1944_v14 = vmax.f32 %v1896_v37, 0.0  ;;  %v1899_v41 = vadd.f32 %v1898_v40, %v1810_v36  ;;  %v6146_v43 = vpop.f32.mrb[35].mxu1 }
 0x1f4   : > { %v5703_v42 = vpop.f32.mrb[37].mxu0  ;;  %v1971_v55 = vld [vmem:[#allocation2] sm:$0xff] }
 0x1f5   : > { %v5704_v44 = vadd.f32 %v5703_v42, %v5702_v39  ;;  %v5705_v45 = vpop.f32.mrb[38].mxu0  ;;  %1958 = vst [vmem:[#allocation2 + $0x11] sm:$0xff] %v1944_v14  ;;  %v1945_v46 = vmax.f32 %v1899_v41, 0.0 }
 0x1f6   : > { %v5706_v49 = vpop.f32.mrb[39].mxu0  ;;  %v1972_v47 = vld [vmem:[#allocation2 + $0x8] sm:$0xff] }
 0x1f7   : > { %v5707_v53 = vadd.f32 %v5706_v49, %v5705_v45  ;;  %v1815_v54 = vadd.f32 %v5704_v44, %v7289_v59  ;;  %1959 = vst [vmem:[#allocation2 + $0x19] sm:$0xff] %v1945_v46  ;;  %v2031_v56 = vpack.c.bf16 %v1945_v46, %v1944_v14  ;;  %v5235_v58 = vpack.c.bf16 %v1972_v47, %v1971_v55  ;;  %v1985_v13 = vld [vmem:[#allocation2 + $0x2] sm:$0xff] }
 0x1f8   : > { %v1903_v60 = vpop.f32.mrb[36].mxu1 }
 0x1f9   : > { %v1818_v57 = vadd.f32 %v5707_v53, %v7289_v59  ;;  %v1904_v61 = vadd.f32 %v1903_v60, %v1815_v54  ;;  %v6149_v0 = vpop.f32.mrb[37].mxu1  ;;  %5236 = vmatmul.mubr.msk.bf16.vlgmr.msra.gmra.mrb[56].mxu0 %vm8261_vm11, %v5235_v58 }
 0x1fa   : > { %v1906_v3 = vpop.f32.mrb[38].mxu1  ;;  %2287 = vmatprep.mubr.bf16.mxu0 %v2031_v56 }
 0x1fb   : > { %v5708_v1 = vpop.f32.mrb[40].mxu0  ;;  %v1946_v5 = vmax.f32 %v1904_v61, 0.0  ;;  %v1907_v63 = vadd.f32 %v1906_v3, %v1818_v57  ;;  %v6150_v11 = vpop.f32.mrb[39].mxu1 }
 0x1fc   : > { %v5709_v10 = vpop.f32.mrb[41].mxu0  ;;  %v1986_v21 = vld [vmem:[#allocation2 + $0xa] sm:$0xff] }
 0x1fd   : > { %v5710_v15 = vadd.f32 %v5709_v10, %v5708_v1  ;;  %v5711_v16 = vpop.f32.mrb[42].mxu0  ;;  %1960 = vst [vmem:[#allocation2 + $0x21] sm:$0xff] %v1946_v5  ;;  %v1947_v24 = vmax.f32 %v1907_v63, 0.0  ;;  %v5263_v8 = vpack.c.bf16 %v1986_v21, %v1985_v13  ;;  %v1973_v32 = vld [vmem:[#allocation2 + $0x10] sm:$0xff] }
 0x1fe   : > { %v5712_v27 = vpop.f32.mrb[43].mxu0  ;;  %v1974_v34 = vld [vmem:[#allocation2 + $0x18] sm:$0xff] }
 0x1ff   : > { %v5713_v31 = vadd.f32 %v5712_v27, %v5711_v16  ;;  %v1823_v19 = vadd.f32 %v5710_v15, %v7289_v59  ;;  %1961 = vst [vmem:[#allocation2 + $0x29] sm:$0xff] %v1947_v24  ;;  %v2034_v35 = vpack.c.bf16 %v1947_v24, %v1946_v5  ;;  %6184 = vmatmul.mubr.msk.bf16.vlgmr.msra.gmra.mrb[56].mxu1 %vm7080_vm12, %v5263_v8  ;;  %v1987_v45 = vld [vmem:[#allocation2 + $0x12] sm:$0xff]  ;;  %vm8264_vm12 = vcmp.eq.s32.totalorder %v7029_v17, 0 }
 0x200   : > { %v5239_v6 = vpack.c.bf16 %v1974_v34, %v1973_v32  ;;  %v1911_v12 = vpop.f32.mrb[40].mxu1  ;;  %6187 = vmatprep.mubr.msk.bf16.mxu1 %vm8227_vm0, %v6639_v2 }
 0x201   : > { %v1826_v36 = vadd.f32 %v5713_v31, %v7289_v59  ;;  %v1912_v37 = vadd.f32 %v1911_v12, %v1823_v19  ;;  %v6153_v38 = vpop.f32.mrb[41].mxu1 }
 0x202   : > { %5240 = vmatmul.mubr.msk.bf16.gmra.mrb[60].mxu0 %vm7090_vm13, %v5239_v6  ;;  %v1914_v40 = vpop.f32.mrb[42].mxu1 }
 0x203   : > { %v5714_v39 = vpop.f32.mrb[44].mxu0  ;;  %2295 = vmatprep.mubr.bf16.mxu0 %v2034_v35  ;;  %v1948_v14 = vmax.f32 %v1912_v37, 0.0  ;;  %v1915_v41 = vadd.f32 %v1914_v40, %v1826_v36  ;;  %v6154_v4 = vpop.f32.mrb[43].mxu1 }
 0x204   : > { %v5715_v42 = vpop.f32.mrb[45].mxu0  ;;  %v1988_v46 = vld [vmem:[#allocation2 + $0x1a] sm:$0xff] }
 0x205   : > { %v5716_v43 = vadd.f32 %v5715_v42, %v5714_v39  ;;  %v5717_v44 = vpop.f32.mrb[46].mxu0  ;;  %1962 = vst [vmem:[#allocation2 + $0x31] sm:$0xff] %v1948_v14  ;;  %v1949_v49 = vmax.f32 %v1915_v41, 0.0  ;;  %v5267_v53 = vpack.c.bf16 %v1988_v46, %v1987_v45  ;;  %v1975_v22 = vld [vmem:[#allocation2 + $0x20] sm:$0xff] }
 0x206   : > { %v5718_v47 = vpop.f32.mrb[47].mxu0  ;;  %v1976_v56 = vld [vmem:[#allocation2 + $0x28] sm:$0xff] }
 0x207   : > { %v5719_v54 = vadd.f32 %v5718_v47, %v5717_v44  ;;  %v1831_v55 = vadd.f32 %v5716_v43, %v7289_v59  ;;  %1963 = vst [vmem:[#allocation2 + $0x39] sm:$0xff] %v1949_v49  ;;  %v2037_v58 = vpack.c.bf16 %v1949_v49, %v1948_v14  ;;  %6188 = vmatmul.mubr.msk.bf16.gmra.mrb[60].mxu1 %vm7123_vm1, %v5267_v53  ;;  %v1989_v16 = vld [vmem:[#allocation2 + $0x22] sm:$0xff]  ;;  %vm8269_vm1 = vcmp.ne.s32.totalorder %v7034_v26, 13 }
 0x208   : > { %v5243_v60 = vpack.c.bf16 %v1976_v56, %v1975_v22  ;;  %v1919_v57 = vpop.f32.mrb[44].mxu1  ;;  %6191 = vmatprep.mubr.msk.bf16.mxu1 %vm8227_vm0, %v6639_v2 }
 0x209   : > { %v1834_v61 = vadd.f32 %v5719_v54, %v7289_v59  ;;  %v1920_v0 = vadd.f32 %v1919_v57, %v1831_v55  ;;  %v6157_v1 = vpop.f32.mrb[45].mxu1 }
 0x20a   : > { %5244 = vmatmul.mubr.msk.bf16.gmra.mrb[64].mxu0 %vm7133_vm2, %v5243_v60  ;;  %v1922_v5 = vpop.f32.mrb[46].mxu1 }
 0x20b   : > { %v5720_v3 = vpop.f32.mrb[48].mxu0  ;;  %2303 = vmatprep.mubr.bf16.mxu0 %v2037_v58  ;;  %v1950_v63 = vmax.f32 %v1920_v0, 0.0  ;;  %v1923_v10 = vadd.f32 %v1922_v5, %v1834_v61  ;;  %v6158_v33 = vpop.f32.mrb[47].mxu1 }
 0x20c   : > { %v5721_v11 = vpop.f32.mrb[49].mxu0  ;;  %v1990_v21 = vld [vmem:[#allocation2 + $0x2a] sm:$0xff] }
 0x20d   : > { %v5722_v13 = vadd.f32 %v5721_v11, %v5720_v3  ;;  %v5723_v15 = vpop.f32.mrb[50].mxu0  ;;  %1964 = vst [vmem:[#allocation2 + $0x41] sm:$0xff] %v1950_v63  ;;  %v1951_v24 = vmax.f32 %v1923_v10, 0.0  ;;  %v5271_v8 = vpack.c.bf16 %v1990_v21, %v1989_v16  ;;  %v1977_v50 = vld [vmem:[#allocation2 + $0x30] sm:$0xff] }
 0x20e   : > { %v5724_v27 = vpop.f32.mrb[51].mxu0  ;;  %v1978_v32 = vld [vmem:[#allocation2 + $0x38] sm:$0xff] }
 0x20f   : > { %v5725_v31 = vadd.f32 %v5724_v27, %v5723_v15  ;;  %v1839_v19 = vadd.f32 %v5722_v13, %v7289_v59  ;;  %v1991_v34 = vld [vmem:[#allocation2 + $0x32] sm:$0xff]  ;;  %1965 = vst [vmem:[#allocation2 + $0x49] sm:$0xff] %v1951_v24  ;;  %v2040_v35 = vpack.c.bf16 %v1951_v24, %v1950_v63  ;;  %6192 = vmatmul.mubr.msk.bf16.gmra.mrb[64].mxu1 %vm7167_vm15, %v5271_v8 }
 0x210   : > { %v5247_v6 = vpack.c.bf16 %v1978_v32, %v1977_v50  ;;  %2542 = vst [vmem:[#allocation2 + $0x39] sm:$0x1] %v6639_v2  ;;  %v1927_v12 = vpop.f32.mrb[48].mxu1  ;;  %6195 = vmatprep.mubr.msk.bf16.mxu1 %vm8227_vm0, %v6639_v2  ;;  %v6487_v50 = vld [vmem:[%s8210_s3 + $0x8] sm:$0xff]   ;;  %v6490_v32 = vld [vmem:[%s8210_s3 + $0x10] sm:$0xff]  }
 0x211   : > { %v1842_v36 = vadd.f32 %v5725_v31, %v7289_v59  ;;  %v1928_v37 = vadd.f32 %v1927_v12, %v1839_v19  ;;  %v6161_v38 = vpop.f32.mrb[49].mxu1  ;;  %v6483_v19 = vld [vmem:[%s8210_s3 + $0x40] sm:$0xff]   ;;  %v6488_v12 = vld [vmem:[%s8210_s3 + $0x88] sm:$0xff]  }
 0x212   : > { %5248 = vmatmul.mubr.msk.bf16.gmra.mrb[68].mxu0 %vm7174_vm14, %v5247_v6  ;;  %v1930_v40 = vpop.f32.mrb[50].mxu1  ;;  %5820 = vmatprep.subr.bf16.mxu0 %v6483_v19  ;;  %v6493_v6 = vld [vmem:[%s8210_s3 + $0x18] sm:$0xff]   ;;  %v6497_v38 = vld [vmem:[%s8210_s3 + $0x68] sm:$0xff]  }
 0x213   : > { %v5726_v39 = vpop.f32.mrb[52].mxu0  ;;  %2311 = vmatprep.mubr.bf16.mxu0 %v2040_v35  ;;  %v1952_v14 = vmax.f32 %v1928_v37, 0.0  ;;  %v1931_v23 = vadd.f32 %v1930_v40, %v1842_v36  ;;  %v6162_v42 = vpop.f32.mrb[51].mxu1  ;;  %5821 = vmatpush3.bf16.msra.mxu0 %v6484_v28  ;;  %v6485_v35 = vld [vmem:[%s8210_s3 + $0x80] sm:$0xff]   ;;  %v6499_v40 = vld [vmem:[%s8210_s3 + $0x70] sm:$0xff]  }
 0x214   : > { %v5727_v41 = vpop.f32.mrb[53].mxu0  ;;  %v1992_v44 = vld [vmem:[#allocation2 + $0x3a] sm:$0xff]  ;;  %5822 = vmatprep.subr.bf16.mxu0 %v6486_v18  ;;  %6211 = vmatprep.subr.bf16.mxu1 %v6485_v35 }
 0x215   : > { %v5728_v4 = vadd.f32 %v5727_v41, %v5726_v39  ;;  %v5729_v43 = vpop.f32.mrb[54].mxu0  ;;  %1966 = vst [vmem:[#allocation2 + $0x51] sm:$0xff] %v1952_v14  ;;  %v1953_v45 = vmax.f32 %v1931_v23, 0.0  ;;  %v5275_v49 = vpack.c.bf16 %v1992_v44, %v1991_v34  ;;  %v1979_v54 = vld [vmem:[#allocation2 + $0x40] sm:$0xff]  ;;  %v6492_v34 = vld [vmem:[%s8210_s3 + $0x58] sm:$0xff]   ;;  %6212 = vmatpush3.bf16.msra.mxu1 %v6485_v35  ;;  %v6498_v39 = vld [vmem:[%s8210_s3 + $0x28] sm:$0xff]  }
 0x216   : > { %v5730_v46 = vpop.f32.mrb[55].mxu0  ;;  %v1980_v62 = vld [vmem:[#allocation2 + $0x48] sm:$0xff]  ;;  %v6494_v36 = vld [vmem:[%s8210_s3 + $0x60] sm:$0xff]   ;;  %6213 = vmatprep.subr.bf16.mxu1 %v6488_v12  ;;  %v6491_v23 = vld [vmem:[%s8210_s3 + $0x90] sm:$0xff]  }
 0x217   : > { %v5731_v47 = vadd.f32 %v5730_v46, %v5729_v43  ;;  %v1847_v53 = vadd.f32 %v5728_v4, %v7289_v59  ;;  %1967 = vst [vmem:[#allocation2 + $0x59] sm:$0xff] %v1953_v45  ;;  %v2043_v55 = vpack.c.bf16 %v1953_v45, %v1952_v14  ;;  %6196 = vmatmul.mubr.msk.bf16.gmra.mrb[68].mxu1 %vm7191_vm9, %v5275_v49  ;;  %v1993_v5 = vld [vmem:[#allocation2 + $0x42] sm:$0xff]  ;;  %v6500_v14 = vld [vmem:[%s8210_s3 + $0x30] sm:$0xff]   ;;  %v6496_v41 = vld [vmem:[%s8210_s3 + $0x98] sm:$0xff]  }
 0x218   : > { %v5251_v22 = vpack.c.bf16 %v1980_v62, %v1979_v54  ;;  %v1935_v56 = vpop.f32.mrb[52].mxu1  ;;  %6199 = vmatprep.mubr.msk.bf16.mxu1 %vm8227_vm0, %v6639_v2  ;;  %vm8263_vm9 = vnez %v8252_v20  ;;  %5823 = vmatpush3.bf16.msra.mxu0 %v6487_v50  ;;  %v6495_v37 = vld [vmem:[%s8210_s3 + $0x20] sm:$0xff]   ;;  %v6502_v42 = vld [vmem:[%s8210_s3 + $0x78] sm:$0xff]   ;;  %v6504_v44 = vld [vmem:[%s8210_s3 + $0xa8] sm:$0xff]  }
 0x219   : > { %v1850_v58 = vadd.f32 %v5731_v47, %v7289_v59  ;;  %v1936_v60 = vadd.f32 %v1935_v56, %v1847_v53  ;;  %v6165_v57 = vpop.f32.mrb[53].mxu1  ;;  %5824 = vmatprep.subr.bf16.mxu0 %v6489_v25  ;;  %6214 = vmatpush3.bf16.msra.mxu1 %v6488_v12  ;;  %v6503_v4 = vld [vmem:[%s8210_s3 + $0x38] sm:$0xff]   ;;  %v6501_v43 = vld [vmem:[%s8210_s3 + $0xa0] sm:$0xff]   ;;  %v6505_v45 = vld [vmem:[%s8210_s3 + $0xb0] sm:$0xff]  }
 0x21a   : > { %5252 = vmatmul.mubr.msk.bf16.gmra.mrb[72].mxu0 %vm8262_vm7, %v5251_v22  ;;  %v1938_v61 = vpop.f32.mrb[54].mxu1  ;;  %6215 = vmatprep.subr.bf16.mxu1 %v6491_v23  ;;  %v6506_v46 = vld [vmem:[%s8210_s3 + $0xb8] sm:$0xff]  }
 0x21b   : > { %2319 = vmatprep.mubr.bf16.mxu0 %v2043_v55  ;;  %v1954_v0 = vmax.f32 %v1936_v60, 0.0  ;;  %v1939_v1 = vadd.f32 %v1938_v61, %v1850_v58  ;;  %v6166_v3 = vpop.f32.mrb[55].mxu1 }
 0x21c   : > { %v1994_v48 = vld [vmem:[#allocation2 + $0x4a] sm:$0xff]  ;;  %5825 = vmatpush3.bf16.msra.mxu0 %v6490_v32 }
 0x21d   : > { %1968 = vst [vmem:[#allocation2 + $0x61] sm:$0xff] %v1954_v0  ;;  %v1955_v63 = vmax.f32 %v1939_v1, 0.0  ;;  %v5279_v10 = vpack.c.bf16 %v1994_v48, %v1993_v5  ;;  %v1981_v11 = vld [vmem:[#allocation2 + $0x50] sm:$0xff]  ;;  %5826 = vmatprep.subr.bf16.mxu0 %v6492_v34  ;;  %6216 = vmatpush3.bf16.msra.mxu1 %v6491_v23 }
 0x21e   : > { %v1982_v33 = vld [vmem:[#allocation2 + $0x58] sm:$0xff]  ;;  %6217 = vmatprep.subr.bf16.mxu1 %v6496_v41 }
 0x21f   : > { %1969 = vst [vmem:[#allocation2 + $0x69] sm:$0xff] %v1955_v63  ;;  %v2046_v13 = vpack.c.bf16 %v1955_v63, %v1954_v0  ;;  %6200 = vmatmul.mubr.msk.bf16.gmra.mrb[72].mxu1 %vm8263_vm9, %v5279_v10  ;;  %v5255_v15 = vpack.c.bf16 %v1982_v33, %v1981_v11  ;;  %v1995_v51 = vld [vmem:[#allocation2 + $0x52] sm:$0xff] }
 0x220   : > { %6203 = vmatprep.mubr.msk.bf16.mxu1 %vm8227_vm0, %v6639_v2  ;;  %5827 = vmatpush3.bf16.msra.mxu0 %v6493_v6 }
 0x221   : > { %5828 = vmatprep.subr.bf16.mxu0 %v6494_v36  ;;  %6218 = vmatpush3.bf16.msra.mxu1 %v6496_v41 }
 0x222   : > { %5256 = vmatmul.mubr.msk.bf16.gmra.mrb[76].mxu0 %vm7216_vm8, %v5255_v15  ;;  %6219 = vmatprep.subr.bf16.mxu1 %v6501_v43  ;;  %vm8226_vm8 = vcmp.eq.s32.totalorder %v7029_v17, 7 }
 0x223   : > { %2327 = vmatprep.mubr.bf16.mxu0 %v2046_v13  ;;  %vm7455_vm13 = vmor %vm8264_vm12, %vm8226_vm8  ;;  %vm8275_vm12 = vcmp.ne.s32.totalorder %v7057_v52, 27 }
 0x224   : > { %v1996_v16 = vld [vmem:[#allocation2 + $0x5a] sm:$0xff]  ;;  %5829 = vmatpush3.bf16.msra.mxu0 %v6495_v37  ;;  %vm5316_vm14 = vmneg %vm7455_vm13 }
 0x225   : > { %v5283_v21 = vpack.c.bf16 %v1996_v16, %v1995_v51  ;;  %v1983_v24 = vld [vmem:[#allocation2 + $0x60] sm:$0xff]  ;;  %5830 = vmatprep.subr.bf16.mxu0 %v6497_v38  ;;  %6220 = vmatpush3.bf16.msra.mxu1 %v6501_v43  ;;  %vm7468_vm15 = vmpackc.low %vm7042_vm6, %vm5316_vm14  ;;  %vm2716_vm14 = vcmp.eq.s32.totalorder %v7159_v7, 48 }
 0x226   : > { %v1984_v27 = vld [vmem:[#allocation2 + $0x68] sm:$0xff]  ;;  %6221 = vmatprep.subr.bf16.mxu1 %v6504_v44 }
 0x227   : > { %6204 = vmatmul.mubr.msk.bf16.gmra.mrb[76].mxu1 %vm7228_vm3, %v5283_v21  ;;  %v5259_v8 = vpack.c.bf16 %v1984_v27, %v1983_v24  ;;  %v1997_v20 = vld [vmem:[#allocation2 + $0x62] sm:$0xff]  ;;  %v1998_v31 = vld [vmem:[#allocation2 + $0x6a] sm:$0xff] }
 0x228   : > { %6207 = vmatprep.mubr.msk.bf16.mxu1 %vm8227_vm0, %v6639_v2  ;;  %v5288_v29 = vpack.c.bf16 %v1998_v31, %v1997_v20  ;;  %5831 = vmatpush3.bf16.msra.mxu0 %v6498_v39  ;;  %vm8284_vm0 = vcmp.ne.s32.totalorder %v7095_v30, 41 }
 0x229   : > { %5832 = vmatprep.subr.bf16.mxu0 %v6499_v40  ;;  %6222 = vmatpush3.bf16.msra.mxu1 %v6504_v44 }
 0x22a   : > { %5260 = vmatmul.mubr.msk.bf16.gmra.mrb[80].mxu0 %vm7233_vm5, %v5259_v8  ;;  %6223 = vmatprep.subr.bf16.mxu1 %v6505_v45  ;;  %vm8229_vm5 = vcmp.eq.s32.totalorder %v7029_v17, 6 }
 0x22b   : > { %vm5336_vm6 = vmneg %vm8229_vm5 }
 0x22c   : > { %5833 = vmatpush3.bf16.msra.mxu0 %v6500_v14  ;;  %vm7486_vm2 = vmpackc.low %vm8269_vm1, %vm5336_vm6  ;;  %vm8278_vm1 = vcmp.eq.s32.totalorder %v7159_v7, 55 }
 0x22d   : > { %5834 = vmatprep.subr.bf16.mxu0 %v6502_v42  ;;  %6224 = vmatpush3.bf16.msra.mxu1 %v6505_v45 }
 0x22e   : > { %6225 = vmatprep.subr.bf16.mxu1 %v6506_v46 }
 0x22f   : > { %6208 = vmatmul.mubr.msk.bf16.gmra.mrb[80].mxu1 %vm7245_vm4, %v5288_v29  ;;  %vm8272_vm4 = vcmp.ne.s32.totalorder %v7057_v52, 28 }
 0x230   : > { %5835 = vmatpush3.bf16.msra.mxu0 %v6503_v4 }
 0x231   : > { %6226 = vmatpush3.bf16.msra.mxu1 %v6506_v46 }
 0x2cc   : > { %v5763_v49 = vpop.f32.mrb[56].mxu0 }
 0x2cd   : > { %v5764_v47 = vpop.f32.mrb[57].mxu0 }
 0x2ce   : > { %v5765_v53 = vadd.f32 %v5764_v47, %v5763_v49  ;;  %v5766_v54 = vpop.f32.mrb[58].mxu0 }
 0x2cf   : > { %v5767_v62 = vpop.f32.mrb[59].mxu0 }
 0x2d0   : > { %v5768_v55 = vadd.f32 %v5767_v62, %v5766_v54  ;;  %v2282_v22 = vadd.f32 %v5765_v53, %v7289_v59 }
 0x2d2   : > { %v2370_v56 = vpop.f32.mrb[56].mxu1  ;;  %v2285_v58 = vadd.f32 %v5768_v55, %v7289_v59 }
 0x2d3   : > { %v2371_v60 = vadd.f32 %v2370_v56, %v2282_v22  ;;  %v6185_v57 = vpop.f32.mrb[57].mxu1 }
 0x2d4   : > { %v2373_v0 = vpop.f32.mrb[58].mxu1 }
 0x2d5   : > { %v5769_v61 = vpop.f32.mrb[60].mxu0  ;;  %2425 = vst [vmem:[#allocation4] sm:$0xff] %v2371_v60  ;;  %v2374_v1 = vadd.f32 %v2373_v0, %v2285_v58  ;;  %v6186_v5 = vpop.f32.mrb[59].mxu1 }
 0x2d6   : > { %v5770_v3 = vpop.f32.mrb[61].mxu0 }
 0x2d7   : > { %v5771_v48 = vadd.f32 %v5770_v3, %v5769_v61  ;;  %v5772_v63 = vpop.f32.mrb[62].mxu0  ;;  %2426 = vst [vmem:[#allocation4 + $0x8] sm:$0xff] %v2374_v1 }
 0x2d8   : > { %v5773_v10 = vpop.f32.mrb[63].mxu0 }
 0x2d9   : > { %v5774_v11 = vadd.f32 %v5773_v10, %v5772_v63  ;;  %v2290_v33 = vadd.f32 %v5771_v48, %v7289_v59 }
 0x2da   : > { %v2378_v13 = vpop.f32.mrb[60].mxu1 }
 0x2db   : > { %v2293_v15 = vadd.f32 %v5774_v11, %v7289_v59  ;;  %v2379_v51 = vadd.f32 %v2378_v13, %v2290_v33  ;;  %v6189_v16 = vpop.f32.mrb[61].mxu1 }
 0x2dc   : > { %v2381_v24 = vpop.f32.mrb[62].mxu1 }
 0x2dd   : > { %v5775_v21 = vpop.f32.mrb[64].mxu0  ;;  %2427 = vst [vmem:[#allocation4 + $0x10] sm:$0xff] %v2379_v51  ;;  %v2382_v27 = vadd.f32 %v2381_v24, %v2293_v15  ;;  %v6190_v20 = vpop.f32.mrb[63].mxu1 }
 0x2de   : > { %v5776_v8 = vpop.f32.mrb[65].mxu0  ;;  %v2439_v31 = vld [vmem:[#allocation4] ss:$2 sm:$0x7f] }
 0x2df   : > { %v2441_v29 = vld [vmem:[#allocation4 + $0x1] ss:$2 sm:$0x7f]  ;;  %v5777_v19 = vadd.f32 %v5776_v8, %v5775_v21  ;;  %v2443_v28 = vld [vmem:[#allocation4 + $0x2] ss:$2 sm:$0x7f] }
 0x2e0   : > { %v2448_v18 = vmax.f32 %v2439_v31, %v2441_v29  ;;  %2428 = vst [vmem:[#allocation4 + $0x18] sm:$0xff] %v2382_v27  ;;  %v5778_v50 = vpop.f32.mrb[66].mxu0  ;;  %v2447_v25 = vsel %vm8229_vm5, 0.0, %v2443_v28 }
 0x2e1   : > { %v5779_v32 = vpop.f32.mrb[67].mxu0  ;;  %v2298_v34 = vadd.f32 %v5777_v19, %v7289_v59 }
 0x2e2   : > { %v2449_v35 = vmax.f32 %v2448_v18, %v2447_v25  ;;  %v5780_v6 = vadd.f32 %v5779_v32, %v5778_v50  ;;  %v2386_v12 = vpop.f32.mrb[64].mxu1 }
 0x2e3   : > { %v2387_v36 = vadd.f32 %v2386_v12, %v2298_v34  ;;  %v6193_v37 = vpop.f32.mrb[65].mxu1 }
 0x2e4   : > { %2450 = vst [vmem:[#allocation5] sm:$0x7f] %v2449_v35  ;;  %v2301_v38 = vadd.f32 %v5780_v6, %v7289_v59  ;;  %v2389_v40 = vpop.f32.mrb[66].mxu1 }
 0x2e5   : > { %v5781_v39 = vpop.f32.mrb[68].mxu0  ;;  %2429 = vst [vmem:[#allocation4 + $0x20] sm:$0xff] %v2387_v36  ;;  %v6194_v41 = vpop.f32.mrb[67].mxu1 }
 0x2e6   : > { %v2390_v14 = vadd.f32 %v2389_v40, %v2301_v38  ;;  %v5782_v23 = vpop.f32.mrb[69].mxu0 }
 0x2e7   : > { %v2452_v42 = vld [vmem:[#allocation4 + $0xe] ss:$2 sm:$0x7f]  ;;  %v2454_v4 = vld [vmem:[#allocation4 + $0xf] ss:$2 sm:$0x7f]  ;;  %v5783_v43 = vadd.f32 %v5782_v23, %v5781_v39 }
 0x2e8   : > { %v2456_v44 = vld [vmem:[#allocation4 + $0x10] ss:$2 sm:$0x7f]  ;;  %v2458_v45 = vmax.f32 %v2452_v42, %v2454_v4  ;;  %2430 = vst [vmem:[#allocation4 + $0x28] sm:$0xff] %v2390_v14  ;;  %v5784_v46 = vpop.f32.mrb[70].mxu0 }
 0x2e9   : > { %v2457_v49 = vsel %vm8229_vm5, 0.0, %v2456_v44  ;;  %v5785_v47 = vpop.f32.mrb[71].mxu0  ;;  %v2306_v53 = vadd.f32 %v5783_v43, %v7289_v59 }
 0x2ea   : > { %v2459_v54 = vmax.f32 %v2458_v45, %v2457_v49  ;;  %v5786_v62 = vadd.f32 %v5785_v47, %v5784_v46  ;;  %v2394_v55 = vpop.f32.mrb[68].mxu1 }
 0x2eb   : > { %v2395_v22 = vadd.f32 %v2394_v55, %v2306_v53  ;;  %v6197_v56 = vpop.f32.mrb[69].mxu1 }
 0x2ec   : > { %2460 = vst [vmem:[#allocation5 + $0x7] sm:$0x7f] %v2459_v54  ;;  %v2309_v58 = vadd.f32 %v5786_v62, %v7289_v59  ;;  %v2397_v57 = vpop.f32.mrb[70].mxu1 }
 0x2ed   : > { %v5787_v60 = vpop.f32.mrb[72].mxu0  ;;  %2431 = vst [vmem:[#allocation4 + $0x30] sm:$0xff] %v2395_v22  ;;  %v6198_v1 = vpop.f32.mrb[71].mxu1 }
 0x2ee   : > { %v2398_v61 = vadd.f32 %v2397_v57, %v2309_v58  ;;  %v5788_v0 = vpop.f32.mrb[73].mxu0 }
 0x2ef   : > { %v2462_v3 = vld [vmem:[#allocation4 + $0x1c] ss:$2 sm:$0x7f]  ;;  %v2464_v5 = vld [vmem:[#allocation4 + $0x1d] ss:$2 sm:$0x7f]  ;;  %v5789_v48 = vadd.f32 %v5788_v0, %v5787_v60 }
 0x2f0   : > { %v2466_v63 = vld [vmem:[#allocation4 + $0x1e] ss:$2 sm:$0x7f]  ;;  %v2468_v10 = vmax.f32 %v2462_v3, %v2464_v5  ;;  %2432 = vst [vmem:[#allocation4 + $0x38] sm:$0xff] %v2398_v61  ;;  %v5790_v11 = vpop.f32.mrb[74].mxu0 }
 0x2f1   : > { %v2467_v33 = vsel %vm8229_vm5, 0.0, %v2466_v63  ;;  %v5791_v13 = vpop.f32.mrb[75].mxu0  ;;  %v2314_v15 = vadd.f32 %v5789_v48, %v7289_v59 }
 0x2f2   : > { %v2469_v51 = vmax.f32 %v2468_v10, %v2467_v33  ;;  %v5792_v16 = vadd.f32 %v5791_v13, %v5790_v11  ;;  %v2402_v21 = vpop.f32.mrb[72].mxu1 }
 0x2f3   : > { %v7437_v24 = vld [vmem:[#allocation5] sm:$0xff]  ;;  %v2403_v27 = vadd.f32 %v2402_v21, %v2314_v15  ;;  %v6201_v8 = vpop.f32.mrb[73].mxu1 }
 0x2f4   : > { %2470 = vst [vmem:[#allocation5 + $0xe] sm:$0x7f] %v2469_v51  ;;  %v2317_v20 = vadd.f32 %v5792_v16, %v7289_v59  ;;  %v2528_v31 = vmax.f32 %v7437_v24, 0.0  ;;  %v2472_v29 = vld [vmem:[#allocation4 + $0x2a] ss:$2 sm:$0x7f] }
 0x2f5   : > { %v2474_v19 = vld [vmem:[#allocation4 + $0x2b] ss:$2 sm:$0x7f]  ;;  %2433 = vst [vmem:[#allocation4 + $0x40] sm:$0xff] %v2403_v27  ;;  %v5793_v18 = vpop.f32.mrb[76].mxu0  ;;  %v2405_v50 = vpop.f32.mrb[74].mxu1 }
 0x2f6   : > { %v2478_v28 = vmax.f32 %v2472_v29, %v2474_v19  ;;  %2535 = vst [vmem:[#allocation2 + $0x1] sm:$0xff] %v2528_v31  ;;  %v2406_v32 = vadd.f32 %v2405_v50, %v2317_v20  ;;  %v5794_v34 = vpop.f32.mrb[77].mxu0  ;;  %v6202_v35 = vpop.f32.mrb[75].mxu1 }
 0x2f7   : > { %v2476_v25 = vld [vmem:[#allocation4 + $0x2c] ss:$2 sm:$0x7f]  ;;  %v5795_v12 = vadd.f32 %v5794_v34, %v5793_v18  ;;  %v5796_v36 = vpop.f32.mrb[78].mxu0 }
 0x2f8   : > { %v2477_v6 = vsel %vm8229_vm5, 0.0, %v2476_v25  ;;  %2434 = vst [vmem:[#allocation4 + $0x48] sm:$0xff] %v2406_v32  ;;  %v5797_v38 = vpop.f32.mrb[79].mxu0 }
 0x2f9   : > { %v2479_v37 = vmax.f32 %v2478_v28, %v2477_v6  ;;  %v5798_v39 = vadd.f32 %v5797_v38, %v5796_v36  ;;  %v2322_v40 = vadd.f32 %v5795_v12, %v7289_v59  ;;  %v7475_v28 = vadd.s32 16, %v7029_v17 }
 0x2fa   : > { %v2410_v14 = vpop.f32.mrb[76].mxu1 }
 0x2fb   : > { %2480 = vst [vmem:[#allocation5 + $0x15] sm:$0x7f] %v2479_v37  ;;  %v7444_v23 = vld [vmem:[#allocation5 + $0x8] sm:$0xff]  ;;  %v2411_v41 = vadd.f32 %v2410_v14, %v2322_v40  ;;  %v6205_v42 = vpop.f32.mrb[77].mxu1  ;;  %v2325_v4 = vadd.f32 %v5798_v39, %v7289_v59  ;;  %vm8230_vm3 = vcmp.eq.s32.totalorder %v7475_v28, 21  ;;  %vm2670_vm7 = vcmp.eq.s32.totalorder %v7475_v28, 20 }
 0x2fc   : > { %v2529_v43 = vmax.f32 %v7444_v23, 0.0  ;;  %v2482_v44 = vld [vmem:[#allocation4 + $0x38] ss:$2 sm:$0x7f]  ;;  %v2413_v53 = vpop.f32.mrb[78].mxu1  ;;  %vm5321_vm10 = vmneg %vm8230_vm3 }
 0x2fd   : > { %v2484_v45 = vld [vmem:[#allocation4 + $0x39] ss:$2 sm:$0x7f]  ;;  %v2486_v46 = vld [vmem:[#allocation4 + $0x3a] ss:$2 sm:$0x7f]  ;;  %v2414_v55 = vadd.f32 %v2413_v53, %v2325_v4  ;;  %vm7504_vm11 = vmpackc.low %vm8272_vm4, %vm5321_vm10 }
 0x2fe   : > { %v2488_v49 = vmax.f32 %v2482_v44, %v2484_v45  ;;  %2435 = vst [vmem:[#allocation4 + $0x50] sm:$0xff] %v2411_v41  ;;  %v5799_v47 = vpop.f32.mrb[80].mxu0  ;;  %2536 = vst [vmem:[#allocation2 + $0x9] sm:$0xff] %v2529_v43  ;;  %v2753_v54 = vpack.c.bf16 %v2529_v43, %v2528_v31  ;;  %v2487_v62 = vsel %vm8229_vm5, 0.0, %v2486_v46  ;;  %v6206_v56 = vpop.f32.mrb[79].mxu1  ;;  %v2543_v8 = vld [vmem:[#allocation2] sm:$0xff] }
 0x2ff   : > { %v5800_v22 = vpop.f32.mrb[81].mxu0  ;;  %2436 = vst [vmem:[#allocation4 + $0x58] sm:$0xff] %v2414_v55  ;;  %vm5341_vm9 = vmneg %vm2670_vm7 }
 0x300   : > { %v2489_v60 = vmax.f32 %v2488_v49, %v2487_v62  ;;  %v5801_v57 = vadd.f32 %v5800_v22, %v5799_v47  ;;  %v5802_v61 = vpop.f32.mrb[82].mxu0  ;;  %2995 = vmatprep.mubr.bf16.mxu0 %v2753_v54  ;;  %vm7518_vm13 = vmpackc.low %vm8275_vm12, %vm5341_vm9  ;;  %vm8281_vm9 = vcmp.ne.s32.totalorder %v7095_v30, 42 }
 0x301   : > { %v5803_v0 = vpop.f32.mrb[83].mxu0  ;;  %vm7531_vm10 = vmor %vm2716_vm14, %vm8278_vm1 }
 0x302   : > { %2490 = vst [vmem:[#allocation5 + $0x1c] sm:$0x7f] %v2489_v60  ;;  %v5804_v1 = vadd.f32 %v5803_v0, %v5802_v61  ;;  %v2330_v3 = vadd.f32 %v5801_v57, %v7289_v59  ;;  %v7462_v5 = vld [vmem:[#allocation5 + $0x10] sm:$0xff]  ;;  %v2418_v48 = vpop.f32.mrb[80].mxu1  ;;  %v1030_v61 = vadd.s32 32, %v7029_v17  ;;  %vm5350_vm8 = vmneg %vm7531_vm10  ;;  %vm3563_vm10 = vcmp.eq.s32.totalorder %v7029_v17, 3 }
 0x303   : > { %v2530_v63 = vmax.f32 %v7462_v5, 0.0  ;;  %v6209_v11 = vpop.f32.mrb[81].mxu1 }
 0x304   : > { %v2419_v10 = vadd.f32 %v2418_v48, %v2330_v3  ;;  %v2333_v33 = vadd.f32 %v5804_v1, %v7289_v59  ;;  %v2421_v27 = vpop.f32.mrb[82].mxu1  ;;  %vm5597_vm6 = vcmp.ne.s32.totalorder %v1030_v61, 35  ;;  %vm5599_vm4 = vcmp.ne.s32.totalorder %v1030_v61, 34 }
 0x305   : > { %v2492_v13 = vld [vmem:[#allocation4 + $0x46] ss:$2 sm:$0x7f]  ;;  %v2494_v15 = vld [vmem:[#allocation4 + $0x47] ss:$2 sm:$0x7f]  ;;  %vm7537_vm12 = vmpackc.low %vm8281_vm9, %vm5597_vm6 }
 0x306   : > { %2537 = vst [vmem:[#allocation2 + $0x11] sm:$0xff] %v2530_v63  ;;  %v2496_v16 = vld [vmem:[#allocation4 + $0x48] ss:$2 sm:$0x7f]  ;;  %v2498_v21 = vmax.f32 %v2492_v13, %v2494_v15  ;;  %2437 = vst [vmem:[#allocation4 + $0x60] sm:$0xff] %v2419_v10  ;;  %v2544_v20 = vld [vmem:[#allocation2 + $0x8] sm:$0xff]  ;;  %v2422_v29 = vadd.f32 %v2421_v27, %v2333_v33 }
 0x307   : > { %v2497_v31 = vsel %vm8229_vm5, 0.0, %v2496_v16  ;;  %v6210_v59 = vpop.f32.mrb[83].mxu1  ;;  %v5318_v19 = vpack.c.bf16 %v2544_v20, %v2543_v8  ;;  %v2550_v32 = vld [vmem:[#allocation2 + $0x2] sm:$0xff]  ;;  %vm7545_vm14 = vmpackc.low %vm8284_vm0, %vm5599_vm4  ;;  %vm5598_vm0 = vcmp.ne.s32.totalorder %v7159_v7, 49 }
 0x308   : > { %v2499_v9 = vmax.f32 %v2498_v21, %v2497_v31  ;;  %2438 = vst [vmem:[#allocation4 + $0x68] sm:$0xff] %v2422_v29  ;;  %vm7551_vm6 = vmpackc.low %vm5350_vm8, %vm5350_vm8  ;;  %v6507_v29 = vld [vmem:[%s8210_s3 + $0x40] sm:$0xff]   ;;  %v6509_v59 = vld [vmem:[%s8210_s3 + $0x48] sm:$0xff]   ;;  %vm4349_vm8 = vcmp.eq.s32.totalorder %v7029_v17, 1 }
 0x309   : > { %5319 = vmatmul.mubr.msk.bf16.vlgmr.msra.gmra.mrb[84].mxu0 %vm7468_vm15, %v5318_v19  ;;  %v7479_v18 = vld [vmem:[#allocation5 + $0x18] sm:$0xff]  ;;  %vm7561_vm1 = vmpackc.low %vm5598_vm0, %vm5598_vm0  ;;  %v6508_v7 = vld [vmem:[%s8210_s3] sm:$0xff]   ;;  %5872 = vmatprep.subr.bf16.mxu0 %v6507_v29  ;;  %vm3573_vm0 = vcmp.eq.s32.totalorder %v7034_v26, 9 }
 0x30a   : > { %2500 = vst [vmem:[#allocation5 + $0x23] sm:$0x7f] %v2499_v9  ;;  %v2531_v50 = vmax.f32 %v7479_v18, 0.0  ;;  %5873 = vmatpush3.bf16.msra.mxu0 %v6508_v7  ;;  %v6510_v19 = vld [vmem:[%s8210_s3 + $0x8] sm:$0xff]   ;;  %v6511_v9 = vld [vmem:[%s8210_s3 + $0x50] sm:$0xff]   ;;  %v6535_v20 = vld [vmem:[%s8210_s3 + $0x80] sm:$0xff]  }
 0x30b   : > { %5874 = vmatprep.subr.bf16.mxu0 %v6509_v59  ;;  %v6533_v33 = vld [vmem:[%s8210_s3 + $0x48] sm:$0xff]  }
 0x30c   : > { %v2756_v25 = vpack.c.bf16 %v2531_v50, %v2530_v63  ;;  %2538 = vst [vmem:[#allocation2 + $0x19] sm:$0xff] %v2531_v50  ;;  %v6512_v50 = vld [vmem:[%s8210_s3 + $0x10] sm:$0xff]   ;;  %v6532_v63 = vld [vmem:[%s8210_s3] sm:$0xff]   ;;  %v6534_v27 = vld [vmem:[%s8210_s3 + $0x8] sm:$0xff]  }
 0x30d   : > { %v2551_v34 = vld [vmem:[#allocation2 + $0xa] sm:$0xff]  ;;  %v2502_v6 = vld [vmem:[#allocation4 + $0x54] ss:$2 sm:$0x7f] }
 0x30e   : > { %v2504_v12 = vld [vmem:[#allocation4 + $0x55] ss:$2 sm:$0x7f]  ;;  %v5338_v36 = vpack.c.bf16 %v2551_v34, %v2550_v32  ;;  %v2506_v37 = vld [vmem:[#allocation4 + $0x56] ss:$2 sm:$0x7f]  ;;  %3003 = vmatprep.mubr.bf16.mxu0 %v2756_v25  ;;  %5875 = vmatpush3.bf16.msra.mxu0 %v6510_v19 }
 0x30f   : > { %v2508_v38 = vmax.f32 %v2502_v6, %v2504_v12  ;;  %v2507_v39 = vsel %vm8229_vm5, 0.0, %v2506_v37  ;;  %v2512_v14 = vld [vmem:[#allocation4 + $0x62] ss:$2 sm:$0x7f]  ;;  %5876 = vmatprep.subr.bf16.mxu0 %v6511_v9  ;;  %v6513_v25 = vld [vmem:[%s8210_s3 + $0x80] sm:$0xff]   ;;  %v6514_v32 = vld [vmem:[%s8210_s3 + $0x58] sm:$0xff]  }
 0x310   : > { %6227 = vmatprep.mubr.msk.bf16.mxu1 %vm7486_vm2, %v5338_v36  ;;  %v2514_v41 = vld [vmem:[#allocation4 + $0x63] ss:$2 sm:$0x7f]  ;;  %v2516_v42 = vld [vmem:[#allocation4 + $0x64] ss:$2 sm:$0x7f]  ;;  %6235 = vmatprep.subr.bf16.mxu1 %v6513_v25 }
 0x311   : > { %v2509_v40 = vmax.f32 %v2508_v38, %v2507_v39  ;;  %v2518_v4 = vmax.f32 %v2512_v14, %v2514_v41  ;;  %v7497_v43 = vld [vmem:[#allocation5 + $0x20] sm:$0xff]  ;;  %v2517_v44 = vsel %vm8229_vm5, 0.0, %v2516_v42  ;;  %v2545_v49 = vld [vmem:[#allocation2 + $0x10] sm:$0xff]  ;;  %v6515_v34 = vld [vmem:[%s8210_s3 + $0x18] sm:$0xff]  }
 0x312   : > { %v2532_v45 = vmax.f32 %v7497_v43, 0.0  ;;  %5877 = vmatpush3.bf16.msra.mxu0 %v6512_v50  ;;  %v6516_v6 = vld [vmem:[%s8210_s3 + $0x88] sm:$0xff]   ;;  %v6517_v12 = vld [vmem:[%s8210_s3 + $0x60] sm:$0xff]   ;;  %v6519_v37 = vld [vmem:[%s8210_s3 + $0x90] sm:$0xff]  }
 0x313   : > { %2510 = vst [vmem:[#allocation5 + $0x2a] sm:$0x7f] %v2509_v40  ;;  %v2519_v46 = vmax.f32 %v2518_v4, %v2517_v44  ;;  %v2546_v47 = vld [vmem:[#allocation2 + $0x18] sm:$0xff]  ;;  %5878 = vmatprep.subr.bf16.mxu0 %v6514_v32  ;;  %v6518_v36 = vld [vmem:[%s8210_s3 + $0x20] sm:$0xff]   ;;  %v6520_v38 = vld [vmem:[%s8210_s3 + $0x68] sm:$0xff]  }
 0x314   : > { %v5323_v54 = vpack.c.bf16 %v2546_v47, %v2545_v49  ;;  %2539 = vst [vmem:[#allocation2 + $0x21] sm:$0xff] %v2532_v45  ;;  %v2552_v56 = vld [vmem:[#allocation2 + $0x12] sm:$0xff]  ;;  %v6521_v39 = vld [vmem:[%s8210_s3 + $0x28] sm:$0xff]   ;;  %v6525_v42 = vld [vmem:[%s8210_s3 + $0xa0] sm:$0xff]  }
 0x315   : > { %2520 = vst [vmem:[#allocation5 + $0x31] sm:$0x7f] %v2519_v46  ;;  %v6522_v40 = vld [vmem:[%s8210_s3 + $0x98] sm:$0xff]   ;;  %v6523_v14 = vld [vmem:[%s8210_s3 + $0x70] sm:$0xff]  }
 0x316   : > { %5324 = vmatmul.mubr.msk.bf16.gmra.mrb[88].mxu0 %vm7504_vm11, %v5323_v54  ;;  %v6524_v41 = vld [vmem:[%s8210_s3 + $0x30] sm:$0xff]   ;;  %v6526_v4 = vld [vmem:[%s8210_s3 + $0x78] sm:$0xff]  }
 0x317   : > { %5879 = vmatpush3.bf16.msra.mxu0 %v6515_v34  ;;  %v6527_v44 = vld [vmem:[%s8210_s3 + $0x38] sm:$0xff]   ;;  %v6529_v46 = vld [vmem:[%s8210_s3 + $0xb0] sm:$0xff]  }
 0x318   : > { %5880 = vmatprep.subr.bf16.mxu0 %v6517_v12  ;;  %v6530_v49 = vld [vmem:[%s8210_s3 + $0xb8] sm:$0xff]  }
 0x31a   : > { %v7513_v62 = vld [vmem:[#allocation5 + $0x28] sm:$0xff] }
 0x31b   : > { %v2533_v55 = vmax.f32 %v7513_v62, 0.0  ;;  %v2553_v58 = vld [vmem:[#allocation2 + $0x1a] sm:$0xff]  ;;  %5881 = vmatpush3.bf16.msra.mxu0 %v6518_v36 }
 0x31c   : > { %v5343_v57 = vpack.c.bf16 %v2553_v58, %v2552_v56  ;;  %v7523_v0 = vld [vmem:[#allocation5 + $0x30] sm:$0xff]  ;;  %v2547_v3 = vld [vmem:[#allocation2 + $0x20] sm:$0xff]  ;;  %5882 = vmatprep.subr.bf16.mxu0 %v6520_v38 }
 0x31d   : > { %v2759_v60 = vpack.c.bf16 %v2533_v55, %v2532_v45  ;;  %2540 = vst [vmem:[#allocation2 + $0x29] sm:$0xff] %v2533_v55  ;;  %v2534_v1 = vmax.f32 %v7523_v0, 0.0  ;;  %v6528_v45 = vld [vmem:[%s8210_s3 + $0xa8] sm:$0xff]  }
 0x31e   : > { %6228 = vmatmul.mubr.msk.bf16.vlgmr.msra.gmra.mrb[84].mxu1 %vm7518_vm13, %v5343_v57 }
 0x31f   : > { %3011 = vmatprep.mubr.bf16.mxu0 %v2759_v60  ;;  %2541 = vst [vmem:[#allocation2 + $0x31] sm:$0xff] %v2534_v1  ;;  %v2762_v11 = vpack.c.bf16 %v2534_v1, %v2534_v1  ;;  %6236 = vmatpush3.bf16.msra.mxu1 %v6513_v25 }
 0x320   : > { %6237 = vmatprep.subr.bf16.mxu1 %v6516_v6  ;;  %5883 = vmatpush3.bf16.msra.mxu0 %v6521_v39 }
 0x321   : > { %5884 = vmatprep.subr.bf16.mxu0 %v6523_v14 }
 0x323   : > { %6238 = vmatpush3.bf16.msra.mxu1 %v6516_v6 }
 0x324   : > { %v2548_v48 = vld [vmem:[#allocation2 + $0x28] sm:$0xff]  ;;  %6239 = vmatprep.subr.bf16.mxu1 %v6519_v37  ;;  %5885 = vmatpush3.bf16.msra.mxu0 %v6524_v41 }
 0x325   : > { %v5328_v10 = vpack.c.bf16 %v2548_v48, %v2547_v3  ;;  %v2554_v13 = vld [vmem:[#allocation2 + $0x22] sm:$0xff]  ;;  %5886 = vmatprep.subr.bf16.mxu0 %v6526_v4 }
 0x326   : > { %v2555_v15 = vld [vmem:[#allocation2 + $0x2a] sm:$0xff]  ;;  %v2556_v16 = vld [vmem:[#allocation2 + $0x32] sm:$0xff] }
 0x327   : > { %5329 = vmatmul.mubr.msk.bf16.gmra.mrb[92].mxu0 %vm7537_vm12, %v5328_v10  ;;  %v5348_v21 = vpack.c.bf16 %v2555_v15, %v2554_v13  ;;  %v5353_v8 = vpack.c.bf16 %v2556_v16, %v2556_v16  ;;  %3105 = vst [vmem:[#allocation2 + $0x39] sm:$0x1] %v6639_v2  ;;  %v2549_v30 = vld [vmem:[#allocation2 + $0x30] sm:$0xff]  ;;  %6240 = vmatpush3.bf16.msra.mxu1 %v6519_v37  ;;  %v7642_v10 = vld [vmem:[%s8211_s4] ss:$0 sm:$0xff] }
 0x328   : > { %3019 = vmatprep.mubr.bf16.mxu0 %v2762_v11  ;;  %v5333_v31 = vpack.c.bf16 %v2549_v30, %v2549_v30  ;;  %6241 = vmatprep.subr.bf16.mxu1 %v6522_v40 }
 0x329   : > { %6231 = vmatprep.mubr.msk.bf16.mxu1 %vm7545_vm14, %v5348_v21  ;;  %5887 = vmatpush3.bf16.msra.mxu0 %v6527_v44 }
 0x32a   : > { %6232 = vmatmul.mubr.msk.bf16.gmra.mrb[88].mxu1 %vm7551_vm6, %v5353_v8 }
 0x32b   : > { %6242 = vmatpush3.bf16.msra.mxu1 %v6522_v40 }
 0x32c   : > { %6243 = vmatprep.subr.bf16.mxu1 %v6525_v42 }
 0x32f   : > { %5334 = vmatmul.mubr.msk.bf16.gmra.mrb[96].mxu0 %vm7561_vm1, %v5333_v31  ;;  %6244 = vmatpush3.bf16.msra.mxu1 %v6525_v42 }
 0x330   : > { %6245 = vmatprep.subr.bf16.mxu1 %v6528_v45 }
 0x333   : > { %6246 = vmatpush3.bf16.msra.mxu1 %v6528_v45 }
 0x334   : > { %6247 = vmatprep.subr.bf16.mxu1 %v6529_v46 }
 0x337   : > { %6248 = vmatpush3.bf16.msra.mxu1 %v6529_v46 }
 0x338   : > { %6249 = vmatprep.subr.bf16.mxu1 %v6530_v49 }
 0x33b   : > { %6250 = vmatpush3.bf16.msra.mxu1 %v6530_v49 }
 0x33c   : > { %6259 = vmatprep.subr.bf16.mxu1 %v6535_v20 }
 0x3dc   : > { %v5836_v47 = vpop.f32.mrb[84].mxu0 }
 0x3dd   : > { %v5837_v54 = vpop.f32.mrb[85].mxu0 }
 0x3de   : > { %v5838_v55 = vadd.f32 %v5837_v54, %v5836_v47  ;;  %v5839_v56 = vpop.f32.mrb[86].mxu0 }
 0x3df   : > { %v5840_v58 = vpop.f32.mrb[87].mxu0 }
 0x3e0   : > { %v5841_v60 = vadd.f32 %v5840_v58, %v5839_v56  ;;  %v2998_v15 = vadd.f32 %v5838_v55, %v7642_v10 }
 0x3e2   : > { %v3001_v29 = vadd.f32 %v5841_v60, %v7642_v10 }
 0x3e9   : > { %v5842_v57 = vpop.f32.mrb[88].mxu0 }
 0x3ea   : > { %v5843_v61 = vpop.f32.mrb[89].mxu0 }
 0x3eb   : > { %v5844_v1 = vadd.f32 %v5843_v61, %v5842_v57  ;;  %v5845_v52 = vpop.f32.mrb[90].mxu0 }
 0x3ec   : > { %v5846_v3 = vpop.f32.mrb[91].mxu0 }
 0x3ed   : > { %v5847_v48 = vadd.f32 %v5846_v3, %v5845_v52  ;;  %v3006_v11 = vadd.f32 %v5844_v1, %v7642_v10 }
 0x3ef   : > { %v3009_v8 = vadd.f32 %v5847_v48, %v7642_v10 }
 0x3f1   : > { %v6229_v13 = vpop.f32.mrb[84].mxu1 }
 0x3f2   : > { %v3070_v16 = vadd.f32 %v6229_v13, %v3006_v11  ;;  %v3061_v21 = vpop.f32.mrb[85].mxu1 }
 0x3f3   : > { %v3062_v30 = vadd.f32 %v3061_v21, %v2998_v15  ;;  %v6230_v31 = vpop.f32.mrb[86].mxu1 }
 0x3f4   : > { %v3093_v7 = vmax.f32 %v3070_v16, 0.0  ;;  %v3073_v59 = vadd.f32 %v6230_v31, %v3009_v8  ;;  %v3064_v19 = vpop.f32.mrb[87].mxu1 }
 0x3f5   : > { %v3091_v9 = vmax.f32 %v3062_v30, 0.0  ;;  %v3065_v50 = vadd.f32 %v3064_v19, %v3001_v29 }
 0x3f6   : > { %3100 = vst [vmem:[#allocation2 + $0x11] sm:$0xff] %v3093_v7  ;;  %v3094_v25 = vmax.f32 %v3073_v59, 0.0 }
 0x3f7   : > { %3098 = vst [vmem:[#allocation2 + $0x1] sm:$0xff] %v3091_v9  ;;  %v3092_v32 = vmax.f32 %v3065_v50, 0.0 }
 0x3f8   : > { %v3138_v34 = vpack.c.bf16 %v3094_v25, %v3093_v7  ;;  %3101 = vst [vmem:[#allocation2 + $0x19] sm:$0xff] %v3094_v25 }
 0x3f9   : > { %v3135_v6 = vpack.c.bf16 %v3092_v32, %v3091_v9  ;;  %3099 = vst [vmem:[#allocation2 + $0x9] sm:$0xff] %v3092_v32 }
 0x3fa   : > { %v5848_v12 = vpop.f32.mrb[92].mxu0 }
 0x3fb   : > { %v5849_v36 = vpop.f32.mrb[93].mxu0  ;;  %3377 = vmatprep.mubr.bf16.mxu0 %v3135_v6 }
 0x3fc   : > { %v5850_v37 = vadd.f32 %v5849_v36, %v5848_v12  ;;  %v5851_v38 = vpop.f32.mrb[94].mxu0  ;;  %v6531_v12 = vld [vmem:[%s8210_s3 + $0x40] sm:$0xff]   ;;  %v6536_v36 = vld [vmem:[%s8210_s3 + $0x50] sm:$0xff]  }
 0x3fd   : > { %v5852_v39 = vpop.f32.mrb[95].mxu0  ;;  %v6233_v14 = vpop.f32.mrb[88].mxu1  ;;  %5924 = vmatprep.subr.bf16.mxu0 %v6531_v12 }
 0x3fe   : > { %v5853_v40 = vadd.f32 %v5852_v39, %v5851_v38  ;;  %v3014_v41 = vadd.f32 %v5850_v37, %v7642_v10  ;;  %v3077_v42 = vpop.f32.mrb[89].mxu1  ;;  %v3106_v46 = vld [vmem:[#allocation2] sm:$0xff]  ;;  %v6537_v37 = vld [vmem:[%s8210_s3 + $0x10] sm:$0xff]   ;;  %v6538_v38 = vld [vmem:[%s8210_s3 + $0x88] sm:$0xff]  }
 0x3ff   : > { %v6234_v44 = vpop.f32.mrb[90].mxu1  ;;  %v3109_v49 = vld [vmem:[#allocation2 + $0x18] sm:$0xff] }
 0x400   : > { %v3078_v4 = vadd.f32 %v3077_v42, %v3014_v41  ;;  %v3017_v45 = vadd.f32 %v5853_v40, %v7642_v10  ;;  %v3115_v47 = vld [vmem:[#allocation2 + $0x12] sm:$0xff]  ;;  %v3080_v54 = vpop.f32.mrb[91].mxu1  ;;  %v3107_v55 = vld [vmem:[#allocation2 + $0x8] sm:$0xff]  ;;  %v6542_v41 = vld [vmem:[%s8210_s3 + $0x60] sm:$0xff]  }
 0x401   : > { %v3113_v56 = vld [vmem:[#allocation2 + $0x2] sm:$0xff]  ;;  %v3114_v58 = vld [vmem:[#allocation2 + $0xa] sm:$0xff]  ;;  %3556 = vst [vmem:[#allocation2 + $0x19] sm:$0x1] %v6639_v2  ;;  %v5383_v1 = vpack.c.bf16 %v3107_v55, %v3106_v46  ;;  %v6539_v39 = vld [vmem:[%s8210_s3 + $0x58] sm:$0xff]  }
 0x402   : > { %v3095_v60 = vmax.f32 %v3078_v4, 0.0  ;;  %v3081_v57 = vadd.f32 %v3080_v54, %v3017_v45  ;;  %v5854_v61 = vpop.f32.mrb[96].mxu0  ;;  %v5403_v52 = vpack.c.bf16 %v3114_v58, %v3113_v56  ;;  %v3108_v8 = vld [vmem:[#allocation2 + $0x10] sm:$0xff]  ;;  %v6540_v40 = vld [vmem:[%s8210_s3 + $0x18] sm:$0xff]   ;;  %v6543_v42 = vld [vmem:[%s8210_s3 + $0x20] sm:$0xff]  }
 0x403   : > { %v5855_v3 = vpop.f32.mrb[97].mxu0  ;;  %5384 = vmatmul.mubr.msk.bf16.vlgmr.msra.gmra.mrb[100].mxu0 %vm7468_vm15, %v5383_v1  ;;  %v5388_v29 = vpack.c.bf16 %v3109_v49, %v3108_v8  ;;  %v6544_v4 = vld [vmem:[%s8210_s3 + $0x98] sm:$0xff]   ;;  %v6545_v44 = vld [vmem:[%s8210_s3 + $0x68] sm:$0xff]   ;;  %v6547_v46 = vld [vmem:[%s8210_s3 + $0xa0] sm:$0xff]   ;;  %vm3608_vm15 = vcmp.eq.s32.totalorder %v7029_v17, 2 }
 0x404   : > { %3102 = vst [vmem:[#allocation2 + $0x21] sm:$0xff] %v3095_v60  ;;  %v3096_v48 = vmax.f32 %v3081_v57, 0.0  ;;  %v5856_v11 = vadd.f32 %v5855_v3, %v5854_v61  ;;  %v5857_v13 = vpop.f32.mrb[98].mxu0  ;;  %6251 = vmatprep.mubr.msk.bf16.mxu1 %vm7486_vm2, %v5403_v52  ;;  %3385 = vmatprep.mubr.bf16.mxu0 %v3138_v34  ;;  %v6546_v45 = vld [vmem:[%s8210_s3 + $0x28] sm:$0xff]   ;;  %v6548_v49 = vld [vmem:[%s8210_s3 + $0x70] sm:$0xff]   ;;  %v6551_v55 = vld [vmem:[%s8210_s3 + $0x78] sm:$0xff]  }
 0x405   : > { %v5858_v15 = vpop.f32.mrb[99].mxu0  ;;  %5925 = vmatpush3.bf16.msra.mxu0 %v6532_v63  ;;  %v6550_v54 = vld [vmem:[%s8210_s3 + $0xa8] sm:$0xff]   ;;  %v6552_v56 = vld [vmem:[%s8210_s3 + $0x38] sm:$0xff]   ;;  %v6553_v58 = vld [vmem:[%s8210_s3 + $0xb0] sm:$0xff]   ;;  %vm8291_vm2 = vcmp.eq.s32.totalorder %v7029_v17, 0 }
 0x406   : > { %v3141_v16 = vpack.c.bf16 %v3096_v48, %v3095_v60  ;;  %3103 = vst [vmem:[#allocation2 + $0x29] sm:$0xff] %v3096_v48  ;;  %v3022_v21 = vadd.f32 %v5856_v11, %v7642_v10  ;;  %5926 = vmatprep.subr.bf16.mxu0 %v6533_v33  ;;  %v6554_v60 = vld [vmem:[%s8210_s3 + $0xb8] sm:$0xff]   ;;  %v6555_v57 = vld [vmem:[%s8210_s3 + $0x40] sm:$0xff]  }
 0x407   : > { %v7751_v61 = vld [vmem:[%s8210_s3 + $0x80] sm:$0xff]  }
 0x408   : > { %v3086_v30 = vadd.f32 %v6233_v14, %v3022_v21  ;;  %v6541_v14 = vld [vmem:[%s8210_s3 + $0x90] sm:$0xff]   ;;  %v6604_v1 = vld [vmem:[%s8210_s3] sm:$0xff]  }
 0x409   : > { %5927 = vmatpush3.bf16.msra.mxu0 %v6534_v27 }
 0x40a   : > { %v3097_v31 = vmax.f32 %v3086_v30, 0.0  ;;  %5928 = vmatprep.subr.bf16.mxu0 %v6536_v36 }
 0x40b   : > { %v3116_v7 = vld [vmem:[#allocation2 + $0x1a] sm:$0xff]  ;;  %5389 = vmatmul.mubr.msk.bf16.gmra.mrb[104].mxu0 %vm7504_vm11, %v5388_v29  ;;  %vm4350_vm11 = vmor %vm8291_vm2, %vm4349_vm8  ;;  %vm3585_vm2 = vcmp.eq.s32.totalorder %v7034_v26, 15 }
 0x40c   : > { %3104 = vst [vmem:[#allocation2 + $0x31] sm:$0xff] %v3097_v31  ;;  %v5408_v51 = vpack.c.bf16 %v3116_v7, %v3115_v47  ;;  %3393 = vmatprep.mubr.bf16.mxu0 %v3141_v16  ;;  %v3110_v59 = vld [vmem:[#allocation2 + $0x20] sm:$0xff]  ;;  %v3144_v9 = vpack.c.bf16 %v3097_v31, %v3097_v31  ;;  %v6549_v47 = vld [vmem:[%s8210_s3 + $0x30] sm:$0xff]   ;;  %vm4351_vm4 = vmor %vm4350_vm11, %vm3608_vm15  ;;  %vm8294_vm11 = vcmp.eq.s32.totalorder %v7029_v17, 0 }
 0x40d   : > { %v3111_v35 = vld [vmem:[#allocation2 + $0x28] sm:$0xff]  ;;  %5929 = vmatpush3.bf16.msra.mxu0 %v6537_v37  ;;  %vm4352_vm9 = vmor %vm4351_vm4, %vm3563_vm10 }
 0x40e   : > { %6252 = vmatmul.mubr.msk.bf16.vlgmr.msra.gmra.mrb[92].mxu1 %vm7518_vm13, %v5408_v51  ;;  %v5393_v19 = vpack.c.bf16 %v3111_v35, %v3110_v59  ;;  %v3117_v50 = vld [vmem:[#allocation2 + $0x22] sm:$0xff]  ;;  %5930 = vmatprep.subr.bf16.mxu0 %v6539_v39  ;;  %vm4353_vm13 = vcmp.eq.s32.totalorder %v7029_v17, 4 }
 0x40f   : > { %6260 = vmatpush3.bf16.msra.mxu1 %v6535_v20 }
 0x410   : > { %6261 = vmatprep.subr.bf16.mxu1 %v6538_v38 }
 0x411   : > { %5931 = vmatpush3.bf16.msra.mxu0 %v6540_v40 }
 0x412   : > { %5932 = vmatprep.subr.bf16.mxu0 %v6542_v41 }
 0x413   : > { %v3118_v25 = vld [vmem:[#allocation2 + $0x2a] sm:$0xff]  ;;  %v3119_v32 = vld [vmem:[#allocation2 + $0x32] sm:$0xff]  ;;  %5394 = vmatmul.mubr.msk.bf16.gmra.mrb[108].mxu0 %vm7537_vm12, %v5393_v19  ;;  %6262 = vmatpush3.bf16.msra.mxu1 %v6538_v38  ;;  %vm3611_vm12 = vcmp.eq.s32.totalorder %v7029_v17, 5 }
 0x414   : > { %v5413_v34 = vpack.c.bf16 %v3118_v25, %v3117_v50  ;;  %v5418_v6 = vpack.c.bf16 %v3119_v32, %v3119_v32  ;;  %3401 = vmatprep.mubr.bf16.mxu0 %v3144_v9  ;;  %v3112_v53 = vld [vmem:[#allocation2 + $0x30] sm:$0xff]  ;;  %6263 = vmatprep.subr.bf16.mxu1 %v6541_v14 }
 0x415   : > { %v5398_v22 = vpack.c.bf16 %v3112_v53, %v3112_v53  ;;  %5933 = vmatpush3.bf16.msra.mxu0 %v6543_v42 }
 0x416   : > { %6255 = vmatprep.mubr.msk.bf16.mxu1 %vm7545_vm14, %v5413_v34  ;;  %5934 = vmatprep.subr.bf16.mxu0 %v6545_v44  ;;  %vm4354_vm14 = vmor %vm4352_vm9, %vm4353_vm13 }
 0x417   : > { %6256 = vmatmul.mubr.msk.bf16.gmra.mrb[96].mxu1 %vm7551_vm6, %v5418_v6  ;;  %vm7762_vm6 = vmor %vm4354_vm14, %vm3611_vm12  ;;  %vm3618_vm14 = vcmp.eq.s32.totalorder %v7034_v26, 8 }
 0x418   : > { %6264 = vmatpush3.bf16.msra.mxu1 %v6541_v14  ;;  %vm3566_vm13 = vmor %vm8294_vm11, %vm3563_vm10  ;;  %vm3624_vm10 = vcmp.eq.s32.totalorder %v7034_v26, 11 }
 0x419   : > { %6265 = vmatprep.subr.bf16.mxu1 %v6544_v4  ;;  %5935 = vmatpush3.bf16.msra.mxu0 %v6546_v45  ;;  %vm3569_vm9 = vmor %vm3566_vm13, %vm8229_vm5  ;;  %vm8301_vm5 = vcmp.eq.s32.totalorder %v7034_v26, 14 }
 0x41a   : > { %5936 = vmatprep.subr.bf16.mxu0 %v6548_v49 }
 0x41b   : > { %5399 = vmatmul.mubr.msk.bf16.gmra.mrb[112].mxu0 %vm7561_vm1, %v5398_v22  ;;  %vm3579_vm1 = vcmp.eq.s32.totalorder %v7034_v26, 12 }
 0x41c   : > { %6266 = vmatpush3.bf16.msra.mxu1 %v6544_v4  ;;  %vm3582_vm8 = vmor %vm3573_vm0, %vm3579_vm1  ;;  %vm3634_vm0 = vcmp.eq.s32.totalorder %v7475_v28, 17 }
 0x41d   : > { %6267 = vmatprep.subr.bf16.mxu1 %v6547_v46  ;;  %5937 = vmatpush3.bf16.msra.mxu0 %v6549_v47  ;;  %vm7792_vm4 = vmor %vm3582_vm8, %vm3585_vm2 }
 0x41e   : > { %5938 = vmatprep.subr.bf16.mxu0 %v6551_v55  ;;  %vm5445_vm1 = vmneg %vm7792_vm4  ;;  %vm3592_vm4 = vcmp.eq.s32.totalorder %v7475_v28, 18 }
 0x41f   : > { %vm5446_vm8 = vmneg %vm3569_vm9  ;;  %vm3643_vm9 = vcmp.eq.s32.totalorder %v7475_v28, 23 }
 0x420   : > { %6268 = vmatpush3.bf16.msra.mxu1 %v6547_v46  ;;  %vm3627_vm2 = vmor %vm3618_vm14, %vm3624_vm10 }
 0x421   : > { %6269 = vmatprep.subr.bf16.mxu1 %v6550_v54  ;;  %5939 = vmatpush3.bf16.msra.mxu0 %v6552_v56  ;;  %vm7806_vm11 = vmor %vm3634_vm0, %vm2670_vm7 }
 0x422   : > { %5962 = vmatprep.subr.bf16.mxu0 %v6555_v57  ;;  %vm7810_vm13 = vmpackc.low %vm5445_vm1, %vm5446_vm8 }
 0x423   : > { %vm7816_vm3 = vmor %vm3627_vm2, %vm8301_vm5 }
 0x424   : > { %6270 = vmatpush3.bf16.msra.mxu1 %v6550_v54  ;;  %vm7826_vm7 = vmor %vm3608_vm15, %vm3611_vm12  ;;  %vm8306_vm15 = vcmp.eq.s32.totalorder %v7475_v28, 21  ;;  %v6580_v28 = vld [vmem:[%s8210_s3] sm:$0xff]  }
 0x425   : > { %6271 = vmatprep.subr.bf16.mxu1 %v6553_v58  ;;  %vm5455_vm5 = vmneg %vm7816_vm3 }
 0x426   : > { %vm3598_vm12 = vmor %vm3592_vm4, %vm8306_vm15  ;;  %vm8317_vm4 = vcmp.eq.s32.totalorder %v7029_v17, 7 }
 0x427   : > { %vm5456_vm14 = vmneg %vm7826_vm7 }
 0x428   : > { %6272 = vmatpush3.bf16.msra.mxu1 %v6553_v58  ;;  %vm7849_vm3 = vmor %vm7806_vm11, %vm3643_vm9  ;;  %vm8315_vm11 = vmmov 0  }
 0x429   : > { %6273 = vmatprep.subr.bf16.mxu1 %v6554_v60  ;;  %vm5450_vm10 = vmneg %vm3598_vm12  ;;  %vm5036_vm12 = vcmask 15360  }
 0x42a   : > { %vm7856_vm0 = vmpackc.low %vm5455_vm5, %vm5456_vm14 }
 0x42b   : > { %vm5460_vm1 = vmneg %vm7849_vm3 }
 0x42c   : > { %6274 = vmatpush3.bf16.msra.mxu1 %v6554_v60  ;;  %vm7862_vm8 = vmpackc.low %vm5450_vm10, %vm5450_vm10 }
 0x42d   : > { %6279 = vmatprep.subr.bf16.mxu1 %v7751_v61  ;;  %vm7866_vm2 = vmpackc.low %vm5460_vm1, %vm5460_vm1 }
 0x4d6   : > { %v5888_v52 = vpop.f32.mrb[100].mxu0 }
 0x4d7   : > { %v5889_v3 = vpop.f32.mrb[101].mxu0 }
 0x4d8   : > { %v5890_v48 = vadd.f32 %v5889_v3, %v5888_v52  ;;  %v5891_v11 = vpop.f32.mrb[102].mxu0 }
 0x4d9   : > { %v5892_v13 = vpop.f32.mrb[103].mxu0 }
 0x4da   : > { %v5893_v15 = vadd.f32 %v5892_v13, %v5891_v11  ;;  %v3380_v29 = vadd.f32 %v5890_v48, %v7642_v10 }
 0x4dc   : > { %v3383_v50 = vadd.f32 %v5893_v15, %v7642_v10 }
 0x4de   : > { %v5894_v16 = vpop.f32.mrb[104].mxu0 }
 0x4df   : > { %v5895_v21 = vpop.f32.mrb[105].mxu0 }
 0x4e0   : > { %v5896_v8 = vadd.f32 %v5895_v21, %v5894_v16  ;;  %v5897_v30 = vpop.f32.mrb[106].mxu0 }
 0x4e1   : > { %v6253_v31 = vpop.f32.mrb[92].mxu1  ;;  %v5898_v7 = vpop.f32.mrb[107].mxu0 }
 0x4e2   : > { %v3443_v51 = vpop.f32.mrb[93].mxu1  ;;  %v3388_v35 = vadd.f32 %v5896_v8, %v7642_v10  ;;  %v5899_v59 = vadd.f32 %v5898_v7, %v5897_v30 }
 0x4e3   : > { %v3444_v19 = vadd.f32 %v3443_v51, %v3380_v29  ;;  %v6254_v9 = vpop.f32.mrb[94].mxu1 }
 0x4e4   : > { %v3446_v25 = vpop.f32.mrb[95].mxu1  ;;  %v3452_v32 = vadd.f32 %v6253_v31, %v3388_v35  ;;  %v3391_v6 = vadd.f32 %v5899_v59, %v7642_v10 }
 0x4e5   : > { %v3473_v34 = vadd.f32 %v3444_v19, %v7437_v24  ;;  %v3447_v53 = vadd.f32 %v3446_v25, %v3383_v50 }
 0x4e6   : > { %v3475_v22 = vadd.f32 %v3452_v32, %v7462_v5  ;;  %v3455_v12 = vadd.f32 %v6254_v9, %v3391_v6  ;;  %v5900_v33 = vpop.f32.mrb[108].mxu0 }
 0x4e7   : > { %3480 = vst [vmem:[#allocation4] sm:$0xff] %v3473_v34  ;;  %v3474_v63 = vadd.f32 %v3447_v53, %v7444_v23  ;;  %v5901_v27 = vpop.f32.mrb[109].mxu0 }
 0x4e8   : > { %3482 = vst [vmem:[#allocation4 + $0x10] sm:$0xff] %v3475_v22  ;;  %v3476_v20 = vadd.f32 %v3455_v12, %v7479_v18  ;;  %v5902_v36 = vadd.f32 %v5901_v27, %v5900_v33  ;;  %v5903_v37 = vpop.f32.mrb[110].mxu0 }
 0x4e9   : > { %3481 = vst [vmem:[#allocation4 + $0x8] sm:$0xff] %v3474_v63  ;;  %v5904_v38 = vpop.f32.mrb[111].mxu0 }
 0x4ea   : > { %v6257_v39 = vpop.f32.mrb[96].mxu1  ;;  %3483 = vst [vmem:[#allocation4 + $0x18] sm:$0xff] %v3476_v20  ;;  %v5905_v24 = vadd.f32 %v5904_v38, %v5903_v37  ;;  %v3396_v40 = vadd.f32 %v5902_v36, %v7642_v10 }
 0x4eb   : > { %v3459_v14 = vpop.f32.mrb[97].mxu1 }
 0x4ec   : > { %v6258_v5 = vpop.f32.mrb[98].mxu1  ;;  %v3460_v41 = vadd.f32 %v3459_v14, %v3396_v40  ;;  %v3399_v42 = vadd.f32 %v5905_v24, %v7642_v10 }
 0x4ed   : > { %v3462_v23 = vpop.f32.mrb[99].mxu1 }
 0x4ee   : > { %v3487_v4 = vld [vmem:[#allocation4] ss:$2 sm:$0x7]  ;;  %v3488_v44 = vld [vmem:[#allocation4 + $0x1] ss:$2 sm:$0x7]  ;;  %v3477_v18 = vadd.f32 %v3460_v41, %v7497_v43  ;;  %v3463_v46 = vadd.f32 %v3462_v23, %v3399_v42 }
 0x4ef   : > { %v3490_v45 = vmax.f32 %v3487_v4, %v3488_v44  ;;  %v5906_v49 = vpop.f32.mrb[112].mxu0  ;;  %v3489_v47 = vld [vmem:[#allocation4 + $0x2] ss:$2 sm:$0x7]  ;;  %v6579_v44 = vld [vmem:[%s8210_s3 + $0x40] sm:$0xff]  }
 0x4f0   : > { %v3494_v54 = vld [vmem:[#allocation4 + $0x7] ss:$2 sm:$0x7]  ;;  %v3496_v56 = vld [vmem:[#allocation4 + $0x8] ss:$2 sm:$0x7]  ;;  %v3478_v60 = vadd.f32 %v3463_v46, %v7513_v62 }
 0x4f1   : > { %v3491_v55 = vmax.f32 %v3490_v45, %v3489_v47  ;;  %v3498_v58 = vld [vmem:[#allocation4 + $0x9] ss:$2 sm:$0x7]  ;;  %3484 = vst [vmem:[#allocation4 + $0x20] sm:$0xff] %v3477_v18  ;;  %v3499_v57 = vmax.f32 %v3494_v54, %v3496_v56  ;;  %v5907_v52 = vpop.f32.mrb[113].mxu0  ;;  %v6556_v54 = vld [vmem:[%s8210_s3] sm:$0xff]  }
 0x4f2   : > { %v3502_v3 = vld [vmem:[#allocation4 + $0xe] ss:$2 sm:$0x7]  ;;  %3485 = vst [vmem:[#allocation4 + $0x28] sm:$0xff] %v3478_v60  ;;  %v5908_v48 = vadd.f32 %v5907_v52, %v5906_v49  ;;  %v5909_v11 = vpop.f32.mrb[114].mxu0  ;;  %v6557_v56 = vld [vmem:[%s8210_s3 + $0x48] sm:$0xff]  }
 0x4f3   : > { %3492 = vst [vmem:[#allocation5] sm:$0x7] %v3491_v55  ;;  %v3503_v13 = vld [vmem:[#allocation4 + $0xf] ss:$2 sm:$0x7]  ;;  %v3500_v15 = vmax.f32 %v3499_v57, %v3498_v58  ;;  %v5910_v43 = vpop.f32.mrb[115].mxu0 }
 0x4f4   : > { %v3505_v16 = vmax.f32 %v3502_v3, %v3503_v13  ;;  %v3509_v21 = vld [vmem:[#allocation4 + $0x15] ss:$2 sm:$0x7]  ;;  %v3504_v8 = vld [vmem:[#allocation4 + $0x10] ss:$2 sm:$0x7]  ;;  %v3404_v30 = vadd.f32 %v5908_v48, %v7642_v10 }
 0x4f5   : > { %v3511_v31 = vld [vmem:[#allocation4 + $0x16] ss:$2 sm:$0x7]  ;;  %3501 = vst [vmem:[#allocation5 + $0x3] sm:$0x7] %v3500_v15  ;;  %v6559_v57 = vld [vmem:[%s8210_s3 + $0x8] sm:$0xff]  }
 0x4f6   : > { %v3506_v29 = vmax.f32 %v3505_v16, %v3504_v8  ;;  %v3514_v7 = vmax.f32 %v3509_v21, %v3511_v31  ;;  %v3468_v62 = vadd.f32 %v6257_v39, %v3404_v30  ;;  %v3513_v51 = vld [vmem:[#allocation4 + $0x17] ss:$2 sm:$0x7]  ;;  %v6560_v8 = vld [vmem:[%s8210_s3 + $0x50] sm:$0xff]   ;;  %v6561_v30 = vld [vmem:[%s8210_s3 + $0x88] sm:$0xff]  }
 0x4f7   : > { %v6562_v31 = vld [vmem:[%s8210_s3 + $0x10] sm:$0xff]   ;;  %v6581_v43 = vld [vmem:[%s8210_s3 + $0x80] sm:$0xff]   ;;  %v6583_v3 = vld [vmem:[%s8210_s3 + $0x8] sm:$0xff]  }
 0x4f8   : > { %v3517_v35 = vld [vmem:[#allocation4 + $0x1c] ss:$2 sm:$0x7]  ;;  %v3518_v59 = vld [vmem:[#allocation4 + $0x1d] ss:$2 sm:$0x7]  ;;  %v3515_v19 = vmax.f32 %v3514_v7, %v3513_v51  ;;  %v3479_v25 = vadd.f32 %v3468_v62, %v7523_v0 }
 0x4f9   : > { %3507 = vst [vmem:[#allocation5 + $0x6] sm:$0x7] %v3506_v29  ;;  %v3519_v9 = vld [vmem:[#allocation4 + $0x1e] ss:$2 sm:$0x7]  ;;  %v3520_v50 = vmax.f32 %v3517_v35, %v3518_v59  ;;  %v6563_v29 = vld [vmem:[%s8210_s3 + $0x58] sm:$0xff]  }
 0x4fa   : > { %v3524_v32 = vld [vmem:[#allocation4 + $0x23] ss:$2 sm:$0x7]  ;;  %3516 = vst [vmem:[#allocation5 + $0x9] sm:$0x7] %v3515_v19  ;;  %3486 = vst [vmem:[#allocation4 + $0x30] sm:$0xff] %v3479_v25 }
 0x4fb   : > { %v3526_v34 = vld [vmem:[#allocation4 + $0x24] ss:$2 sm:$0x7]  ;;  %v3521_v6 = vmax.f32 %v3520_v50, %v3519_v9  ;;  %v3528_v22 = vld [vmem:[#allocation4 + $0x25] ss:$2 sm:$0x7] }
 0x4fc   : > { %v3529_v53 = vmax.f32 %v3524_v32, %v3526_v34  ;;  %v3532_v63 = vld [vmem:[#allocation4 + $0x2a] ss:$2 sm:$0x7]  ;;  %v3533_v33 = vld [vmem:[#allocation4 + $0x2b] ss:$2 sm:$0x7] }
 0x4fd   : > { %3522 = vst [vmem:[#allocation5 + $0xc] sm:$0x7] %v3521_v6  ;;  %v3535_v0 = vmax.f32 %v3532_v63, %v3533_v33  ;;  %v6565_v7 = vld [vmem:[%s8210_s3 + $0x18] sm:$0xff]   ;;  %v6566_v62 = vld [vmem:[%s8210_s3 + $0x60] sm:$0xff]   ;;  %v6569_v59 = vld [vmem:[%s8210_s3 + $0x68] sm:$0xff]  }
 0x4fe   : > { %v3530_v12 = vmax.f32 %v3529_v53, %v3528_v22  ;;  %v6567_v51 = vld [vmem:[%s8210_s3 + $0x98] sm:$0xff]   ;;  %v6568_v35 = vld [vmem:[%s8210_s3 + $0x20] sm:$0xff]   ;;  %v6571_v9 = vld [vmem:[%s8210_s3 + $0x28] sm:$0xff]  }
 0x4ff   : > { %v6570_v19 = vld [vmem:[%s8210_s3 + $0xa0] sm:$0xff]   ;;  %v6572_v50 = vld [vmem:[%s8210_s3 + $0x70] sm:$0xff]   ;;  %v6573_v25 = vld [vmem:[%s8210_s3 + $0xa8] sm:$0xff]  }
 0x500   : > { %3531 = vst [vmem:[#allocation5 + $0xf] sm:$0x7] %v3530_v12  ;;  %v7780_v27 = vld [vmem:[#allocation5] sm:$0xff]  ;;  %v6574_v32 = vld [vmem:[%s8210_s3 + $0x30] sm:$0xff]   ;;  %v6575_v34 = vld [vmem:[%s8210_s3 + $0x78] sm:$0xff]  }
 0x501   : > { %v3550_v20 = vmax.f32 %v7780_v27, 0.0  ;;  %v3534_v36 = vld [vmem:[#allocation4 + $0x2c] ss:$2 sm:$0x7] }
 0x502   : > { %v3539_v37 = vld [vmem:[#allocation4 + $0x31] ss:$2 sm:$0x7]  ;;  %v3536_v38 = vmax.f32 %v3535_v0, %v3534_v36  ;;  %v3541_v39 = vld [vmem:[#allocation4 + $0x32] ss:$2 sm:$0x7] }
 0x503   : > { %3553 = vst [vmem:[#allocation2 + $0x1] sm:$0xff] %v3550_v20  ;;  %v3544_v24 = vmax.f32 %v3539_v37, %v3541_v39  ;;  %v3543_v40 = vld [vmem:[#allocation4 + $0x33] ss:$2 sm:$0x7]  ;;  %v6576_v6 = vld [vmem:[%s8210_s3 + $0xb0] sm:$0xff]  }
 0x504   : > { %3537 = vst [vmem:[#allocation5 + $0x12] sm:$0x7] %v3536_v38  ;;  %v6577_v53 = vld [vmem:[%s8210_s3 + $0x38] sm:$0xff]  }
 0x505   : > { %v3545_v41 = vmax.f32 %v3544_v24, %v3543_v40  ;;  %v6578_v22 = vld [vmem:[%s8210_s3 + $0xb8] sm:$0xff]  }
 0x507   : > { %v7790_v14 = vld [vmem:[#allocation5 + $0x8] sm:$0xff]  ;;  %3546 = vst [vmem:[#allocation5 + $0x15] sm:$0x7] %v3545_v41 }
 0x508   : > { %v3551_v42 = vmax.f32 %v7790_v14, 0.0 }
 0x50a   : > { %v3657_v23 = vpack.c.bf16 %v3551_v42, %v3550_v20  ;;  %3554 = vst [vmem:[#allocation2 + $0x9] sm:$0xff] %v3551_v42  ;;  %v3557_v49 = vld [vmem:[#allocation2] sm:$0xff] }
 0x50c   : > { %3893 = vmatprep.mubr.bf16.mxu0 %v3657_v23 }
 0x50e   : > { %v7820_v18 = vld [vmem:[#allocation5 + $0x10] sm:$0xff] }
 0x50f   : > { %v3552_v26 = vmax.f32 %v7820_v18, 0.0 }
 0x511   : > { %v3558_v47 = vld [vmem:[#allocation2 + $0x8] sm:$0xff]  ;;  %v3660_v58 = vpack.c.bf16 %v3552_v26, %v3552_v26  ;;  %3555 = vst [vmem:[#allocation2 + $0x11] sm:$0xff] %v3552_v26 }
 0x512   : > { %v5448_v55 = vpack.c.bf16 %v3558_v47, %v3557_v49  ;;  %v3560_v52 = vld [vmem:[#allocation2 + $0x2] sm:$0xff] }
 0x514   : > { %5449 = vmatmul.mubr.msk.bf16.vlgmr.msra.gmra.mrb[116].mxu0 %vm7810_vm13, %v5448_v55 }
 0x515   : > { %3901 = vmatprep.mubr.bf16.mxu0 %v3660_v58  ;;  %5963 = vmatpush3.bf16.msra.mxu0 %v6556_v54 }
 0x516   : > { %5964 = vmatprep.subr.bf16.mxu0 %v6557_v56 }
 0x518   : > { %v3561_v48 = vld [vmem:[#allocation2 + $0xa] sm:$0xff]  ;;  %v3562_v11 = vld [vmem:[#allocation2 + $0x12] sm:$0xff] }
 0x519   : > { %5965 = vmatpush3.bf16.msra.mxu0 %v6559_v57  ;;  %v3559_v13 = vld [vmem:[#allocation2 + $0x10] sm:$0xff]  ;;  %v5458_v15 = vpack.c.bf16 %v3561_v48, %v3560_v52  ;;  %v5463_v16 = vpack.c.bf16 %v3562_v11, %v3562_v11  ;;  %3963 = vst [vmem:[#allocation2 + $0x19] sm:$0x1] %v6639_v2 }
 0x51a   : > { %v5453_v21 = vpack.c.bf16 %v3559_v13, %v3559_v13  ;;  %5966 = vmatprep.subr.bf16.mxu0 %v6560_v8 }
 0x51b   : > { %6275 = vmatprep.mubr.msk.bf16.mxu1 %vm7856_vm0, %v5458_v15 }
 0x51c   : > { %5454 = vmatmul.mubr.msk.bf16.gmra.mrb[120].mxu0 %vm7862_vm8, %v5453_v21  ;;  %6276 = vmatmul.mubr.msk.bf16.vlgmr.msra.gmra.mrb[100].mxu1 %vm7866_vm2, %v5463_v16 }
 0x51d   : > { %6280 = vmatpush3.bf16.msra.mxu1 %v7751_v61  ;;  %v6564_v61 = vld [vmem:[%s8210_s3 + $0x90] sm:$0xff]   ;;  %5967 = vmatpush3.bf16.msra.mxu0 %v6562_v31  ;;  %v6584_v31 = vld [vmem:[%s8210_s3 + $0x88] sm:$0xff]  }
 0x51e   : > { %6281 = vmatprep.subr.bf16.mxu1 %v6561_v30  ;;  %5968 = vmatprep.subr.bf16.mxu0 %v6563_v29  ;;  %v6585_v29 = vld [vmem:[%s8210_s3 + $0x50] sm:$0xff]  }
 0x521   : > { %6282 = vmatpush3.bf16.msra.mxu1 %v6561_v30  ;;  %5969 = vmatpush3.bf16.msra.mxu0 %v6565_v7  ;;  %v6582_v30 = vld [vmem:[%s8210_s3 + $0x48] sm:$0xff]   ;;  %v6587_v7 = vld [vmem:[%s8210_s3 + $0x90] sm:$0xff]  }
 0x522   : > { %6283 = vmatprep.subr.bf16.mxu1 %v6564_v61  ;;  %5970 = vmatprep.subr.bf16.mxu0 %v6566_v62  ;;  %v6588_v62 = vld [vmem:[%s8210_s3 + $0x58] sm:$0xff]  }
 0x525   : > { %6284 = vmatpush3.bf16.msra.mxu1 %v6564_v61  ;;  %5971 = vmatpush3.bf16.msra.mxu0 %v6568_v35  ;;  %v6586_v61 = vld [vmem:[%s8210_s3 + $0x10] sm:$0xff]   ;;  %v6590_v35 = vld [vmem:[%s8210_s3 + $0x98] sm:$0xff]  }
 0x526   : > { %6285 = vmatprep.subr.bf16.mxu1 %v6567_v51  ;;  %5972 = vmatprep.subr.bf16.mxu0 %v6569_v59  ;;  %v6591_v59 = vld [vmem:[%s8210_s3 + $0x60] sm:$0xff]  }
 0x529   : > { %6286 = vmatpush3.bf16.msra.mxu1 %v6567_v51  ;;  %5973 = vmatpush3.bf16.msra.mxu0 %v6571_v9  ;;  %v6589_v51 = vld [vmem:[%s8210_s3 + $0x18] sm:$0xff]   ;;  %v6593_v9 = vld [vmem:[%s8210_s3 + $0xa0] sm:$0xff]  }
 0x52a   : > { %6287 = vmatprep.subr.bf16.mxu1 %v6570_v19  ;;  %5974 = vmatprep.subr.bf16.mxu0 %v6572_v50  ;;  %v6594_v50 = vld [vmem:[%s8210_s3 + $0x68] sm:$0xff]  }
 0x52d   : > { %6288 = vmatpush3.bf16.msra.mxu1 %v6570_v19  ;;  %5975 = vmatpush3.bf16.msra.mxu0 %v6574_v32  ;;  %v6592_v19 = vld [vmem:[%s8210_s3 + $0x20] sm:$0xff]   ;;  %v6596_v32 = vld [vmem:[%s8210_s3 + $0xa8] sm:$0xff]  }
 0x52e   : > { %6289 = vmatprep.subr.bf16.mxu1 %v6573_v25  ;;  %5976 = vmatprep.subr.bf16.mxu0 %v6575_v34  ;;  %v6597_v34 = vld [vmem:[%s8210_s3 + $0x70] sm:$0xff]  }
 0x531   : > { %6290 = vmatpush3.bf16.msra.mxu1 %v6573_v25  ;;  %5977 = vmatpush3.bf16.msra.mxu0 %v6577_v53  ;;  %v6595_v25 = vld [vmem:[%s8210_s3 + $0x28] sm:$0xff]   ;;  %v6599_v53 = vld [vmem:[%s8210_s3 + $0xb0] sm:$0xff]  }
 0x532   : > { %6291 = vmatprep.subr.bf16.mxu1 %v6576_v6  ;;  %6000 = vmatprep.subr.bf16.mxu0 %v6579_v44 }
 0x535   : > { %6292 = vmatpush3.bf16.msra.mxu1 %v6576_v6  ;;  %v6598_v6 = vld [vmem:[%s8210_s3 + $0x30] sm:$0xff]  }
 0x536   : > { %6293 = vmatprep.subr.bf16.mxu1 %v6578_v22 }
 0x539   : > { %6294 = vmatpush3.bf16.msra.mxu1 %v6578_v22  ;;  %v6600_v22 = vld [vmem:[%s8210_s3 + $0x78] sm:$0xff]  }
 0x53a   : > { %6299 = vmatprep.subr.bf16.mxu1 %v6639_v2 }
 0x5e7   : > { %v5940_v12 = vpop.f32.mrb[116].mxu0 }
 0x5e8   : > { %v5941_v63 = vpop.f32.mrb[117].mxu0 }
 0x5e9   : > { %v5942_v33 = vadd.f32 %v5941_v63, %v5940_v12  ;;  %v5943_v20 = vpop.f32.mrb[118].mxu0  ;;  %v6601_v12 = vld [vmem:[%s8210_s3 + $0x38] sm:$0xff]  }
 0x5ea   : > { %v5944_v0 = vpop.f32.mrb[119].mxu0  ;;  %v6602_v63 = vld [vmem:[%s8210_s3 + $0xb8] sm:$0xff]  }
 0x5eb   : > { %v5945_v36 = vadd.f32 %v5944_v0, %v5943_v20  ;;  %v3896_v39 = vadd.f32 %v5942_v33, %v7642_v10  ;;  %v6603_v33 = vld [vmem:[%s8210_s3 + $0x40] sm:$0xff]  }
 0x5ed   : > { %v3899_v4 = vadd.f32 %v5945_v36, %v7642_v10  ;;  %v8036_v36 = vld [vmem:[%s8211_s4] ss:$0 sm:$0xff] }
 0x5ef   : > { %v5946_v37 = vpop.f32.mrb[120].mxu0  ;;  %v6277_v38 = vpop.f32.mrb[100].mxu1 }
 0x5f0   : > { %v5947_v24 = vpop.f32.mrb[121].mxu0  ;;  %v3943_v40 = vpop.f32.mrb[101].mxu1 }
 0x5f1   : > { %v5948_v5 = vadd.f32 %v5947_v24, %v5946_v37  ;;  %v5949_v41 = vpop.f32.mrb[122].mxu0  ;;  %v3944_v42 = vadd.f32 %v3943_v40, %v3896_v39  ;;  %v6278_v23 = vpop.f32.mrb[102].mxu1 }
 0x5f2   : > { %v5950_v45 = vpop.f32.mrb[123].mxu0  ;;  %v3946_v49 = vpop.f32.mrb[103].mxu1 }
 0x5f3   : > { %v3904_v46 = vadd.f32 %v5948_v5, %v7642_v10  ;;  %v3957_v47 = vmax.f32 %v3944_v42, 0.0  ;;  %v3947_v26 = vadd.f32 %v3946_v49, %v3899_v4 }
 0x5f5   : > { %v3952_v54 = vadd.f32 %v6277_v38, %v3904_v46  ;;  %3960 = vst [vmem:[#allocation2 + $0x1] sm:$0xff] %v3957_v47  ;;  %v3958_v55 = vmax.f32 %v3947_v26, 0.0 }
 0x5f7   : > { %v3959_v56 = vmax.f32 %v3952_v54, 0.0  ;;  %v3977_v58 = vpack.c.bf16 %v3958_v55, %v3957_v47  ;;  %3961 = vst [vmem:[#allocation2 + $0x9] sm:$0xff] %v3958_v55 }
 0x5f9   : > { %3962 = vst [vmem:[#allocation2 + $0x11] sm:$0xff] %v3959_v56  ;;  %4213 = vmatprep.mubr.bf16.mxu0 %v3977_v58  ;;  %v3980_v10 = vpack.c.bf16 %v3959_v56, %v3959_v56 }
 0x5fc   : > { %v3964_v60 = vld [vmem:[#allocation2] sm:$0xff] }
 0x5fe   : > { %v3965_v57 = vld [vmem:[#allocation2 + $0x8] sm:$0xff] }
 0x5ff   : > { %v3967_v52 = vld [vmem:[#allocation2 + $0x2] sm:$0xff]  ;;  %v5493_v48 = vpack.c.bf16 %v3965_v57, %v3964_v60 }
 0x600   : > { %v3968_v11 = vld [vmem:[#allocation2 + $0xa] sm:$0xff]  ;;  %4346 = vst [vmem:[#allocation2 + $0x9] sm:$0x1] %v6639_v2  ;;  %v3969_v13 = vld [vmem:[#allocation2 + $0x12] sm:$0xff] }
 0x601   : > { %v5503_v15 = vpack.c.bf16 %v3968_v11, %v3967_v52  ;;  %v5508_v16 = vpack.c.bf16 %v3969_v13, %v3969_v13  ;;  %5494 = vmatmul.mubr.msk.bf16.vlgmr.msra.gmra.mrb[124].mxu0 %vm7810_vm13, %v5493_v48  ;;  %v3966_v21 = vld [vmem:[#allocation2 + $0x10] sm:$0xff]  ;;  %vm8316_vm13 = vcmp.eq.s32.totalorder %v7029_v17, 6 }
 0x602   : > { %4221 = vmatprep.mubr.bf16.mxu0 %v3980_v10  ;;  %v5498_v8 = vpack.c.bf16 %v3966_v21, %v3966_v21  ;;  %6001 = vmatpush3.bf16.msra.mxu0 %v6580_v28  ;;  %vm4356_vm7 = vmor %vm7762_vm6, %vm8316_vm13 }
 0x603   : > { %6295 = vmatprep.mubr.msk.bf16.mxu1 %vm7856_vm0, %v5503_v15  ;;  %6002 = vmatprep.subr.bf16.mxu0 %v6582_v30  ;;  %vm4357_vm5 = vmor %vm4356_vm7, %vm8317_vm4 }
 0x604   : > { %6296 = vmatmul.mubr.msk.bf16.vlgmr.msra.gmra.mrb[104].mxu1 %vm7866_vm2, %v5508_v16 }
 0x605   : > { %6315 = vmatprep.mubr.msk.bf16.mxu1 %vm8315_vm11, %v6639_v2  ;;  %6300 = vmatpush3.bf16.msra.mxu1 %v6581_v43 }
 0x606   : > { %6301 = vmatprep.subr.bf16.mxu1 %v6639_v2  ;;  %6003 = vmatpush3.bf16.msra.mxu0 %v6583_v3 }
 0x607   : > { %6004 = vmatprep.subr.bf16.mxu0 %v6585_v29 }
 0x609   : > { %5499 = vmatmul.mubr.msk.bf16.gmra.mrb[128].mxu0 %vm7862_vm8, %v5498_v8  ;;  %6302 = vmatpush3.bf16.msra.mxu1 %v6584_v31 }
 0x60a   : > { %6303 = vmatprep.subr.bf16.mxu1 %v6639_v2  ;;  %6005 = vmatpush3.bf16.msra.mxu0 %v6586_v61 }
 0x60b   : > { %6006 = vmatprep.subr.bf16.mxu0 %v6588_v62 }
 0x60d   : > { %6304 = vmatpush3.bf16.msra.mxu1 %v6587_v7 }
 0x60e   : > { %6305 = vmatprep.subr.bf16.mxu1 %v6639_v2  ;;  %6007 = vmatpush3.bf16.msra.mxu0 %v6589_v51 }
 0x60f   : > { %6008 = vmatprep.subr.bf16.mxu0 %v6591_v59 }
 0x611   : > { %6306 = vmatpush3.bf16.msra.mxu1 %v6590_v35 }
 0x612   : > { %6307 = vmatprep.subr.bf16.mxu1 %v6639_v2  ;;  %6009 = vmatpush3.bf16.msra.mxu0 %v6592_v19 }
 0x613   : > { %6010 = vmatprep.subr.bf16.mxu0 %v6594_v50 }
 0x615   : > { %6308 = vmatpush3.bf16.msra.mxu1 %v6593_v9 }
 0x616   : > { %6309 = vmatprep.subr.bf16.mxu1 %v6639_v2  ;;  %6011 = vmatpush3.bf16.msra.mxu0 %v6595_v25 }
 0x617   : > { %6012 = vmatprep.subr.bf16.mxu0 %v6597_v34 }
 0x619   : > { %6310 = vmatpush3.bf16.msra.mxu1 %v6596_v32 }
 0x61a   : > { %6311 = vmatprep.subr.bf16.mxu1 %v6639_v2  ;;  %6013 = vmatpush3.bf16.msra.mxu0 %v6598_v6 }
 0x61b   : > { %6014 = vmatprep.subr.bf16.mxu0 %v6600_v22 }
 0x61d   : > { %6312 = vmatpush3.bf16.msra.mxu1 %v6599_v53 }
 0x61e   : > { %6313 = vmatprep.subr.bf16.mxu1 %v6639_v2  ;;  %6015 = vmatpush3.bf16.msra.mxu0 %v6601_v12 }
 0x61f   : > { %6031 = vmatprep.subr.bf16.mxu0 %v6603_v33 }
 0x621   : > { %6314 = vmatpush3.bf16.msra.mxu1 %v6602_v63 }
 0x622   : > { %6319 = vmatprep.subr.bf16.mxu1 %v6639_v2 }
 0x6d4   : > { %v5978_v20 = vpop.f32.mrb[124].mxu0 }
 0x6d5   : > { %v5979_v0 = vpop.f32.mrb[125].mxu0 }
 0x6d6   : > { %v5980_v37 = vadd.f32 %v5979_v0, %v5978_v20  ;;  %v5981_v38 = vpop.f32.mrb[126].mxu0 }
 0x6d7   : > { %v6297_v39 = vpop.f32.mrb[104].mxu1  ;;  %v5982_v24 = vpop.f32.mrb[127].mxu0 }
 0x6d8   : > { %v4263_v40 = vpop.f32.mrb[105].mxu1  ;;  %v5983_v5 = vadd.f32 %v5982_v24, %v5981_v38  ;;  %v4216_v41 = vadd.f32 %v5980_v37, %v8036_v36 }
 0x6d9   : > { %v6298_v42 = vpop.f32.mrb[106].mxu1 }
 0x6da   : > { %v4266_v23 = vpop.f32.mrb[107].mxu1  ;;  %v4264_v4 = vadd.f32 %v4263_v40, %v4216_v41  ;;  %v4219_v45 = vadd.f32 %v5983_v5, %v8036_v36  ;;  %v6642_v5 = vmov 0   ;;  %v4945_v42 = vld [vmem:[%s8212_s5 + $0x58] sm:$0xff] }
 0x6db   : > { %v4358_v41 = vsel %vm4357_vm5, 1, %v6642_v5 }
 0x6dc   : > { %v4277_v46 = vadd.f32 %v4264_v4, %v7780_v27  ;;  %v4267_v49 = vadd.f32 %v4266_v23, %v4219_v45  ;;  %v5984_v47 = vpop.f32.mrb[128].mxu0  ;;  %vm5600_vm9 = vcmp.ne.s32.totalorder %v4358_v41, 1  ;;  %v6605_v4 = vld [vmem:[%s8210_s3 + $0x80] sm:$0xff]   ;;  %v4944_v41 = vld [vmem:[%s8212_s5 + $0x50] sm:$0xff] }
 0x6dd   : > { %v5985_v26 = vpop.f32.mrb[129].mxu0  ;;  %vm8053_vm15 = vmpackc.low %vm5600_vm9, %vm5600_vm9 }
 0x6de   : > { %4280 = vst [vmem:[#allocation4] sm:$0xff] %v4277_v46  ;;  %v4278_v54 = vadd.f32 %v4267_v49, %v7790_v14  ;;  %v5986_v55 = vadd.f32 %v5985_v26, %v5984_v47  ;;  %v5987_v56 = vpop.f32.mrb[130].mxu0  ;;  %v6606_v49 = vld [vmem:[%s8210_s3 + $0x48] sm:$0xff]  }
 0x6df   : > { %v5988_v58 = vpop.f32.mrb[131].mxu0  ;;  %v6607_v47 = vld [vmem:[%s8210_s3 + $0x8] sm:$0xff]   ;;  %v6611_v56 = vld [vmem:[%s8210_s3 + $0x90] sm:$0xff]  }
 0x6e0   : > { %4281 = vst [vmem:[#allocation4 + $0x8] sm:$0xff] %v4278_v54  ;;  %v4224_v60 = vadd.f32 %v5986_v55, %v8036_v36  ;;  %v6608_v26 = vld [vmem:[%s8210_s3 + $0x88] sm:$0xff]   ;;  %v6609_v54 = vld [vmem:[%s8210_s3 + $0x50] sm:$0xff]   ;;  %v6612_v58 = vld [vmem:[%s8210_s3 + $0x58] sm:$0xff]  }
 0x6e1   : > { %v6610_v55 = vld [vmem:[%s8210_s3 + $0x10] sm:$0xff]  }
 0x6e2   : > { %v4272_v57 = vadd.f32 %v6297_v39, %v4224_v60  ;;  %v6613_v60 = vld [vmem:[%s8210_s3 + $0x18] sm:$0xff]  }
 0x6e4   : > { %v4279_v52 = vadd.f32 %v4272_v57, %v7820_v18  ;;  %v6614_v57 = vld [vmem:[%s8210_s3 + $0x98] sm:$0xff]  }
 0x6e5   : > { %v4283_v48 = vld [vmem:[#allocation4] ss:$2 sm:$0x1]  ;;  %v4284_v11 = vld [vmem:[#allocation4 + $0x1] ss:$2 sm:$0x1] }
 0x6e6   : > { %4282 = vst [vmem:[#allocation4 + $0x10] sm:$0xff] %v4279_v52  ;;  %v4285_v13 = vld [vmem:[#allocation4 + $0x2] ss:$2 sm:$0x1]  ;;  %v4286_v27 = vmax.f32 %v4283_v48, %v4284_v11  ;;  %v6615_v52 = vld [vmem:[%s8210_s3 + $0x60] sm:$0xff]  }
 0x6e7   : > { %v4290_v10 = vld [vmem:[#allocation4 + $0x3] ss:$2 sm:$0x1]  ;;  %v4292_v15 = vld [vmem:[#allocation4 + $0x4] ss:$2 sm:$0x1] }
 0x6e8   : > { %v4294_v16 = vld [vmem:[#allocation4 + $0x5] ss:$2 sm:$0x1]  ;;  %v4287_v21 = vmax.f32 %v4286_v27, %v4285_v13  ;;  %v4295_v8 = vmax.f32 %v4290_v10, %v4292_v15  ;;  %v4299_v14 = vld [vmem:[#allocation4 + $0x6] ss:$2 sm:$0x1] }
 0x6e9   : > { %v4300_v44 = vld [vmem:[#allocation4 + $0x7] ss:$2 sm:$0x1]  ;;  %v4301_v28 = vld [vmem:[#allocation4 + $0x8] ss:$2 sm:$0x1] }
 0x6ea   : > { %v4302_v43 = vmax.f32 %v4299_v14, %v4300_v44  ;;  %v4305_v30 = vld [vmem:[#allocation4 + $0x9] ss:$2 sm:$0x1]  ;;  %4288 = vst [vmem:[#allocation5] sm:$0x1] %v4287_v21  ;;  %v4296_v3 = vmax.f32 %v4295_v8, %v4294_v16  ;;  %v6616_v48 = vld [vmem:[%s8210_s3 + $0x20] sm:$0xff]  }
 0x6eb   : > { %v4307_v31 = vld [vmem:[#allocation4 + $0xa] ss:$2 sm:$0x1]  ;;  %v4314_v61 = vld [vmem:[#allocation4 + $0xc] ss:$2 sm:$0x1] }
 0x6ec   : > { %v4303_v29 = vmax.f32 %v4302_v43, %v4301_v28  ;;  %v4310_v18 = vmax.f32 %v4305_v30, %v4307_v31  ;;  %v4316_v7 = vld [vmem:[#allocation4 + $0xd] ss:$2 sm:$0x1]  ;;  %4297 = vst [vmem:[#allocation5 + $0x1] sm:$0x1] %v4296_v3  ;;  %v6617_v11 = vld [vmem:[%s8210_s3 + $0xa0] sm:$0xff]  }
 0x6ed   : > { %v4309_v62 = vld [vmem:[#allocation4 + $0xb] ss:$2 sm:$0x1]  ;;  %v4317_v51 = vld [vmem:[#allocation4 + $0xe] ss:$2 sm:$0x1]  ;;  %v4318_v35 = vmax.f32 %v4314_v61, %v4316_v7 }
 0x6ee   : > { %4304 = vst [vmem:[#allocation5 + $0x2] sm:$0x1] %v4303_v29  ;;  %v4311_v59 = vmax.f32 %v4310_v18, %v4309_v62  ;;  %v4321_v19 = vld [vmem:[#allocation4 + $0xf] ss:$2 sm:$0x1]  ;;  %v6618_v13 = vld [vmem:[%s8210_s3 + $0x68] sm:$0xff]  }
 0x6ef   : > { %v4322_v9 = vld [vmem:[#allocation4 + $0x10] ss:$2 sm:$0x1]  ;;  %v4319_v50 = vmax.f32 %v4318_v35, %v4317_v51  ;;  %v4329_v32 = vld [vmem:[#allocation4 + $0x12] ss:$2 sm:$0x1] }
 0x6f0   : > { %v4325_v25 = vmax.f32 %v4321_v19, %v4322_v9  ;;  %v4331_v34 = vld [vmem:[#allocation4 + $0x13] ss:$2 sm:$0x1]  ;;  %4312 = vst [vmem:[#allocation5 + $0x3] sm:$0x1] %v4311_v59  ;;  %v6619_v27 = vld [vmem:[%s8210_s3 + $0x28] sm:$0xff]  }
 0x6f1   : > { %v4324_v6 = vld [vmem:[#allocation4 + $0x11] ss:$2 sm:$0x1]  ;;  %v4334_v53 = vmax.f32 %v4329_v32, %v4331_v34  ;;  %v4337_v22 = vld [vmem:[#allocation4 + $0x15] ss:$2 sm:$0x1] }
 0x6f2   : > { %4320 = vst [vmem:[#allocation5 + $0x4] sm:$0x1] %v4319_v50  ;;  %v4326_v12 = vmax.f32 %v4325_v25, %v4324_v6  ;;  %v4333_v63 = vld [vmem:[#allocation4 + $0x14] ss:$2 sm:$0x1]  ;;  %v6620_v10 = vld [vmem:[%s8210_s3 + $0xa8] sm:$0xff]  }
 0x6f3   : > { %v4338_v33 = vld [vmem:[#allocation4 + $0x16] ss:$2 sm:$0x1]  ;;  %v4335_v20 = vmax.f32 %v4334_v53, %v4333_v63  ;;  %v4339_v37 = vld [vmem:[#allocation4 + $0x17] ss:$2 sm:$0x1] }
 0x6f4   : > { %v4340_v0 = vmax.f32 %v4337_v22, %v4338_v33  ;;  %4327 = vst [vmem:[#allocation5 + $0x5] sm:$0x1] %v4326_v12  ;;  %v6621_v15 = vld [vmem:[%s8210_s3 + $0x70] sm:$0xff]   ;;  %v6624_v8 = vld [vmem:[%s8210_s3 + $0x78] sm:$0xff]   ;;  %v6643_v28 = vmov 0.0|0.0   ;;  %v4934_v9 = vld [vmem:[%s8212_s5] sm:$0xff] }
 0x6f5   : > { %4336 = vst [vmem:[#allocation5 + $0x6] sm:$0x1] %v4335_v20  ;;  %v6622_v16 = vld [vmem:[%s8210_s3 + $0x30] sm:$0xff]   ;;  %v6625_v14 = vld [vmem:[%s8210_s3 + $0x38] sm:$0xff]   ;;  %v4935_v50 = vld [vmem:[%s8212_s5 + $0x8] sm:$0xff] }
 0x6f6   : > { %v4341_v38 = vmax.f32 %v4340_v0, %v4339_v37  ;;  %v6623_v21 = vld [vmem:[%s8210_s3 + $0xb0] sm:$0xff]   ;;  %v6626_v44 = vld [vmem:[%s8210_s3 + $0xb8] sm:$0xff]   ;;  %v6375_v34 = vpack.c.bf16 %v4935_v50, %v4934_v9  ;;  %v4938_v33 = vld [vmem:[%s8212_s5 + $0x20] sm:$0xff] }
 0x6f7   : > { %v4936_v22 = vld [vmem:[%s8212_s5 + $0x10] sm:$0xff]  ;;  %v4937_v12 = vld [vmem:[%s8212_s5 + $0x18] sm:$0xff]  ;;  %v4939_v20 = vld [vmem:[%s8212_s5 + $0x28] sm:$0xff] }
 0x6f8   : > { %4342 = vst [vmem:[#allocation5 + $0x7] sm:$0x1] %v4341_v38  ;;  %v6378_v63 = vpack.c.bf16 %v4937_v12, %v4936_v22  ;;  %v6381_v0 = vpack.c.bf16 %v4939_v20, %v4938_v33  ;;  %v4940_v37 = vld [vmem:[%s8212_s5 + $0x30] sm:$0xff] }
 0x6ff   : > { %v8050_v39 = vld [vmem:[#allocation5] sm:$0xff] }
 0x700   : > { %v4344_v24 = vmax.f32 %v8050_v39, 0.0 }
 0x702   : > { %v4363_v40 = vpack.c.bf16 %v4344_v24, %v4344_v24  ;;  %4345 = vst [vmem:[#allocation2 + $0x1] sm:$0xff] %v4344_v24  ;;  %v4942_v24 = vld [vmem:[%s8212_s5 + $0x40] sm:$0xff] }
 0x704   : > { %4596 = vmatprep.mubr.bf16.mxu0 %v4363_v40  ;;  %v4943_v40 = vld [vmem:[%s8212_s5 + $0x48] sm:$0xff] }
 0x705   : > { %v6387_v5 = vpack.c.bf16 %v4943_v40, %v4942_v24 }
 0x709   : > { %v4347_v17 = vld [vmem:[#allocation2] sm:$0xff] }
 0x70a   : > { %v4348_v23 = vld [vmem:[#allocation2 + $0x2] sm:$0xff]  ;;  %v5538_v45 = vpack.c.bf16 %v4347_v17, %v4347_v17 }
 0x70b   : > { %v5543_v46 = vpack.c.bf16 %v4348_v23, %v4348_v23  ;;  %4646 = vst [vmem:[#allocation2 + $0x9] sm:$0x1] %v6639_v2  ;;  %v4946_v17 = vld [vmem:[%s8212_s5 + $0x60] sm:$0xff]  ;;  %v4947_v23 = vld [vmem:[%s8212_s5 + $0x68] sm:$0xff] }
 0x70c   : > { %5539 = vmatmul.mubr.msk.bf16.vlgmr.msra.gmra.mrb[132].mxu0 %vm8053_vm15, %v5538_v45  ;;  %v4948_v45 = vld [vmem:[%s8212_s5 + $0x70] sm:$0xff] }
 0x70d   : > { %6316 = vmatmul.mubr.msk.bf16.vlgmr.msra.gmra.mrb[108].mxu1 %vm8053_vm15, %v5543_v46  ;;  %6032 = vmatpush3.bf16.msra.mxu0 %v6604_v1  ;;  %v6390_v1 = vpack.c.bf16 %v4945_v42, %v4944_v41  ;;  %v4949_v46 = vld [vmem:[%s8212_s5 + $0x78] sm:$0xff] }
 0x70e   : > { %6320 = vmatpush3.bf16.msra.mxu1 %v6605_v4  ;;  %6033 = vmatprep.subr.bf16.mxu0 %v6606_v49  ;;  %v6393_v4 = vpack.c.bf16 %v4947_v23, %v4946_v17  ;;  %v6396_v49 = vpack.c.bf16 %v4949_v46, %v4948_v45 }
 0x70f   : > { %6321 = vmatprep.subr.bf16.mxu1 %v6639_v2  ;;  %6335 = vmatprep.mubr.msk.bf16.mxu1 %vm8315_vm11, %v6639_v2 }
 0x711   : > { %6034 = vmatpush3.bf16.msra.mxu0 %v6607_v47 }
 0x712   : > { %6322 = vmatpush3.bf16.msra.mxu1 %v6608_v26  ;;  %6035 = vmatprep.subr.bf16.mxu0 %v6609_v54 }
 0x713   : > { %6323 = vmatprep.subr.bf16.mxu1 %v6639_v2 }
 0x715   : > { %6036 = vmatpush3.bf16.msra.mxu0 %v6610_v55 }
 0x716   : > { %6324 = vmatpush3.bf16.msra.mxu1 %v6611_v56  ;;  %6037 = vmatprep.subr.bf16.mxu0 %v6612_v58 }
 0x717   : > { %6325 = vmatprep.subr.bf16.mxu1 %v6639_v2 }
 0x719   : > { %6038 = vmatpush3.bf16.msra.mxu0 %v6613_v60 }
 0x71a   : > { %6326 = vmatpush3.bf16.msra.mxu1 %v6614_v57  ;;  %6039 = vmatprep.subr.bf16.mxu0 %v6615_v52 }
 0x71b   : > { %6327 = vmatprep.subr.bf16.mxu1 %v6639_v2 }
 0x71d   : > { %6040 = vmatpush3.bf16.msra.mxu0 %v6616_v48 }
 0x71e   : > { %6328 = vmatpush3.bf16.msra.mxu1 %v6617_v11  ;;  %6041 = vmatprep.subr.bf16.mxu0 %v6618_v13 }
 0x71f   : > { %6329 = vmatprep.subr.bf16.mxu1 %v6639_v2 }
 0x721   : > { %6042 = vmatpush3.bf16.msra.mxu0 %v6619_v27  ;;  %v5580_v27 = vld [vmem:[%s8213_s6] ss:$0 sm:$0xff] }
 0x722   : > { %6330 = vmatpush3.bf16.msra.mxu1 %v6620_v10  ;;  %6043 = vmatprep.subr.bf16.mxu0 %v6621_v15 }
 0x723   : > { %6331 = vmatprep.subr.bf16.mxu1 %v6639_v2 }
 0x725   : > { %6044 = vmatpush3.bf16.msra.mxu0 %v6622_v16 }
 0x726   : > { %6332 = vmatpush3.bf16.msra.mxu1 %v6623_v21  ;;  %6045 = vmatprep.subr.bf16.mxu0 %v6624_v8 }
 0x727   : > { %6333 = vmatprep.subr.bf16.mxu1 %v6639_v2 }
 0x729   : > { %6046 = vmatpush3.bf16.msra.mxu0 %v6625_v14 }
 0x72a   : > { %6334 = vmatpush3.bf16.msra.mxu1 %v6626_v44  ;;  %6374 = vmatprep.subr.bf16.mxu0 %v6643_v28 }
 0x7df   : > { %v6016_v43 = vpop.f32.mrb[132].mxu0 }
 0x7e0   : > { %v4638_v30 = vpop.f32.mrb[108].mxu1  ;;  %v6017_v3 = vpop.f32.mrb[133].mxu0 }
 0x7e1   : > { %v6317_v31 = vpop.f32.mrb[109].mxu1  ;;  %v6018_v29 = vadd.f32 %v6017_v3, %v6016_v43  ;;  %v6019_v18 = vpop.f32.mrb[134].mxu0 }
 0x7e2   : > { %v4641_v61 = vpop.f32.mrb[110].mxu1  ;;  %v6020_v7 = vpop.f32.mrb[135].mxu0 }
 0x7e3   : > { %v6318_v62 = vpop.f32.mrb[111].mxu1  ;;  %v4599_v51 = vadd.f32 %v6018_v29, %v8036_v36 }
 0x7e5   : > { %v4639_v35 = vadd.f32 %v4638_v30, %v4599_v51 }
 0x7e7   : > { %v4644_v59 = vmax.f32 %v4639_v35, 0.0 }
 0x7e9   : > { %4645 = vst [vmem:[#allocation2 + $0x1] sm:$0xff] %v4644_v59  ;;  %v4652_v19 = vpack.c.bf16 %v4644_v59, %v4644_v59 }
 0x7eb   : > { %4885 = vmatprep.mubr.bf16.mxu0 %v4652_v19 }
 0x7f0   : > { %v4647_v25 = vld [vmem:[#allocation2] sm:$0xff] }
 0x7f1   : > { %v4648_v32 = vld [vmem:[#allocation2 + $0x2] sm:$0xff]  ;;  %v5573_v6 = vpack.c.bf16 %v4647_v25, %v4647_v25 }
 0x7f2   : > { %v5578_v53 = vpack.c.bf16 %v4648_v32, %v4648_v32 }
 0x7f3   : > { %5574 = vmatmul.mubr.msk.bf16.vlgmr.msra.gmra.mrb[136].mxu0 %vm8053_vm15, %v5573_v6 }
 0x7f4   : > { %6336 = vmatmul.mubr.msk.bf16.vlgmr.msra.gmra.mrb[112].mxu1 %vm8053_vm15, %v5578_v53  ;;  %6376 = vmatpush3.bf16.msra.mxu0 %v6375_v34 }
 0x7f5   : > { %6371 = vmatprep.mubr.msk.f32.mxu0 %vm8315_vm11, %v6639_v2  ;;  %6377 = vmatprep.subr.bf16.mxu0 %v6643_v28  ;;  %v4941_v2 = vld [vmem:[%s8212_s5 + $0x38] sm:$0xff] }
 0x7f6   : > { %v6384_v38 = vpack.c.bf16 %v4941_v2, %v4940_v37 }
 0x7f8   : > { %6379 = vmatpush3.bf16.msra.mxu0 %v6378_v63 }
 0x7f9   : > { %6380 = vmatprep.subr.bf16.mxu0 %v6643_v28 }
 0x7fc   : > { %6382 = vmatpush3.bf16.msra.mxu0 %v6381_v0 }
 0x7fd   : > { %6383 = vmatprep.subr.bf16.mxu0 %v6643_v28 }
 0x800   : > { %6385 = vmatpush3.bf16.msra.mxu0 %v6384_v38 }
 0x801   : > { %6386 = vmatprep.subr.bf16.mxu0 %v6643_v28 }
 0x804   : > { %6388 = vmatpush3.bf16.msra.mxu0 %v6387_v5 }
 0x805   : > { %6389 = vmatprep.subr.bf16.mxu0 %v6643_v28 }
 0x808   : > { %6391 = vmatpush3.bf16.msra.mxu0 %v6390_v1 }
 0x809   : > { %6392 = vmatprep.subr.bf16.mxu0 %v6643_v28 }
 0x80c   : > { %6394 = vmatpush3.bf16.msra.mxu0 %v6393_v4 }
 0x80d   : > { %6395 = vmatprep.subr.bf16.mxu0 %v6643_v28 }
 0x810   : > { %6397 = vmatpush3.bf16.msra.mxu0 %v6396_v49 }
 0x8c6   : > { %v6047_v47 = vpop.f32.mrb[136].mxu0 }
 0x8c7   : > { %v4927_v26 = vpop.f32.mrb[112].mxu1  ;;  %v6048_v54 = vpop.f32.mrb[137].mxu0 }
 0x8c8   : > { %v6337_v55 = vpop.f32.mrb[113].mxu1  ;;  %v6049_v56 = vadd.f32 %v6048_v54, %v6047_v47  ;;  %v6050_v58 = vpop.f32.mrb[138].mxu0 }
 0x8c9   : > { %v4930_v60 = vpop.f32.mrb[114].mxu1  ;;  %v6051_v57 = vpop.f32.mrb[139].mxu0 }
 0x8ca   : > { %v6338_v52 = vpop.f32.mrb[115].mxu1  ;;  %v4888_v48 = vadd.f32 %v6049_v56, %v8036_v36 }
 0x8cc   : > { %v4928_v11 = vadd.f32 %v4927_v26, %v4888_v48 }
 0x8ce   : > { %v4933_v13 = vadd.f32 %v4928_v11, %v8050_v39 }
 0x8d0   : > { %6372 = vmatmul.mubr.f32.vlgmr.msra.gmra.mrb[140].mxu0 %v4933_v13 }
 0x9a3   : > { %v5023_v10 = vpop.f32.mrb[140].mxu0 }
 0x9a4   : > { %v5024_v15 = vadd.f32 %v5580_v27, %v5023_v10  ;;  %v6373_v16 = vpop.f32.mrb[141].mxu0 }
 0x9a6   : > { %v5027_v21 = vand.u32 2147483647, %v5024_v15  ;;  %vm5031_vm6 = vcmp.ge.f32.partialorder %v5024_v15, 0.0 }
 0x9a8   : > { %v5028_v8 = vsub.f32 0.0, %v5027_v21 }
 0x9aa   : > { %v5029_v14 = vmul.f32 1.442695, %v5028_v8 }
 0x9ac   : > { %6627 = vpow2.f32 %v5029_v14 }
 0x9b6   : > { %v6628_v44 = vpop.eup %6627 }
 0x9b7   : > { %v5033_v28 = vadd.f32 1.0, %v6628_v44  ;;  %v5032_v39 = vsel %vm5031_vm6, 1.0, %v6628_v44 }
 0x9b9   : > { %6629 = vrcp.f32 %v5033_v28 }
 0x9c3   : > { %v6630_v36 = vpop.eup %6629 }
 0x9c4   : > { %v5035_v43 = vmul.f32 %v6630_v36, %v5032_v39 }
 0x9c6   : > { %5037 = vst.msk [vmem:[%s276_s22] sm:$0xff] %vm5036_vm12, %v5035_v43 }
 0x9c7 PF: > { %s17_s24 = sadd.s32 1, %s6637_s24  }
 0x9c8   : > { %p14_p4 = scmp.ge.s32.totalorder %s17_s24, 4  }
 0x9ca   :  { %16 = sbr.rel (!%p14_p4) target bundleno = 1 (0x1), region = 125 }

</bundles_post_ra>
